<compile_context>
chip_gen: v5e
topology: v5e:2x2
jax: 0.10.0
libtpu: 0.0.40
codegen_flags: <defaults>
</compile_context>

<pallas_src>
import functools

import jax
import jax.numpy as jnp
from jax.experimental import pallas as pl
from jax.experimental.pallas import tpu as pltpu


# ----------------------------- fused Pallas kernel ---------------------------

def _manipulator_kernel(ma_ref, mb_ref,
                        wg_ref, bg_ref, wf_ref, bf_ref,
                        wr1_ref, br1_ref, wr2_ref, br2_ref,
                        out_ref, *, H, W, C):
    """One batch element per grid step; all activations stay register/VMEM resident.

    ma_ref / mb_ref / out_ref : (1, C, H*W) f32   channel-major, spatial on lanes
    w*_ref : (C, 9*C) bf16     weight matrix, columns ordered (kh, kw, cin)
    b*_ref : (C, 1)  f32       conv bias
    """
    HW = H * W

    # Flattened-spatial boundary masks (computed once, shared by all four convs).
    idx = jax.lax.broadcasted_iota(jnp.int32, (C, HW), 1)
    if W & (W - 1) == 0:
        col = jnp.bitwise_and(idx, W - 1)          # W is a power of two
    else:
        col = jax.lax.rem(idx, W)
    is_w0 = col == 0
    is_wL = col == W - 1
    is_h0 = idx < W
    is_hL = idx >= HW - W

    def conv3x3_reflect(x, w_ref, b_ref, relu):
        # x: (C, HW) f32.  3x3 conv with ReflectionPad2d(1) as ONE MXU matmul:
        #   out(C, HW) = W(C, 9C) @ patch(9C, HW)
        # The nine (C, HW) row-blocks of `patch` are the reflection-shifted views
        # of x, built from lane rotations (XLU) + boundary selects (VPU); every
        # wrap-around lane of a roll is overridden by the reflection mask.
        xl = pltpu.roll(x, 1, 1)          # value at flattened idx-1  (column w-1)
        xr = pltpu.roll(x, HW - 1, 1)     # value at flattened idx+1  (column w+1)
        c0 = jnp.where(is_w0, xr, xl)     # kw=0: column w-1, reflected at w == 0
        c2 = jnp.where(is_wL, xl, xr)     # kw=2: column w+1, reflected at w == W-1

        pieces = [None] * 9
        for kw, c in enumerate((c0, x, c2)):
            cu = pltpu.roll(c, W, 1)          # value at row h-1
            cd = pltpu.roll(c, HW - W, 1)     # value at row h+1
            pieces[0 * 3 + kw] = jnp.where(is_h0, cd, cu)   # kh=0, reflected at h == 0
            pieces[1 * 3 + kw] = c                          # kh=1
            pieces[2 * 3 + kw] = jnp.where(is_hL, cu, cd)   # kh=2, reflected at h == H-1

        patch = jnp.concatenate(pieces, axis=0).astype(jnp.bfloat16)   # (9C, HW)
        y = jnp.dot(w_ref[...], patch,
                    preferred_element_type=jnp.float32) + b_ref[...]
        return jnp.maximum(y, 0.0) if relu else y

    # diff = m_b - m_a
    d = mb_ref[0] - ma_ref[0]
    # diff = g_(diff)                          ReflectionPad2d(1) + Conv3x3 + ReLU
    d = conv3x3_reflect(d, wg_ref, bg_ref, relu=True)
    # diff = f_(diff * (amp_factor - 1.0));    the scale is folded into wf host-side
    d = conv3x3_reflect(d, wf_ref, bf_ref, relu=False)
    # diff = ResBlock(32, 32, 1): diff + conv_b(ReLU(conv_a(diff)))
    r = conv3x3_reflect(d, wr1_ref, br1_ref, relu=True)
    r = conv3x3_reflect(r, wr2_ref, br2_ref, relu=False)
    d = d + r
    # out = m_b + diff
    out_ref[0] = (mb_ref[0] + d).astype(out_ref.dtype)


# ------------------------------ host-side wrapper -----------------------------

def _prep_conv(w, b, scale=None):
    # PyTorch layout (Cout, Cin, KH, KW) -> (Cout, KH*KW*Cin), columns ordered
    # (kh, kw, cin) to match the patch row-block order; bf16 for the MXU.
    cout, cin, kh, kw = w.shape
    w_mat = jnp.transpose(w, (0, 2, 3, 1)).reshape(cout, kh * kw * cin)
    if scale is not None:
        w_mat = w_mat * scale
    return w_mat.astype(jnp.bfloat16), b.reshape(cout, 1).astype(jnp.float32)


def manipulator_forward(params, m_a, m_b, amp_factor):
    """m_a, m_b: (N, C, H, W) f32; amp_factor: scalar. Returns (N, C, H, W) f32."""
    N, C, H, W = m_a.shape
    HW = H * W
    # NCHW is already channel-major: flattening (H, W) is a free reshape (no transpose).
    ma = m_a.reshape(N, C, HW)
    mb = m_b.reshape(N, C, HW)

    amp = jnp.asarray(amp_factor, jnp.float32)
    wg, bg = _prep_conv(params["g"]["w"], params["g"]["b"])
    # f_ is linear in its input, so `diff * (amp - 1)` is folded into f_'s weights.
    wf, bf = _prep_conv(params["f"]["w"], params["f"]["b"], scale=amp - 1.0)
    wr1, br1 = _prep_conv(params["res_a"]["w"], params["res_a"]["b"])
    wr2, br2 = _prep_conv(params["res_b"]["w"], params["res_b"]["b"])

    kernel = functools.partial(_manipulator_kernel, H=H, W=W, C=C)

    act_spec = pl.BlockSpec((1, C, HW), lambda b: (b, 0, 0))
    w_spec = pl.BlockSpec((C, 9 * C), lambda b: (0, 0))
    b_spec = pl.BlockSpec((C, 1), lambda b: (0, 0))

    out = pl.pallas_call(
        kernel,
        out_shape=jax.ShapeDtypeStruct((N, C, HW), jnp.float32),
        grid=(N,),
        in_specs=[
            act_spec, act_spec,      # m_a, m_b
            w_spec, b_spec,          # g_
            w_spec, b_spec,          # f_   ((amp - 1) folded in)
            w_spec, b_spec,          # ResBlock conv a
            w_spec, b_spec,          # ResBlock conv b
        ],
        out_specs=act_spec,
        compiler_params=pltpu.CompilerParams(
            dimension_semantics=("parallel",),   # batch axis -> megacore sharding
        ),
    )(ma, mb, wg, bg, wf, bf, wr1, br1, wr2, br2)

    return out.reshape(N, C, H, W)


# ------------------------------- parameters -----------------------------------

def _init_conv(key, cout, cin, kh=3, kw=3):
    k1, k2 = jax.random.split(key)
    fan_in = cin * kh * kw
    bound = 1.0 / (fan_in ** 0.5)
    w = jax.random.uniform(k1, (cout, cin, kh, kw), jnp.float32, -bound, bound)
    b = jax.random.uniform(k2, (cout,), jnp.float32, -bound, bound)
    return {"w": w, "b": b}


def init_manipulator_params(key, channels=32):
    ks = jax.random.split(key, 4)
    return {
        "g": _init_conv(ks[0], channels, channels),       # self.g_ conv
        "f": _init_conv(ks[1], channels, channels),       # self.f_ conv
        "res_a": _init_conv(ks[2], channels, channels),   # ResBlock conv 1
        "res_b": _init_conv(ks[3], channels, channels),   # ResBlock conv 2
    }


# --------------------------- pure-JAX reference --------------------------------

def _ref_conv(x, w, b, relu):
    xp = jnp.pad(x, ((0, 0), (0, 0), (1, 1), (1, 1)), mode="reflect")
    y = jax.lax.conv_general_dilated(
        xp, w, window_strides=(1, 1), padding="VALID",
        dimension_numbers=("NCHW", "OIHW", "NCHW"))
    y = y + b.reshape(1, -1, 1, 1)
    return jnp.maximum(y, 0.0) if relu else y


def manipulator_reference(params, m_a, m_b, amp_factor):
    d = m_b - m_a
    d = _ref_conv(d, params["g"]["w"], params["g"]["b"], True)
    d = d * (amp_factor - 1.0)
    d = _ref_conv(d, params["f"]["w"], params["f"]["b"], False)
    r = _ref_conv(d, params["res_a"]["w"], params["res_a"]["b"], True)
    r = _ref_conv(r, params["res_b"]["w"], params["res_b"]["b"], False)
    d = d + r
    return m_b + d


# ----------------------------------- main --------------------------------------

if __name__ == "__main__":
    key = jax.random.PRNGKey(0)
    kp, ka, kb = jax.random.split(key, 3)
    N, C, H, W = 2, 32, 16, 16          # Manipulator operates on 32-channel maps
    params = init_manipulator_params(kp, C)
    m_a = jax.random.normal(ka, (N, C, H, W), jnp.float32)
    m_b = jax.random.normal(kb, (N, C, H, W), jnp.float32)
    amp_factor = 2.5

    fwd = jax.jit(manipulator_forward)
    out = fwd(params, m_a, m_b, amp_factor)
    jax.block_until_ready(out)

    assert out.shape == (N, C, H, W), out.shape
    ref = manipulator_reference(params, m_a, m_b, amp_factor)
    abs_err = float(jnp.max(jnp.abs(out - ref)))
    rel_err = abs_err / (float(jnp.max(jnp.abs(ref))) + 1e-6)
    # bf16 MXU operands with f32 accumulation -> small, bounded mismatch vs f32 reference
    assert abs_err < 1e-1 and rel_err < 3e-2, (abs_err, rel_err)
    print("KERNEL_OK")
</pallas_src>

<mosaic_0001>
module attributes {stable_mosaic.version = 11 : i64} {
  func.func @_manipulator_kernel(%arg0: i32, %arg1: memref<1x32x256xf32, #tpu.memory_space<vmem>>, %arg2: memref<1x32x256xf32, #tpu.memory_space<vmem>>, %arg3: memref<32x288xbf16, #tpu.memory_space<vmem>>, %arg4: memref<32x1xf32, #tpu.memory_space<vmem>>, %arg5: memref<32x288xbf16, #tpu.memory_space<vmem>>, %arg6: memref<32x1xf32, #tpu.memory_space<vmem>>, %arg7: memref<32x288xbf16, #tpu.memory_space<vmem>>, %arg8: memref<32x1xf32, #tpu.memory_space<vmem>>, %arg9: memref<32x288xbf16, #tpu.memory_space<vmem>>, %arg10: memref<32x1xf32, #tpu.memory_space<vmem>>, %arg11: memref<1x32x256xf32, #tpu.memory_space<vmem>>) attributes {dimension_semantics = [#tpu.dimension_semantics<parallel>], iteration_bounds = array<i64: 2>, scalar_prefetch = 0 : i64, scratch_operands = 0 : i64, tpu.core_type = #tpu.core_type<tc>, window_params = [{transform_indices = @transform_0, window_bounds = array<i64: 1, 32, 256>}, {transform_indices = @transform_1, window_bounds = array<i64: 1, 32, 256>}, {pipeline_mode = #tpu.pipeline_mode<synchronous>, transform_indices = @transform_2, window_bounds = array<i64: 32, 288>}, {pipeline_mode = #tpu.pipeline_mode<synchronous>, transform_indices = @transform_3, window_bounds = array<i64: 32, 1>}, {pipeline_mode = #tpu.pipeline_mode<synchronous>, transform_indices = @transform_4, window_bounds = array<i64: 32, 288>}, {pipeline_mode = #tpu.pipeline_mode<synchronous>, transform_indices = @transform_5, window_bounds = array<i64: 32, 1>}, {pipeline_mode = #tpu.pipeline_mode<synchronous>, transform_indices = @transform_6, window_bounds = array<i64: 32, 288>}, {pipeline_mode = #tpu.pipeline_mode<synchronous>, transform_indices = @transform_7, window_bounds = array<i64: 32, 1>}, {pipeline_mode = #tpu.pipeline_mode<synchronous>, transform_indices = @transform_8, window_bounds = array<i64: 32, 288>}, {pipeline_mode = #tpu.pipeline_mode<synchronous>, transform_indices = @transform_9, window_bounds = array<i64: 32, 1>}, {transform_indices = @transform_10, window_bounds = array<i64: 1, 32, 256>}]} {
    %0 = tpu.iota {dimensions = array<i32: 1>} : vector<32x256xi32>
    %c15_i32 = arith.constant 15 : i32
    %1 = vector.broadcast %c15_i32 : i32 to vector<32x256xi32>
    %2 = arith.andi %0, %1 : vector<32x256xi32>
    %c0_i32 = arith.constant 0 : i32
    %3 = vector.broadcast %c0_i32 : i32 to vector<32x256xi32>
    %4 = arith.cmpi eq, %2, %3 : vector<32x256xi32>
    %c15_i32_0 = arith.constant 15 : i32
    %5 = vector.broadcast %c15_i32_0 : i32 to vector<32x256xi32>
    %6 = arith.cmpi eq, %2, %5 : vector<32x256xi32>
    %c16_i32 = arith.constant 16 : i32
    %7 = vector.broadcast %c16_i32 : i32 to vector<32x256xi32>
    %8 = arith.cmpi slt, %0, %7 : vector<32x256xi32>
    %c240_i32 = arith.constant 240 : i32
    %9 = vector.broadcast %c240_i32 : i32 to vector<32x256xi32>
    %10 = arith.cmpi sge, %0, %9 : vector<32x256xi32>
    %c0 = arith.constant 0 : index
    %c0_1 = arith.constant 0 : index
    %c0_2 = arith.constant 0 : index
    %11 = vector.load %arg2[%c0, %c0_1, %c0_2] : memref<1x32x256xf32, #tpu.memory_space<vmem>>, vector<1x32x256xf32>
    %12 = vector.shape_cast %11 : vector<1x32x256xf32> to vector<32x256xf32>
    %c0_3 = arith.constant 0 : index
    %c0_4 = arith.constant 0 : index
    %c0_5 = arith.constant 0 : index
    %13 = vector.load %arg1[%c0_3, %c0_4, %c0_5] : memref<1x32x256xf32, #tpu.memory_space<vmem>>, vector<1x32x256xf32>
    %14 = vector.shape_cast %13 : vector<1x32x256xf32> to vector<32x256xf32>
    %15 = arith.subf %12, %14 : vector<32x256xf32>
    %c1_i32 = arith.constant 1 : i32
    %16 = tpu.dynamic_rotate %15 by %c1_i32 dim 1 : vector<32x256xf32>, i32 -> vector<32x256xf32>
    %c255_i32 = arith.constant 255 : i32
    %17 = tpu.dynamic_rotate %15 by %c255_i32 dim 1 : vector<32x256xf32>, i32 -> vector<32x256xf32>
    %18 = arith.select %4, %17, %16 : vector<32x256xi1>, vector<32x256xf32>
    %19 = arith.select %6, %16, %17 : vector<32x256xi1>, vector<32x256xf32>
    %c16_i32_6 = arith.constant 16 : i32
    %20 = tpu.dynamic_rotate %18 by %c16_i32_6 dim 1 : vector<32x256xf32>, i32 -> vector<32x256xf32>
    %c240_i32_7 = arith.constant 240 : i32
    %21 = tpu.dynamic_rotate %18 by %c240_i32_7 dim 1 : vector<32x256xf32>, i32 -> vector<32x256xf32>
    %22 = arith.select %8, %21, %20 : vector<32x256xi1>, vector<32x256xf32>
    %23 = arith.select %10, %20, %21 : vector<32x256xi1>, vector<32x256xf32>
    %c16_i32_8 = arith.constant 16 : i32
    %24 = tpu.dynamic_rotate %15 by %c16_i32_8 dim 1 : vector<32x256xf32>, i32 -> vector<32x256xf32>
    %c240_i32_9 = arith.constant 240 : i32
    %25 = tpu.dynamic_rotate %15 by %c240_i32_9 dim 1 : vector<32x256xf32>, i32 -> vector<32x256xf32>
    %26 = arith.select %8, %25, %24 : vector<32x256xi1>, vector<32x256xf32>
    %27 = arith.select %10, %24, %25 : vector<32x256xi1>, vector<32x256xf32>
    %c16_i32_10 = arith.constant 16 : i32
    %28 = tpu.dynamic_rotate %19 by %c16_i32_10 dim 1 : vector<32x256xf32>, i32 -> vector<32x256xf32>
    %c240_i32_11 = arith.constant 240 : i32
    %29 = tpu.dynamic_rotate %19 by %c240_i32_11 dim 1 : vector<32x256xf32>, i32 -> vector<32x256xf32>
    %30 = arith.select %8, %29, %28 : vector<32x256xi1>, vector<32x256xf32>
    %31 = arith.select %10, %28, %29 : vector<32x256xi1>, vector<32x256xf32>
    %32 = tpu.concatenate %22, %26, %30, %18, %15, %19, %23, %27, %31 in 0 : vector<32x256xf32>, vector<32x256xf32>, vector<32x256xf32>, vector<32x256xf32>, vector<32x256xf32>, vector<32x256xf32>, vector<32x256xf32>, vector<32x256xf32>, vector<32x256xf32> -> vector<288x256xf32>
    %33 = arith.truncf %32 : vector<288x256xf32> to vector<288x256xbf16>
    %c0_12 = arith.constant 0 : index
    %c0_13 = arith.constant 0 : index
    %34 = vector.load %arg3[%c0_12, %c0_13] : memref<32x288xbf16, #tpu.memory_space<vmem>>, vector<32x288xbf16>
    %cst = arith.constant dense<0.000000e+00> : vector<32x256xf32>
    %35 = tpu.matmul %34, %33, %cst {dimension_numbers = #tpu.dot_dimension_numbers<[1], [0], [0], [1], [0, 0, 1, 1], [], []>} : vector<32x288xbf16>, vector<288x256xbf16>, vector<32x256xf32> -> vector<32x256xf32>
    %c0_14 = arith.constant 0 : index
    %c0_15 = arith.constant 0 : index
    %36 = vector.load %arg4[%c0_14, %c0_15] : memref<32x1xf32, #tpu.memory_space<vmem>>, vector<32x1xf32>
    %37 = vector.broadcast %36 : vector<32x1xf32> to vector<32x256xf32>
    %38 = arith.addf %35, %37 : vector<32x256xf32>
    %cst_16 = arith.constant 0.000000e+00 : f32
    %39 = vector.broadcast %cst_16 : f32 to vector<32x256xf32>
    %40 = arith.maximumf %38, %39 : vector<32x256xf32>
    %c1_i32_17 = arith.constant 1 : i32
    %41 = tpu.dynamic_rotate %40 by %c1_i32_17 dim 1 : vector<32x256xf32>, i32 -> vector<32x256xf32>
    %c255_i32_18 = arith.constant 255 : i32
    %42 = tpu.dynamic_rotate %40 by %c255_i32_18 dim 1 : vector<32x256xf32>, i32 -> vector<32x256xf32>
    %43 = arith.select %4, %42, %41 : vector<32x256xi1>, vector<32x256xf32>
    %44 = arith.select %6, %41, %42 : vector<32x256xi1>, vector<32x256xf32>
    %c16_i32_19 = arith.constant 16 : i32
    %45 = tpu.dynamic_rotate %43 by %c16_i32_19 dim 1 : vector<32x256xf32>, i32 -> vector<32x256xf32>
    %c240_i32_20 = arith.constant 240 : i32
    %46 = tpu.dynamic_rotate %43 by %c240_i32_20 dim 1 : vector<32x256xf32>, i32 -> vector<32x256xf32>
    %47 = arith.select %8, %46, %45 : vector<32x256xi1>, vector<32x256xf32>
    %48 = arith.select %10, %45, %46 : vector<32x256xi1>, vector<32x256xf32>
    %c16_i32_21 = arith.constant 16 : i32
    %49 = tpu.dynamic_rotate %40 by %c16_i32_21 dim 1 : vector<32x256xf32>, i32 -> vector<32x256xf32>
    %c240_i32_22 = arith.constant 240 : i32
    %50 = tpu.dynamic_rotate %40 by %c240_i32_22 dim 1 : vector<32x256xf32>, i32 -> vector<32x256xf32>
    %51 = arith.select %8, %50, %49 : vector<32x256xi1>, vector<32x256xf32>
    %52 = arith.select %10, %49, %50 : vector<32x256xi1>, vector<32x256xf32>
    %c16_i32_23 = arith.constant 16 : i32
    %53 = tpu.dynamic_rotate %44 by %c16_i32_23 dim 1 : vector<32x256xf32>, i32 -> vector<32x256xf32>
    %c240_i32_24 = arith.constant 240 : i32
    %54 = tpu.dynamic_rotate %44 by %c240_i32_24 dim 1 : vector<32x256xf32>, i32 -> vector<32x256xf32>
    %55 = arith.select %8, %54, %53 : vector<32x256xi1>, vector<32x256xf32>
    %56 = arith.select %10, %53, %54 : vector<32x256xi1>, vector<32x256xf32>
    %57 = tpu.concatenate %47, %51, %55, %43, %40, %44, %48, %52, %56 in 0 : vector<32x256xf32>, vector<32x256xf32>, vector<32x256xf32>, vector<32x256xf32>, vector<32x256xf32>, vector<32x256xf32>, vector<32x256xf32>, vector<32x256xf32>, vector<32x256xf32> -> vector<288x256xf32>
    %58 = arith.truncf %57 : vector<288x256xf32> to vector<288x256xbf16>
    %c0_25 = arith.constant 0 : index
    %c0_26 = arith.constant 0 : index
    %59 = vector.load %arg5[%c0_25, %c0_26] : memref<32x288xbf16, #tpu.memory_space<vmem>>, vector<32x288xbf16>
    %cst_27 = arith.constant dense<0.000000e+00> : vector<32x256xf32>
    %60 = tpu.matmul %59, %58, %cst_27 {dimension_numbers = #tpu.dot_dimension_numbers<[1], [0], [0], [1], [0, 0, 1, 1], [], []>} : vector<32x288xbf16>, vector<288x256xbf16>, vector<32x256xf32> -> vector<32x256xf32>
    %c0_28 = arith.constant 0 : index
    %c0_29 = arith.constant 0 : index
    %61 = vector.load %arg6[%c0_28, %c0_29] : memref<32x1xf32, #tpu.memory_space<vmem>>, vector<32x1xf32>
    %62 = vector.broadcast %61 : vector<32x1xf32> to vector<32x256xf32>
    %63 = arith.addf %60, %62 : vector<32x256xf32>
    %c1_i32_30 = arith.constant 1 : i32
    %64 = tpu.dynamic_rotate %63 by %c1_i32_30 dim 1 : vector<32x256xf32>, i32 -> vector<32x256xf32>
    %c255_i32_31 = arith.constant 255 : i32
    %65 = tpu.dynamic_rotate %63 by %c255_i32_31 dim 1 : vector<32x256xf32>, i32 -> vector<32x256xf32>
    %66 = arith.select %4, %65, %64 : vector<32x256xi1>, vector<32x256xf32>
    %67 = arith.select %6, %64, %65 : vector<32x256xi1>, vector<32x256xf32>
    %c16_i32_32 = arith.constant 16 : i32
    %68 = tpu.dynamic_rotate %66 by %c16_i32_32 dim 1 : vector<32x256xf32>, i32 -> vector<32x256xf32>
    %c240_i32_33 = arith.constant 240 : i32
    %69 = tpu.dynamic_rotate %66 by %c240_i32_33 dim 1 : vector<32x256xf32>, i32 -> vector<32x256xf32>
    %70 = arith.select %8, %69, %68 : vector<32x256xi1>, vector<32x256xf32>
    %71 = arith.select %10, %68, %69 : vector<32x256xi1>, vector<32x256xf32>
    %c16_i32_34 = arith.constant 16 : i32
    %72 = tpu.dynamic_rotate %63 by %c16_i32_34 dim 1 : vector<32x256xf32>, i32 -> vector<32x256xf32>
    %c240_i32_35 = arith.constant 240 : i32
    %73 = tpu.dynamic_rotate %63 by %c240_i32_35 dim 1 : vector<32x256xf32>, i32 -> vector<32x256xf32>
    %74 = arith.select %8, %73, %72 : vector<32x256xi1>, vector<32x256xf32>
    %75 = arith.select %10, %72, %73 : vector<32x256xi1>, vector<32x256xf32>
    %c16_i32_36 = arith.constant 16 : i32
    %76 = tpu.dynamic_rotate %67 by %c16_i32_36 dim 1 : vector<32x256xf32>, i32 -> vector<32x256xf32>
    %c240_i32_37 = arith.constant 240 : i32
    %77 = tpu.dynamic_rotate %67 by %c240_i32_37 dim 1 : vector<32x256xf32>, i32 -> vector<32x256xf32>
    %78 = arith.select %8, %77, %76 : vector<32x256xi1>, vector<32x256xf32>
    %79 = arith.select %10, %76, %77 : vector<32x256xi1>, vector<32x256xf32>
    %80 = tpu.concatenate %70, %74, %78, %66, %63, %67, %71, %75, %79 in 0 : vector<32x256xf32>, vector<32x256xf32>, vector<32x256xf32>, vector<32x256xf32>, vector<32x256xf32>, vector<32x256xf32>, vector<32x256xf32>, vector<32x256xf32>, vector<32x256xf32> -> vector<288x256xf32>
    %81 = arith.truncf %80 : vector<288x256xf32> to vector<288x256xbf16>
    %c0_38 = arith.constant 0 : index
    %c0_39 = arith.constant 0 : index
    %82 = vector.load %arg7[%c0_38, %c0_39] : memref<32x288xbf16, #tpu.memory_space<vmem>>, vector<32x288xbf16>
    %cst_40 = arith.constant dense<0.000000e+00> : vector<32x256xf32>
    %83 = tpu.matmul %82, %81, %cst_40 {dimension_numbers = #tpu.dot_dimension_numbers<[1], [0], [0], [1], [0, 0, 1, 1], [], []>} : vector<32x288xbf16>, vector<288x256xbf16>, vector<32x256xf32> -> vector<32x256xf32>
    %c0_41 = arith.constant 0 : index
    %c0_42 = arith.constant 0 : index
    %84 = vector.load %arg8[%c0_41, %c0_42] : memref<32x1xf32, #tpu.memory_space<vmem>>, vector<32x1xf32>
    %85 = vector.broadcast %84 : vector<32x1xf32> to vector<32x256xf32>
    %86 = arith.addf %83, %85 : vector<32x256xf32>
    %cst_43 = arith.constant 0.000000e+00 : f32
    %87 = vector.broadcast %cst_43 : f32 to vector<32x256xf32>
    %88 = arith.maximumf %86, %87 : vector<32x256xf32>
    %c1_i32_44 = arith.constant 1 : i32
    %89 = tpu.dynamic_rotate %88 by %c1_i32_44 dim 1 : vector<32x256xf32>, i32 -> vector<32x256xf32>
    %c255_i32_45 = arith.constant 255 : i32
    %90 = tpu.dynamic_rotate %88 by %c255_i32_45 dim 1 : vector<32x256xf32>, i32 -> vector<32x256xf32>
    %91 = arith.select %4, %90, %89 : vector<32x256xi1>, vector<32x256xf32>
    %92 = arith.select %6, %89, %90 : vector<32x256xi1>, vector<32x256xf32>
    %c16_i32_46 = arith.constant 16 : i32
    %93 = tpu.dynamic_rotate %91 by %c16_i32_46 dim 1 : vector<32x256xf32>, i32 -> vector<32x256xf32>
    %c240_i32_47 = arith.constant 240 : i32
    %94 = tpu.dynamic_rotate %91 by %c240_i32_47 dim 1 : vector<32x256xf32>, i32 -> vector<32x256xf32>
    %95 = arith.select %8, %94, %93 : vector<32x256xi1>, vector<32x256xf32>
    %96 = arith.select %10, %93, %94 : vector<32x256xi1>, vector<32x256xf32>
    %c16_i32_48 = arith.constant 16 : i32
    %97 = tpu.dynamic_rotate %88 by %c16_i32_48 dim 1 : vector<32x256xf32>, i32 -> vector<32x256xf32>
    %c240_i32_49 = arith.constant 240 : i32
    %98 = tpu.dynamic_rotate %88 by %c240_i32_49 dim 1 : vector<32x256xf32>, i32 -> vector<32x256xf32>
    %99 = arith.select %8, %98, %97 : vector<32x256xi1>, vector<32x256xf32>
    %100 = arith.select %10, %97, %98 : vector<32x256xi1>, vector<32x256xf32>
    %c16_i32_50 = arith.constant 16 : i32
    %101 = tpu.dynamic_rotate %92 by %c16_i32_50 dim 1 : vector<32x256xf32>, i32 -> vector<32x256xf32>
    %c240_i32_51 = arith.constant 240 : i32
    %102 = tpu.dynamic_rotate %92 by %c240_i32_51 dim 1 : vector<32x256xf32>, i32 -> vector<32x256xf32>
    %103 = arith.select %8, %102, %101 : vector<32x256xi1>, vector<32x256xf32>
    %104 = arith.select %10, %101, %102 : vector<32x256xi1>, vector<32x256xf32>
    %105 = tpu.concatenate %95, %99, %103, %91, %88, %92, %96, %100, %104 in 0 : vector<32x256xf32>, vector<32x256xf32>, vector<32x256xf32>, vector<32x256xf32>, vector<32x256xf32>, vector<32x256xf32>, vector<32x256xf32>, vector<32x256xf32>, vector<32x256xf32> -> vector<288x256xf32>
    %106 = arith.truncf %105 : vector<288x256xf32> to vector<288x256xbf16>
    %c0_52 = arith.constant 0 : index
    %c0_53 = arith.constant 0 : index
    %107 = vector.load %arg9[%c0_52, %c0_53] : memref<32x288xbf16, #tpu.memory_space<vmem>>, vector<32x288xbf16>
    %cst_54 = arith.constant dense<0.000000e+00> : vector<32x256xf32>
    %108 = tpu.matmul %107, %106, %cst_54 {dimension_numbers = #tpu.dot_dimension_numbers<[1], [0], [0], [1], [0, 0, 1, 1], [], []>} : vector<32x288xbf16>, vector<288x256xbf16>, vector<32x256xf32> -> vector<32x256xf32>
    %c0_55 = arith.constant 0 : index
    %c0_56 = arith.constant 0 : index
    %109 = vector.load %arg10[%c0_55, %c0_56] : memref<32x1xf32, #tpu.memory_space<vmem>>, vector<32x1xf32>
    %110 = vector.broadcast %109 : vector<32x1xf32> to vector<32x256xf32>
    %111 = arith.addf %108, %110 : vector<32x256xf32>
    %112 = arith.addf %63, %111 : vector<32x256xf32>
    %c0_57 = arith.constant 0 : index
    %c0_58 = arith.constant 0 : index
    %c0_59 = arith.constant 0 : index
    %113 = vector.load %arg2[%c0_57, %c0_58, %c0_59] : memref<1x32x256xf32, #tpu.memory_space<vmem>>, vector<1x32x256xf32>
    %114 = vector.shape_cast %113 : vector<1x32x256xf32> to vector<32x256xf32>
    %115 = arith.addf %114, %112 : vector<32x256xf32>
    %c0_60 = arith.constant 0 : index
    %c0_61 = arith.constant 0 : index
    %c0_62 = arith.constant 0 : index
    %116 = vector.load %arg11[%c0_60, %c0_61, %c0_62] : memref<1x32x256xf32, #tpu.memory_space<vmem>>, vector<1x32x256xf32>
    %117 = vector.shape_cast %116 : vector<1x32x256xf32> to vector<32x256xf32>
    %118 = vector.shape_cast %115 : vector<32x256xf32> to vector<1x32x256xf32>
    tpu.vector_store %arg11[%c0_60, %c0_61, %c0_62], %118 {strides = array<i32>} : memref<1x32x256xf32, #tpu.memory_space<vmem>>, vector<1x32x256xf32>,
    return
  }
  func.func @transform_0(%arg0: i32) -> (i32, i32, i32) {
    %c0_i32 = arith.constant 0 : i32
    %c0_i32_0 = arith.constant 0 : i32
    %c0_i32_1 = arith.constant 0 : i32
    return %arg0, %c0_i32, %c0_i32_0 : i32, i32, i32
  }
  func.func @transform_1(%arg0: i32) -> (i32, i32, i32) {
    %c0_i32 = arith.constant 0 : i32
    %c0_i32_0 = arith.constant 0 : i32
    %c0_i32_1 = arith.constant 0 : i32
    return %arg0, %c0_i32, %c0_i32_0 : i32, i32, i32
  }
  func.func @transform_2(%arg0: i32) -> (i32, i32) {
    %c0_i32 = arith.constant 0 : i32
    %c0_i32_0 = arith.constant 0 : i32
    %c0_i32_1 = arith.constant 0 : i32
    return %c0_i32, %c0_i32_0 : i32, i32
  }
  func.func @transform_3(%arg0: i32) -> (i32, i32) {
    %c0_i32 = arith.constant 0 : i32
    %c0_i32_0 = arith.constant 0 : i32
    %c0_i32_1 = arith.constant 0 : i32
    return %c0_i32, %c0_i32_0 : i32, i32
  }
  func.func @transform_4(%arg0: i32) -> (i32, i32) {
    %c0_i32 = arith.constant 0 : i32
    %c0_i32_0 = arith.constant 0 : i32
    %c0_i32_1 = arith.constant 0 : i32
    return %c0_i32, %c0_i32_0 : i32, i32
  }
  func.func @transform_5(%arg0: i32) -> (i32, i32) {
    %c0_i32 = arith.constant 0 : i32
    %c0_i32_0 = arith.constant 0 : i32
    %c0_i32_1 = arith.constant 0 : i32
    return %c0_i32, %c0_i32_0 : i32, i32
  }
  func.func @transform_6(%arg0: i32) -> (i32, i32) {
    %c0_i32 = arith.constant 0 : i32
    %c0_i32_0 = arith.constant 0 : i32
    %c0_i32_1 = arith.constant 0 : i32
    return %c0_i32, %c0_i32_0 : i32, i32
  }
  func.func @transform_7(%arg0: i32) -> (i32, i32) {
    %c0_i32 = arith.constant 0 : i32
    %c0_i32_0 = arith.constant 0 : i32
    %c0_i32_1 = arith.constant 0 : i32
    return %c0_i32, %c0_i32_0 : i32, i32
  }
  func.func @transform_8(%arg0: i32) -> (i32, i32) {
    %c0_i32 = arith.constant 0 : i32
    %c0_i32_0 = arith.constant 0 : i32
    %c0_i32_1 = arith.constant 0 : i32
    return %c0_i32, %c0_i32_0 : i32, i32
  }
  func.func @transform_9(%arg0: i32) -> (i32, i32) {
    %c0_i32 = arith.constant 0 : i32
    %c0_i32_0 = arith.constant 0 : i32
    %c0_i32_1 = arith.constant 0 : i32
    return %c0_i32, %c0_i32_0 : i32, i32
  }
  func.func @transform_10(%arg0: i32) -> (i32, i32, i32) {
    %c0_i32 = arith.constant 0 : i32
    %c0_i32_0 = arith.constant 0 : i32
    %c0_i32_1 = arith.constant 0 : i32
    return %arg0, %c0_i32, %c0_i32_0 : i32, i32, i32
  }
}

</mosaic_0001>

<bundles_post_ra>
// kernel: manipulator_forward.1
= control target key start
LH: loop header
LB: loop body
LE: loop exit
PB: predicated region body
PF: predicated region fallthrough
CT: control target
= control target key end

     0   :  { %s3317_s13 = smov 0   ;;  %s5609_s0 = inlined_call_operand.vmem [shape: f32[2,32,256], index: 0, kind: input, shape index: {}]   ;;  %s5610_s1 = inlined_call_operand.vmem [shape: f32[2,32,256], index: 1, kind: input, shape index: {}]   ;;  %s5611_s2 = inlined_call_operand.vmem [shape: bf16[32,288], index: 2, kind: input, shape index: {}]   ;;  %s5612_s3 = inlined_call_operand.vmem [shape: f32[32,1], index: 3, kind: input, shape index: {}]   ;;  %s5613_s4 = inlined_call_operand.vmem [shape: bf16[32,288], index: 4, kind: input, shape index: {}]   ;;  %s5614_s5 = inlined_call_operand.vmem [shape: f32[32,1], index: 5, kind: input, shape index: {}]   ;;  %s5615_s6 = inlined_call_operand.vmem [shape: bf16[32,288], index: 6, kind: input, shape index: {}]   ;;  %s5616_s7 = inlined_call_operand.vmem [shape: f32[32,1], index: 7, kind: input, shape index: {}]   ;;  %s5617_s8 = inlined_call_operand.vmem [shape: bf16[32,288], index: 8, kind: input, shape index: {}]   ;;  %s5618_s9 = inlined_call_operand.vmem [shape: f32[32,1], index: 9, kind: input, shape index: {}]   ;;  %s5619_s10 = inlined_call_operand.vmem [shape: f32[2,32,256], index: 10, kind: output, shape index: {}]  }
   0x1 LB: > { %s2425_s14 = sadd.s32 4294967295, %s3255_s13   ;;  %p2429_p0 = scmp.ge.s32.totalorder %s3255_s13, 1  ;;  %s3255_s13 = sphi %s3317_s13, %s20_s13  }
   0x2   : > { %p322_p1 = scmp.lt.s32.totalorder %s3255_s13, 3 }
   0x4   : > { %p323_p2 = pnand %p2429_p0, %p322_p1 }
   0x6   : > { %326 = sbr.rel (%p323_p2) target bundleno = 1939 (0x793), region = 60 }
   0xb   : > { %p365_p3 = scmp.lt.s32.totalorder %s2425_s14, 1  ;;  %s3257_s22 = smov 127   ;;  %v381_v28 = vlaneseq  ;;  %v5670_v39 = vmov 0  ;;  %v5673_v40 = vmov 0  ;;  %v5678_v54 = vmov 0 }
   0xc   : > { %s3258_s23 = smov 1   ;;  %s3259_s24 = smov 16   ;;  %vm775_vm9 = vcmask 261120  }
   0xd   : > { %s5770_s14 = smov (!%p365_p3, %s2425_s14), 1  ;;  %s3260_s25 = smov 112   ;;  %v3385_v29 = vand.u32 127, %v381_v28 }
   0xe   : > { %s3325_s15 = sshll.u32 %s5770_s14, 6 }
   0xf   : > { %s369_s18 = scalar_lea.vmem %s5609_s0, %s3325_s15  ;;  %s3335_s21 = scalar_lea.vmem %s5610_s1, %s3325_s15  ;;  %v3388_v31 = vadd.s32 128, %v3385_v29  ;;  %v384_v34 = vand.u32 15, %v3385_v29  ;;  %vm434_vm0 = vcmp.lt.s32.totalorder %v3385_v29, 1  ;;  %vm459_vm1 = vcmp.lt.s32.totalorder %v3385_v29, 127 }
  0x10   : > { %v398_v0 = vld [vmem:[%s3335_s21 + $0x20] sm:$0xff]  ;;  %v400_v1 = vld [vmem:[%s3335_s21 + $0x30] sm:$0xff]  ;;  %v399_v6 = vld [vmem:[%s3335_s21 + $0x28] sm:$0xff]  ;;  %vm524_vm6 = vcmp.lt.s32.totalorder %v3385_v29, 112  ;;  %vm390_vm7 = vcmp.lt.s32.totalorder %v3385_v29, 16 }
  0x11   : > { %v406_v2 = vld [vmem:[%s369_s18 + $0x20] sm:$0xff]  ;;  %v408_v3 = vld [vmem:[%s369_s18 + $0x30] sm:$0xff]  ;;  %v407_v7 = vld [vmem:[%s369_s18 + $0x28] sm:$0xff]  ;;  %v385_v35 = vand.u32 15, %v3388_v31  ;;  %vm3394_vm2 = vcmp.eq.s32.totalorder %v384_v34, 0  ;;  %vm3402_vm4 = vcmp.eq.s32.totalorder %v384_v34, 15 }
  0x12   : > { %v3339_v4 = vsub.f32 %v398_v0, %v406_v2  ;;  %v3341_v5 = vsub.f32 %v400_v1, %v408_v3  ;;  %v401_v8 = vld [vmem:[%s3335_s21 + $0x38] sm:$0xff]  ;;  %v394_v11 = vld [vmem:[%s3335_s21] sm:$0xff]  ;;  %v396_v12 = vld [vmem:[%s3335_s21 + $0x10] sm:$0xff]  ;;  %v3349_v14 = vsub.f32 %v399_v6, %v407_v7  ;;  %v5671_v39 = vsel %vm3394_vm2, 4294967295, %v5670_v39 }
  0x13   : > { %v409_v9 = vld [vmem:[%s369_s18 + $0x38] sm:$0xff]  ;;  %v402_v13 = vld [vmem:[%s369_s18] sm:$0xff]  ;;  %v404_v15 = vld [vmem:[%s369_s18 + $0x10] sm:$0xff]  ;;  %5672 = vst [vmem:[#allocation2_spill] sm:$0xff] %v5671_v39  ;;  %vm3398_vm3 = vcmp.eq.s32.totalorder %v385_v35, 0  ;;  %vm3406_vm5 = vcmp.eq.s32.totalorder %v385_v35, 15 }
  0x14   : > { %v2608_v10 = vpack.i.bf16 %v3341_v5, %v3339_v4  ;;  %v3353_v16 = vsub.f32 %v401_v8, %v409_v9  ;;  %v3355_v17 = vsub.f32 %v394_v11, %v402_v13  ;;  %v3357_v18 = vsub.f32 %v396_v12, %v404_v15  ;;  %v395_v19 = vld [vmem:[%s3335_s21 + $0x8] sm:$0xff]  ;;  %v397_v21 = vld [vmem:[%s3335_s21 + $0x18] sm:$0xff] }
  0x15   : > { %v403_v22 = vld [vmem:[%s369_s18 + $0x8] sm:$0xff]  ;;  %v405_v23 = vld [vmem:[%s369_s18 + $0x18] sm:$0xff]  ;;  %v5674_v40 = vsel %vm3398_vm3, 4294967295, %v5673_v40  ;;  %v5679_v54 = vsel %vm3406_vm5, 4294967295, %v5678_v54  ;;  %vm393_vm8 = vcmp.ge.s32.totalorder %v3388_v31, 240 }
  0x16   : > { %2609 = vrot.lane.b32.xlu1 %v2608_v10, %s3257_s22  ;;  %2599 = vrot.lane.b32.xlu0 %v2608_v10, %s3258_s23  ;;  %v2618_v20 = vpack.i.bf16 %v3357_v18, %v3355_v17  ;;  %v2613_v24 = vpack.i.bf16 %v3353_v16, %v3349_v14  ;;  %v3366_v25 = vsub.f32 %v395_v19, %v403_v22 }
  0x17   : > { %v3368_v26 = vsub.f32 %v397_v21, %v405_v23  ;;  %5675 = vst [vmem:[#allocation3_spill] sm:$0xff] %v5674_v40 }
  0x18   : > { %2619 = vrot.lane.b32.xlu2 %v2618_v20, %s3258_s23  ;;  %5680 = vst [vmem:[#allocation4_spill] sm:$0xff] %v5679_v54 }
  0x19   : > { %v2623_v27 = vpack.i.bf16 %v3368_v26, %v3366_v25 }
  0x1e   : > { %2614 = vrot.lane.b32.xlu1 %v2613_v24, %s3257_s22  ;;  %2604 = vrot.lane.b32.xlu0 %v2613_v24, %s3258_s23 }
  0x20   : > { %2624 = vrot.lane.b32.xlu2 %v2623_v27, %s3258_s23 }
  0x26   : > { %2634 = vrot.lane.b32.xlu1 %v2623_v27, %s3257_s22  ;;  %2629 = vrot.lane.b32.xlu0 %v2618_v20, %s3257_s22 }
  0x28   : > { %2644 = vrot.lane.b32.xlu2 %v2613_v24, %s3259_s24 }
  0x2e   : > { %2639 = vrot.lane.b32.xlu1 %v2608_v10, %s3259_s24  ;;  %2649 = vrot.lane.b32.xlu0 %v2608_v10, %s3260_s25 }
  0x30   : > { %2659 = vrot.lane.b32.xlu2 %v2618_v20, %s3259_s24 }
  0x36   : > { %2654 = vrot.lane.b32.xlu1 %v2613_v24, %s3260_s25  ;;  %2664 = vrot.lane.b32.xlu0 %v2623_v27, %s3259_s24 }
  0x38   : > { %2674 = vrot.lane.b32.xlu2 %v2623_v27, %s3260_s25 }
  0x3e   : > { %2669 = vrot.lane.b32.xlu1 %v2618_v20, %s3260_s25 }
  0x72   : > { %v2620_v30 = vpop.permute.xlu2 %2619 }
  0x73   : > { %v2622_v36 = vunpack.i.h.bf16 %v2620_v30  ;;  %v2621_v37 = vunpack.i.l.bf16 %v2620_v30 }
  0x7a   : > { %v2625_v38 = vpop.permute.xlu2 %2624 }
  0x7b   : > { %v2627_v51 = vunpack.i.h.bf16 %v2625_v38  ;;  %v2626_v52 = vunpack.i.l.bf16 %v2625_v38 }
  0x7d   : > { %v435_v12 = vsel %vm434_vm0, %v2621_v37, %v2626_v52  ;;  %v436_v13 = vsel %vm434_vm0, %v2622_v36, %v2627_v51  ;;  %v439_v27 = vsel %vm434_vm0, %v2626_v52, %v2621_v37  ;;  %v440_v28 = vsel %vm434_vm0, %v2627_v51, %v2622_v36 }
  0x88   : > { %v2610_v32 = vpop.permute.xlu1 %2609  ;;  %v2600_v33 = vpop.permute.xlu0 %2599 }
  0x89   : > { %v2612_v41 = vunpack.i.h.bf16 %v2610_v32  ;;  %v2611_v42 = vunpack.i.l.bf16 %v2610_v32  ;;  %v2602_v43 = vunpack.i.h.bf16 %v2600_v33  ;;  %v2601_v44 = vunpack.i.l.bf16 %v2600_v33 }
  0x90   : > { %v2615_v45 = vpop.permute.xlu1 %2614  ;;  %v2605_v46 = vpop.permute.xlu0 %2604 }
  0x91   : > { %v2617_v47 = vunpack.i.h.bf16 %v2615_v45  ;;  %v2616_v48 = vunpack.i.l.bf16 %v2615_v45  ;;  %v2607_v49 = vunpack.i.h.bf16 %v2605_v46  ;;  %v2606_v50 = vunpack.i.l.bf16 %v2605_v46 }
  0x93   : > { %v441_v55 = vsel %vm434_vm0, %v2606_v50, %v2601_v44  ;;  %v442_v56 = vsel %vm434_vm0, %v2607_v49, %v2602_v43  ;;  %v462_v57 = vsel %vm459_vm1, %v2611_v42, %v2616_v48  ;;  %v463_v58 = vsel %vm459_vm1, %v2612_v41, %v2617_v47 }
  0x94   : > { %v472_v59 = vsel %vm3394_vm2, %v462_v57, %v441_v55  ;;  %v474_v60 = vsel %vm3394_vm2, %v463_v58, %v442_v56  ;;  %v437_v61 = vsel %vm434_vm0, %v2601_v44, %v2606_v50  ;;  %v438_v62 = vsel %vm434_vm0, %v2602_v43, %v2607_v49 }
  0x95   : > { %v691_v63 = vpack.c.bf16 %v474_v60, %v472_v59  ;;  %v466_v0 = vsel %vm459_vm1, %v2616_v48, %v2611_v42  ;;  %v467_v1 = vsel %vm459_vm1, %v2617_v47, %v2612_v41  ;;  %v3432_v2 = vsel %vm3402_vm4, %v441_v55, %v462_v57 }
  0x96   : > { %v473_v3 = vsel %vm3398_vm3, %v466_v0, %v437_v61  ;;  %v475_v6 = vsel %vm3398_vm3, %v467_v1, %v438_v62  ;;  %v3440_v7 = vsel %vm3402_vm4, %v442_v56, %v463_v58  ;;  %v3444_v8 = vsel %vm3406_vm5, %v437_v61, %v466_v0 }
  0x97   : > { %782 = vmatpush.bf16.msra.mxu0 %v691_v63  ;;  %v692_v9 = vpack.c.bf16 %v475_v6, %v473_v3  ;;  %v2688_v10 = vpack.i.bf16 %v3440_v7, %v3432_v2  ;;  %v3450_v11 = vsel %vm3406_vm5, %v438_v62, %v467_v1  ;;  %v2723_v55 = vpack.i.bf16 %v475_v6, %v473_v3  ;;  %v2645_v62 = vpop.permute.xlu2 %2644 }
  0x98   : > { %v2683_v15 = vpack.i.bf16 %v3450_v11, %v3444_v8  ;;  %v2635_v19 = vpop.permute.xlu1 %2634  ;;  %v2630_v20 = vpop.permute.xlu0 %2629  ;;  %v2728_v57 = vpack.i.bf16 %v474_v60, %v472_v59  ;;  %v2647_v6 = vunpack.i.h.bf16 %v2645_v62 }
  0x99   : > { %839 = vmatpush.bf16.msra.mxu3 %v692_v9  ;;  %2689 = vrot.lane.b32.xlu1 %v2688_v10, %s3260_s25  ;;  %v2637_v21 = vunpack.i.h.bf16 %v2635_v19  ;;  %v2636_v22 = vunpack.i.l.bf16 %v2635_v19  ;;  %v2632_v23 = vunpack.i.h.bf16 %v2630_v20  ;;  %v2631_v24 = vunpack.i.l.bf16 %v2630_v20 }
  0x9a   : > { %2684 = vrot.lane.b32.xlu0 %v2683_v15, %s3259_s24  ;;  %2679 = vrot.lane.b32.xlu2 %v2688_v10, %s3259_s24  ;;  %v2646_v9 = vunpack.i.l.bf16 %v2645_v62 }
  0x9b   : > { %v461_v32 = vsel %vm459_vm1, %v2632_v23, %v2637_v21  ;;  %v465_v33 = vsel %vm459_vm1, %v2637_v21, %v2632_v23  ;;  %v460_v34 = vsel %vm459_vm1, %v2631_v24, %v2636_v22  ;;  %v464_v35 = vsel %vm459_vm1, %v2636_v22, %v2631_v24 }
  0x9c   : > { %v3477_v36 = vsel %vm3402_vm4, %v439_v27, %v460_v34  ;;  %v3481_v37 = vsel %vm3402_vm4, %v440_v28, %v461_v32  ;;  %v468_v38 = vsel %vm3394_vm2, %v460_v34, %v439_v27  ;;  %v470_v41 = vsel %vm3394_vm2, %v461_v32, %v440_v28 }
  0x9d   : > { %v689_v42 = vpack.c.bf16 %v470_v41, %v468_v38  ;;  %v3489_v43 = vsel %vm3406_vm5, %v435_v12, %v464_v35  ;;  %v3493_v44 = vsel %vm3406_vm5, %v436_v13, %v465_v33  ;;  %v2698_v45 = vpack.i.bf16 %v3481_v37, %v3477_v36 }
  0x9e   : > { %v2703_v46 = vpack.i.bf16 %v3493_v44, %v3489_v43  ;;  %v469_v47 = vsel %vm3398_vm3, %v464_v35, %v435_v12  ;;  %v471_v48 = vsel %vm3398_vm3, %v465_v33, %v436_v13  ;;  %v2738_v56 = vpack.i.bf16 %v470_v41, %v468_v38 }
  0x9f   : > { %783 = vmatpush.bf16.msra.mxu0 %v689_v42  ;;  %v690_v49 = vpack.c.bf16 %v471_v48, %v469_v47  ;;  %v2753_v58 = vpack.i.bf16 %v471_v48, %v469_v47  ;;  %v3523_v10 = vpop.permute.xlu2 %2659 }
  0xa0   : > { %v2640_v61 = vpop.permute.xlu1 %2639  ;;  %v2650_v0 = vpop.permute.xlu0 %2649 }
  0xa1   : > { %2704 = vrot.lane.b32.xlu1 %v2703_v46, %s3259_s24  ;;  %840 = vmatpush.bf16.msra.mxu3 %v690_v49  ;;  %v2652_v1 = vunpack.i.h.bf16 %v2650_v0  ;;  %v2651_v3 = vunpack.i.l.bf16 %v2650_v0  ;;  %v2642_v12 = vunpack.i.h.bf16 %v2640_v61  ;;  %v2641_v13 = vunpack.i.l.bf16 %v2640_v61 }
  0xa2   : > { %2694 = vrot.lane.b32.xlu2 %v2683_v15, %s3260_s25  ;;  %2699 = vrot.lane.b32.xlu0 %v2698_v45, %s3259_s24 }
  0xa3   : > { %v3533_v21 = vsel %vm390_vm7, %v2641_v13, %v2646_v9  ;;  %v3537_v22 = vsel %vm390_vm7, %v2642_v12, %v2647_v6  ;;  %v571_v32 = vsel %vm390_vm7, %v2646_v9, %v2641_v13  ;;  %v572_v34 = vsel %vm390_vm7, %v2647_v6, %v2642_v12 }
  0xa8   : > { %v2655_v63 = vpop.permute.xlu1 %2654  ;;  %v3589_v61 = vpop.permute.xlu0 %2664 }
  0xa9   : > { %2724 = vrot.lane.b32.xlu1 %v2723_v55, %s3259_s24  ;;  %v2657_v59 = vunpack.i.h.bf16 %v2655_v63  ;;  %v2656_v60 = vunpack.i.l.bf16 %v2655_v63 }
  0xaa   : > { %2709 = vrot.lane.b32.xlu2 %v2698_v45, %s3260_s25  ;;  %2714 = vrot.lane.b32.xlu0 %v2703_v46, %s3260_s25  ;;  %v3571_v45 = vpop.permute.xlu2 %2674 }
  0xab   : > { %v591_v15 = vsel %vm524_vm6, %v2651_v3, %v2656_v60  ;;  %v592_v19 = vsel %vm524_vm6, %v2652_v1, %v2657_v59  ;;  %v595_v23 = vsel %vm524_vm6, %v2656_v60, %v2651_v3  ;;  %v596_v24 = vsel %vm524_vm6, %v2657_v59, %v2652_v1 }
  0xac   : > { %v707_v20 = vpack.c.bf16 %v592_v19, %v591_v15  ;;  %v3546_v27 = vsel %vm393_vm8, %v3533_v21, %v595_v23  ;;  %v3551_v28 = vsel %vm393_vm8, %v3537_v22, %v596_v24  ;;  %v3561_v35 = vsel %vm390_vm7, %v591_v15, %v571_v32 }
  0xad   : > { %v3565_v38 = vsel %vm390_vm7, %v592_v19, %v572_v34  ;;  %v2677_v46 = vunpack.i.h.bf16 %v3571_v45  ;;  %v2676_v47 = vunpack.i.l.bf16 %v3571_v45 }
  0xae   : > { %801 = vmatpush.bf16.msra.mxu1 %v707_v20 }
  0xb0   : > { %v3567_v41 = vpop.permute.xlu1 %2669 }
  0xb1   : > { %2739 = vrot.lane.b32.xlu1 %v2738_v56, %s3259_s24  ;;  %v2672_v48 = vunpack.i.h.bf16 %v3567_v41  ;;  %v2671_v49 = vunpack.i.l.bf16 %v3567_v41 }
  0xb2   : > { %2729 = vrot.lane.b32.xlu2 %v2728_v57, %s3260_s25  ;;  %2719 = vrot.lane.b32.xlu0 %v2728_v57, %s3259_s24 }
  0xb9   : > { %2754 = vrot.lane.b32.xlu1 %v2753_v58, %s3260_s25 }
  0xba   : > { %2734 = vrot.lane.b32.xlu0 %v2723_v55, %s3260_s25  ;;  %2744 = vrot.lane.b32.xlu2 %v2753_v58, %s3259_s24  ;;  %v3579_v55 = vsel %vm524_vm6, %v2671_v49, %v2676_v47 }
  0xc2   : > { %2749 = vrot.lane.b32.xlu0 %v2738_v56, %s3260_s25  ;;  %v3585_v56 = vsel %vm524_vm6, %v2672_v48, %v2677_v46 }
  0xc3   : > { %v705_v57 = vpack.c.bf16 %v3585_v56, %v3579_v55 }
  0xc5   : > { %802 = vmatpush.bf16.msra.mxu1 %v705_v57 }
  0xf4   : > { %v2680_v58 = vpop.permute.xlu2 %2679 }
  0xf5   : > { %v2682_v6 = vunpack.i.h.bf16 %v2680_v58  ;;  %v2681_v9 = vunpack.i.l.bf16 %v2680_v58 }
  0xfc   : > { %v3591_v62 = vpop.permute.xlu2 %2694 }
  0xfd   : > { %v5620_v0 = vunpack.i.h.bf16 %v3591_v62  ;;  %v5622_v59 = vunpack.i.l.bf16 %v3591_v62 }
 0x104   : > { %v3621_v34 = vpop.permute.xlu2 %2709 }
 0x10b   : > { %v3593_v63 = vpop.permute.xlu1 %2689 }
 0x10c   : > { %v5621_v60 = vunpack.i.h.bf16 %v3593_v63  ;;  %v5623_v1 = vunpack.i.l.bf16 %v3593_v63  ;;  %v2685_v3 = vpop.permute.xlu0 %2684 }
 0x10d   : > { %v2687_v12 = vunpack.i.h.bf16 %v2685_v3  ;;  %v2686_v13 = vunpack.i.l.bf16 %v2685_v3 }
 0x10e   : > { %v655_v15 = vsel %vm524_vm6, %v5623_v1, %v5622_v59  ;;  %v656_v19 = vsel %vm524_vm6, %v5621_v60, %v5620_v0  ;;  %v2662_v60 = vunpack.i.h.bf16 %v3523_v10  ;;  %v593_v59 = vsel %vm524_vm6, %v2676_v47, %v2671_v49  ;;  %v2555_v1 = vld [vmem:[%s5611_s2 + $0x10] sm:$0xf0] }
 0x10f   : > { %v711_v20 = vpack.c.bf16 %v656_v19, %v655_v15  ;;  %v3613_v23 = vsel %vm390_vm7, %v2681_v9, %v2686_v13  ;;  %v3617_v24 = vsel %vm390_vm7, %v2682_v6, %v2687_v12  ;;  %v635_v32 = vsel %vm390_vm7, %v2686_v13, %v2681_v9 }
 0x110   : > { %v688_v41 = vpack.c.bf16 %v3617_v24, %v3613_v23  ;;  %v636_v57 = vsel %vm390_vm7, %v2687_v12, %v2682_v6  ;;  %v665_v58 = vsel %vm390_vm7, %v655_v15, %v635_v32  ;;  %v2661_v15 = vunpack.i.l.bf16 %v3523_v10 }
 0x111   : > { %826 = vmatpush.bf16.msra.mxu2 %v711_v20  ;;  %v667_v3 = vsel %vm390_vm7, %v656_v19, %v636_v57  ;;  %v2667_v19 = vunpack.i.h.bf16 %v3589_v61  ;;  %v3645_v20 = vpop.permute.xlu2 %2729  ;;  %v684_v57 = vpack.c.bf16 %v3537_v22, %v3533_v21  ;;  %v594_v21 = vsel %vm524_vm6, %v2677_v46, %v2672_v48  ;;  %v2446_v22 = vld [vmem:[%s5611_s2 + $0x8] sm:$0xf] }
 0x112   : > { %841 = vmatpush.bf16.msra.mxu3 %v688_v41  ;;  %v687_v52 = vpack.c.bf16 %v667_v3, %v665_v58  ;;  %v5625_v3 = vunpack.i.l.bf16 %v3621_v34 }
 0x113   : > { %v2705_v51 = vpop.permute.xlu1 %2704  ;;  %v566_v58 = vsel %vm390_vm7, %v2662_v60, %v2667_v19 }
 0x114   : > { %784 = vmatpush.bf16.msra.mxu0 %v687_v52  ;;  %v2700_v9 = vpop.permute.xlu0 %2699  ;;  %v2707_v13 = vunpack.i.h.bf16 %v2705_v51  ;;  %v2706_v50 = vunpack.i.l.bf16 %v2705_v51  ;;  %v2666_v52 = vunpack.i.l.bf16 %v3589_v61  ;;  %v5627_v61 = vunpack.i.h.bf16 %v3621_v34 }
 0x115   : > { %v2702_v30 = vunpack.i.h.bf16 %v2700_v9  ;;  %v2701_v0 = vunpack.i.l.bf16 %v2700_v9 }
 0x116   : > { %v565_v10 = vsel %vm390_vm7, %v2661_v15, %v2666_v52 }
 0x117   : > { %v3634_v6 = vsel %vm390_vm7, %v2701_v0, %v2706_v50  ;;  %v3638_v12 = vsel %vm390_vm7, %v2702_v30, %v2707_v13  ;;  %v633_v46 = vsel %vm390_vm7, %v2706_v50, %v2701_v0  ;;  %v634_v48 = vsel %vm390_vm7, %v2707_v13, %v2702_v30 }
 0x118   : > { %v686_v51 = vpack.c.bf16 %v3638_v12, %v3634_v6  ;;  %v606_v33 = vsel %vm393_vm8, %v565_v10, %v593_v59  ;;  %v5681_v30 = vpack.c.bf16 %v3551_v28, %v3546_v27  ;;  %v570_v0 = vsel %vm390_vm7, %v2667_v19, %v2662_v60 }
 0x119   : > { %v3708_v59 = vpop.permute.xlu2 %2744 }
 0x11a   : > { %842 = vmatpush.bf16.msra.mxu3 %v686_v51  ;;  %v2747_v19 = vunpack.i.h.bf16 %v3708_v59 }
 0x11b   : > { %v3647_v32 = vpop.permute.xlu1 %2724 }
 0x11c   : > { %v3649_v41 = vpop.permute.xlu0 %2714  ;;  %v2726_v13 = vunpack.i.l.bf16 %v3647_v32 }
 0x11d   : > { %v5626_v9 = vunpack.i.h.bf16 %v3649_v41  ;;  %v5624_v51 = vunpack.i.l.bf16 %v3649_v41 }
 0x11e   : > { %843 = vmatpush.bf16.msra.mxu3 %v684_v57  ;;  %v682_v57 = vpack.c.bf16 %v566_v58, %v565_v10 }
 0x11f   : > { %v653_v47 = vsel %vm524_vm6, %v5625_v3, %v5624_v51  ;;  %v654_v45 = vsel %vm524_vm6, %v5627_v61, %v5626_v9  ;;  %v608_v9 = vsel %vm393_vm8, %v566_v58, %v594_v21  ;;  %v3697_v61 = vor.u32 %v2555_v1, %v2446_v22  ;;  %v2554_v22 = vld [vmem:[%s5611_s2 + $0x8] sm:$0xf0] }
 0x120   : > { %v709_v49 = vpack.c.bf16 %v654_v45, %v653_v47  ;;  %v661_v42 = vsel %vm390_vm7, %v653_v47, %v633_v46  ;;  %v663_v51 = vsel %vm390_vm7, %v654_v45, %v634_v48  ;;  %v2727_v1 = vunpack.i.h.bf16 %v3647_v32 }
 0x121   : > { %v685_v3 = vpack.c.bf16 %v663_v51, %v661_v42  ;;  %v569_v42 = vsel %vm390_vm7, %v2666_v52, %v2661_v15  ;;  %v706_v58 = vpack.c.bf16 %v608_v9, %v606_v33  ;;  %v599_v15 = vsel %vm390_vm7, %v3585_v56, %v570_v0 }
 0x122   : > { %827 = vmatpush.bf16.msra.mxu2 %v709_v49  ;;  %844 = vmatpush.bf16.msra.mxu3 %v682_v57  ;;  %v597_v60 = vsel %vm390_vm7, %v3579_v55, %v569_v42  ;;  %v2746_v33 = vunpack.i.l.bf16 %v3708_v59  ;;  %v5682_v52 = vpack.c.bf16 %v3565_v38, %v3561_v35  ;;  %v2438_v38 = vld [vmem:[%s5611_s2] sm:$0xf]  ;;  %v2732_v47 = vunpack.i.h.bf16 %v3645_v20 }
 0x123   : > { %785 = vmatpush.bf16.msra.mxu0 %v685_v3  ;;  %v3702_v50 = vpop.permute.xlu1 %2739  ;;  %v681_v21 = vpack.c.bf16 %v599_v15, %v597_v60  ;;  %v2731_v48 = vunpack.i.l.bf16 %v3645_v20  ;;  %v5684_v42 = vunpack.i.l.bf16 %v3591_v62  ;;  %v5686_v20 = vunpack.i.h.bf16 %v3591_v62 }
 0x124   : > { %v2720_v10 = vpop.permute.xlu0 %2719  ;;  %v2742_v27 = vunpack.i.h.bf16 %v3702_v50  ;;  %v2741_v28 = vunpack.i.l.bf16 %v3702_v50  ;;  %v2439_v15 = vor.u32 %v2554_v22, %v2438_v38  ;;  %v721_v22 = vld [vmem:[%s5612_s3] sm:$0xff] }
 0x125   : > { %v2722_v3 = vunpack.i.h.bf16 %v2720_v10  ;;  %v2721_v51 = vunpack.i.l.bf16 %v2720_v10  ;;  %2460 = vmatmul.msk.bf16.vlgmr.msra.gmra.mxu2 %vm775_vm9, %v3697_v61 }
 0x126   : > { %858 = vmatpush.bf16.msrb.mxu2 %v5681_v30  ;;  %v3735_v56 = vsel %vm390_vm7, %v2741_v28, %v2746_v33  ;;  %v3741_v35 = vsel %vm390_vm7, %v2742_v27, %v2747_v19  ;;  %v5683_v30 = vunpack.i.l.bf16 %v3593_v63 }
 0x127   : > { %786 = vmatpush.bf16.msra.mxu0 %v5682_v52  ;;  %v502_v32 = vsel %vm390_vm7, %v2721_v51, %v2726_v13  ;;  %v503_v9 = vsel %vm390_vm7, %v2722_v3, %v2727_v1  ;;  %v678_v46 = vpack.c.bf16 %v3741_v35, %v3735_v56  ;;  %v506_v59 = vsel %vm390_vm7, %v2726_v13, %v2721_v51  ;;  %v2458_v52 = vld [vmem:[%s5611_s2 + $0x20] sm:$0xf] }
 0x128   : > { %v680_v55 = vpack.c.bf16 %v503_v9, %v502_v32  ;;  %v659_v0 = vsel %vm524_vm6, %v5684_v42, %v5683_v30  ;;  %v507_v10 = vsel %vm390_vm7, %v2727_v1, %v2722_v3 }
 0x129   : > { %v674_v30 = vsel %vm393_vm8, %v3613_v23, %v659_v0  ;;  %v505_v23 = vsel %vm390_vm7, %v2747_v19, %v2742_v27  ;;  %v5688_v0 = vunpack.i.l.bf16 %v3649_v41 }
 0x12a   : > { %859 = vmatpush.bf16.msrb.mxu2 %v706_v58  ;;  %845 = vmatpush.bf16.msra.mxu3 %v680_v55  ;;  %v5685_v58 = vunpack.i.h.bf16 %v3593_v63  ;;  %v2558_v55 = vld [vmem:[%s5611_s2 + $0x28] sm:$0xf0] }
 0x12b   : > { %787 = vmatpush.bf16.msra.mxu0 %v681_v21 }
 0x12c   : > { %v2735_v45 = vpop.permute.xlu0 %2734  ;;  %v660_v60 = vsel %vm524_vm6, %v5686_v20, %v5685_v58  ;;  %v504_v20 = vsel %vm390_vm7, %v2746_v33, %v2741_v28 }
 0x12d   : > { %v2737_v49 = vunpack.i.h.bf16 %v2735_v45  ;;  %v2736_v57 = vunpack.i.l.bf16 %v2735_v45 }
 0x12e   : > { %846 = vmatpush.bf16.msra.mxu3 %v678_v46 }
 0x12f   : > { %v527_v13 = vsel %vm524_vm6, %v2731_v48, %v2736_v57  ;;  %v528_v63 = vsel %vm524_vm6, %v2732_v47, %v2737_v49  ;;  %v531_v62 = vsel %vm524_vm6, %v2736_v57, %v2731_v48  ;;  %v532_v1 = vsel %vm524_vm6, %v2737_v49, %v2732_v47  ;;  %v2755_v47 = vpop.permute.xlu1 %2754 }
 0x130   : > { %v703_v3 = vpack.c.bf16 %v528_v63, %v527_v13  ;;  %v537_v51 = vsel %vm390_vm7, %v527_v13, %v506_v59  ;;  %v539_v21 = vsel %vm390_vm7, %v528_v63, %v507_v10  ;;  %v546_v38 = vsel %vm393_vm8, %v502_v32, %v531_v62 }
 0x131   : > { %v679_v45 = vpack.c.bf16 %v539_v21, %v537_v51  ;;  %v548_v46 = vsel %vm393_vm8, %v503_v9, %v532_v1  ;;  %v3794_v48 = vor.u32 %v2558_v55, %v2458_v52  ;;  %847 = vmatmul.bf16.vlgmr.msra.gmra.mxu3 %v2439_v15  ;;  %v3261_v57 = vmov 0  }
 0x132   : > { %803 = vmatpush.bf16.msra.mxu1 %v703_v3  ;;  %v704_v49 = vpack.c.bf16 %v548_v46, %v546_v38  ;;  %2760 = vset.pattern.permute.xlu1 %v3261_v57  ;;  %v676_v9 = vsel %vm393_vm8, %v3617_v24, %v660_v60  ;;  %v2757_v42 = vunpack.i.h.bf16 %v2755_v47  ;;  %v2756_v59 = vunpack.i.l.bf16 %v2755_v47  ;;  %v723_v46 = vld [vmem:[%s5612_s3 + $0x10] sm:$0xff] }
 0x133   : > { %788 = vmatpush.bf16.msra.mxu0 %v679_v45  ;;  %727 = vperm.xlu1 %2760, %v721_v22   ;;  %v5687_v24 = vunpack.i.l.bf16 %v3621_v34  ;;  %v5689_v52 = vunpack.i.h.bf16 %v3621_v34  ;;  %v5690_v55 = vunpack.i.h.bf16 %v3649_v41  ;;  %v712_v51 = vpack.c.bf16 %v676_v9, %v674_v30 }
 0x134   : > { %860 = vmatpush.bf16.msrb.mxu2 %v704_v49  ;;  %v2750_v32 = vpop.permute.xlu0 %2749  ;;  %2759 = vset.pattern.permute.xlu0 %v3261_v57  ;;  %v5691_v22 = vpack.c.bf16 %v3440_v7, %v3432_v2  ;;  %v5692_v47 = vpack.c.bf16 %v3450_v11, %v3444_v8  ;;  %v5693_v2 = vpack.c.bf16 %v3481_v37, %v3477_v36  ;;  %v2553_v11 = vld [vmem:[%s5611_s2 + $0x4] sm:$0xf] }
 0x135   : > { %v2752_v10 = vunpack.i.h.bf16 %v2750_v32  ;;  %v2751_v58 = vunpack.i.l.bf16 %v2750_v32  ;;  %2461 = vmatmul.msk.bf16.gmra.mxu2 %vm775_vm9, %v3794_v48  ;;  %2758 = vset.pattern.permute.xlu2 %v3261_v57  ;;  %v657_v60 = vsel %vm524_vm6, %v5688_v0, %v5687_v24  ;;  %v658_v13 = vsel %vm524_vm6, %v5690_v55, %v5689_v52 }
 0x136   : > { %v670_v21 = vsel %vm393_vm8, %v3634_v6, %v657_v60  ;;  %v672_v38 = vsel %vm393_vm8, %v3638_v12, %v658_v13  ;;  %v724_v12 = vld [vmem:[%s5612_s3 + $0x18] sm:$0xff]  ;;  %v695_v7 = vpack.c.bf16 %v3341_v5, %v3339_v4  ;;  %737 = vperm.xlu2 %2758, %v723_v46   ;;  %v696_v49 = vpack.c.bf16 %v3353_v16, %v3349_v14  ;;  %v2440_v4 = vld [vmem:[%s5611_s2 + $0xc] sm:$0xf0]  ;;  %v722_v5 = vld [vmem:[%s5612_s3 + $0x8] sm:$0xff] }
 0x137   : > { %v525_v50 = vsel %vm524_vm6, %v2751_v58, %v2756_v59  ;;  %v526_v27 = vsel %vm524_vm6, %v2752_v10, %v2757_v42  ;;  %v529_v28 = vsel %vm524_vm6, %v2756_v59, %v2751_v58  ;;  %v530_v19 = vsel %vm524_vm6, %v2757_v42, %v2752_v10  ;;  %742 = vperm.xlu0 %2759, %v724_v12  }
 0x138   : > { %v701_v33 = vpack.c.bf16 %v526_v27, %v525_v50  ;;  %v533_v34 = vsel %vm390_vm7, %v525_v50, %v504_v20  ;;  %v535_v41 = vsel %vm390_vm7, %v526_v27, %v505_v23  ;;  %v542_v63 = vsel %vm393_vm8, %v3735_v56, %v529_v28  ;;  %v2450_v56 = vld [vmem:[%s5611_s2 + $0x18] sm:$0xf] }
 0x139   : > { %v677_v62 = vpack.c.bf16 %v535_v41, %v533_v34  ;;  %v544_v1 = vsel %vm393_vm8, %v3741_v35, %v530_v19  ;;  %v2557_v35 = vld [vmem:[%s5611_s2 + $0x20] sm:$0xf0]  ;;  %v710_v6 = vpack.c.bf16 %v672_v38, %v670_v21  ;;  %v693_v8 = vpack.c.bf16 %v3357_v18, %v3355_v17  ;;  %v2556_v17 = vld [vmem:[%s5611_s2 + $0x1c] sm:$0xf]  ;;  %v2452_v18 = vld [vmem:[%s5611_s2 + $0x24] sm:$0xf0] }
 0x13a   : > { %804 = vmatpush.bf16.msra.mxu1 %v701_v33  ;;  %v702_v3 = vpack.c.bf16 %v544_v1, %v542_v63  ;;  %v2451_v45 = vor.u32 %v2557_v35, %v2450_v56  ;;  %v694_v14 = vpack.c.bf16 %v3368_v26, %v3366_v25  ;;  %v2443_v16 = vor.u32 %v2553_v11, %v2440_v4 }
 0x13b   : > { %789 = vmatpush.bf16.msra.mxu0 %v677_v62  ;;  %v2455_v36 = vor.u32 %v2556_v17, %v2452_v18 }
 0x13c   : > { %861 = vmatpush.bf16.msrb.mxu2 %v702_v3 }
 0x13e   : > { %790 = vmatmul.bf16.vlgmr.msra.gmra.mxu0 %v2439_v15  ;;  %805 = vmatpush.bf16.msra.mxu1 %v5691_v22  ;;  %v5694_v15 = vpack.c.bf16 %v3493_v44, %v3489_v43 }
 0x13f   : > { %883 = vmatpush.bf16.msrb.mxu0 %v712_v51  ;;  %732 = vperm.xlu2 %2758, %v722_v5  }
 0x140   : > { %862 = vmatpush.bf16.msrb.mxu2 %v5692_v47 }
 0x141   : > { %852 = vmatmul.bf16.gmra.mxu3 %v2451_v45 }
 0x142   : > { %806 = vmatpush.bf16.msra.mxu1 %v5693_v2 }
 0x143   : > { %884 = vmatpush.bf16.msrb.mxu0 %v710_v6 }
 0x144   : > { %863 = vmatpush.bf16.msrb.mxu2 %v5694_v15 }
 0x146   : > { %807 = vmatpush.bf16.msra.mxu1 %v695_v7 }
 0x148   : > { %864 = vmatpush.bf16.msrb.mxu2 %v696_v49 }
 0x14a   : > { %808 = vmatpush.bf16.msra.mxu1 %v693_v8 }
 0x14c   : > { %865 = vmatpush.bf16.msrb.mxu2 %v694_v14 }
 0x14d   : > { %809 = vmatmul.bf16.vlgmr.msra.gmra.mxu1 %v2443_v16 }
 0x14e   : > { %795 = vmatmul.bf16.gmra.mxu0 %v2451_v45 }
 0x14f   : > { %866 = vmatmul.bf16.vlgmr.msrb.gmra.mxu2 %v2443_v16 }
 0x15d   : > { %814 = vmatmul.bf16.gmra.mxu1 %v2455_v36 }
 0x15e   : > { %2462 = vmatmul.msk.bf16.vlgmr.msrb.gmra.mxu0 %vm775_vm9, %v3697_v61 }
 0x15f   : > { %871 = vmatmul.bf16.gmra.mxu2 %v2455_v36 }
 0x16e   : > { %2463 = vmatmul.msk.bf16.gmra.mxu0 %vm775_vm9, %v3794_v48 }
 0x190   : > { %v738_v57 = vpop.permute.xlu2 %737 }
 0x199   : > { %v733_v10 = vpop.permute.xlu2 %732 }
 0x1a5   : > { %v728_v32 = vpop.permute.xlu1 %727 }
 0x1a8   : > { %v829_v25 = vpop.f32.mrf.mxu2 }
 0x1a9   : > { %v743_v3 = vpop.permute.xlu0 %742 }
 0x1b0   : > { %v831_v26 = vpop.f32.mrf.mxu2 }
 0x1b4   : > { %v848_v58 = vpop.f32.mrf.mxu3 }
 0x1b5   : > { %v849_v50 = vadd.f32 %v848_v58, %v728_v32 }
 0x1b8   : > { %v834_v43 = vpop.f32.mrf.mxu2 }
 0x1bb   : > { %v791_v37 = vpop.f32.mrf.mxu0 }
 0x1bc   : > { %v792_v42 = vadd.f32 %v791_v37, %v728_v32  ;;  %v850_v27 = vpop.f32.mrf.mxu3 }
 0x1bd   : > { %v851_v62 = vadd.f32 %v850_v27, %v733_v10 }
 0x1c0   : > { %v836_v30 = vpop.f32.mrf.mxu2 }
 0x1c3   : > { %v793_v44 = vpop.f32.mrf.mxu0 }
 0x1c4   : > { %v794_v23 = vadd.f32 %v793_v44, %v733_v10  ;;  %v853_v22 = vpop.f32.mrf.mxu3 }
 0x1c5   : > { %v854_v17 = vadd.f32 %v853_v22, %v738_v57 }
 0x1ca   : > { %v810_v9 = vpop.f32.mrf.mxu1 }
 0x1cb   : > { %v796_v59 = vpop.f32.mrf.mxu0  ;;  %v811_v20 = vadd.f32 %v810_v9, %v792_v42 }
 0x1cc   : > { %v797_v34 = vadd.f32 %v796_v59, %v738_v57  ;;  %v855_v18 = vpop.f32.mrf.mxu3 }
 0x1cd   : > { %v830_v0 = vadd.f32 %v829_v25, %v811_v20  ;;  %v856_v25 = vadd.f32 %v855_v18, %v743_v3 }
 0x1cf   : > { %v896_v55 = vmax.f32 %v830_v0, 0.0 }
 0x1d2   : > { %v867_v61 = vpop.f32.mrf.mxu2  ;;  %v812_v24 = vpop.f32.mrf.mxu1 }
 0x1d3   : > { %v813_v60 = vadd.f32 %v812_v24, %v794_v23  ;;  %v798_v48 = vpop.f32.mrf.mxu0  ;;  %v868_v1 = vadd.f32 %v867_v61, %v849_v50 }
 0x1d4   : > { %v799_v56 = vadd.f32 %v798_v48, %v743_v3 }
 0x1d5   : > { %v832_v52 = vadd.f32 %v831_v26, %v813_v60 }
 0x1d7   : > { %v898_v13 = vmax.f32 %v832_v52, 0.0 }
 0x1d9   : > { %v3899_v28 = vpack.i.bf16 %v898_v13, %v896_v55  ;;  %v3901_v33 = vpack.c.bf16 %v898_v13, %v896_v55 }
 0x1da   : > { %v815_v19 = vpop.f32.mrf.mxu1  ;;  %v869_v41 = vpop.f32.mrf.mxu2 }
 0x1db   : > { %v886_v63 = vpop.f32.mrf.mxu0  ;;  %2767 = vrot.lane.b32.xlu1 %v3899_v28, %s3257_s22  ;;  %2762 = vrot.lane.b32.xlu2 %v3899_v28, %s3258_s23  ;;  %v816_v51 = vadd.f32 %v815_v19, %v797_v34  ;;  %v870_v21 = vadd.f32 %v869_v41, %v851_v62 }
 0x1dc   : > { %v887_v38 = vadd.f32 %v886_v63, %v868_v1 }
 0x1dd   : > { %v835_v6 = vadd.f32 %v834_v43, %v816_v51 }
 0x1de   : > { %v897_v46 = vmax.f32 %v887_v38, 0.0 }
 0x1df   : > { %v900_v49 = vmax.f32 %v835_v6, 0.0 }
 0x1e2   : > { %v817_v35 = vpop.f32.mrf.mxu1  ;;  %v872_v2 = vpop.f32.mrf.mxu2 }
 0x1e3   : > { %v818_v45 = vadd.f32 %v817_v35, %v799_v56  ;;  %v888_v12 = vpop.f32.mrf.mxu0  ;;  %v873_v26 = vadd.f32 %v872_v2, %v854_v17 }
 0x1e4   : > { %v889_v47 = vadd.f32 %v888_v12, %v870_v21 }
 0x1e5   : > { %v837_v7 = vadd.f32 %v836_v30, %v818_v45 }
 0x1e6   : > { %v899_v15 = vmax.f32 %v889_v47, 0.0 }
 0x1e7   : > { %v902_v8 = vmax.f32 %v837_v7, 0.0 }
 0x1e8   : > { %v3907_v11 = vpack.i.bf16 %v899_v15, %v897_v46  ;;  %v3915_v14 = vpack.c.bf16 %v899_v15, %v897_v46 }
 0x1e9   : > { %v3909_v4 = vpack.i.bf16 %v902_v8, %v900_v49  ;;  %v3913_v5 = vpack.c.bf16 %v902_v8, %v900_v49 }
 0x1ea   : > { %2792 = vrot.lane.b32.xlu2 %v3907_v11, %s3257_s22  ;;  %v874_v36 = vpop.f32.mrf.mxu2 }
 0x1eb   : > { %v891_v16 = vpop.f32.mrf.mxu0  ;;  %2777 = vrot.lane.b32.xlu0 %v3909_v4, %s3257_s22  ;;  %2772 = vrot.lane.b32.xlu1 %v3909_v4, %s3258_s23  ;;  %v875_v37 = vadd.f32 %v874_v36, %v856_v25 }
 0x1ec   : > { %v892_v43 = vadd.f32 %v891_v16, %v873_v26 }
 0x1ee   : > { %v901_v30 = vmax.f32 %v892_v43, 0.0 }
 0x1f3   : > { %v893_v44 = vpop.f32.mrf.mxu0  ;;  %2782 = vrot.lane.b32.xlu0 %v3909_v4, %s3260_s25 }
 0x1f4   : > { %v894_v32 = vadd.f32 %v893_v44, %v875_v37 }
 0x1f6   : > { %v903_v9 = vmax.f32 %v894_v32, 0.0 }
 0x1f8   : > { %v3923_v42 = vpack.i.bf16 %v903_v9, %v901_v30  ;;  %v3925_v59 = vpack.c.bf16 %v903_v9, %v901_v30 }
 0x1fa   : > { %2812 = vrot.lane.b32.xlu1 %v3923_v42, %s3257_s22  ;;  %2797 = vrot.lane.b32.xlu2 %v3923_v42, %s3258_s23 }
 0x1fb   : > { %2787 = vrot.lane.b32.xlu0 %v3907_v11, %s3258_s23 }
 0x202   : > { %2817 = vrot.lane.b32.xlu1 %v3923_v42, %s3260_s25  ;;  %2802 = vrot.lane.b32.xlu2 %v3899_v28, %s3260_s25 }
 0x203   : > { %2807 = vrot.lane.b32.xlu0 %v3907_v11, %s3260_s25 }
 0x235   : > { %v2763_v57 = vpop.permute.xlu2 %2762 }
 0x236   : > { %v2765_v50 = vunpack.i.h.bf16 %v2763_v57  ;;  %v2764_v19 = vunpack.i.l.bf16 %v2763_v57 }
 0x244   : > { %v2793_v10 = vpop.permute.xlu2 %2792 }
 0x245   : > { %v2795_v48 = vunpack.i.h.bf16 %v2793_v10  ;;  %v2794_v52 = vunpack.i.l.bf16 %v2793_v10 }
 0x24d   : > { %v2768_v58 = vpop.permute.xlu1 %2767 }
 0x24e   : > { %v2770_v0 = vunpack.i.h.bf16 %v2768_v58  ;;  %v2769_v60 = vunpack.i.l.bf16 %v2768_v58 }
 0x250   : > { %v944_v34 = vsel %vm459_vm1, %v2769_v60, %v2794_v52  ;;  %v945_v41 = vsel %vm459_vm1, %v2770_v0, %v2795_v48  ;;  %v948_v62 = vsel %vm459_vm1, %v2794_v52, %v2769_v60  ;;  %v949_v1 = vsel %vm459_vm1, %v2795_v48, %v2770_v0 }
 0x254   : > { %v2798_v23 = vpop.permute.xlu2 %2797 }
 0x255   : > { %v2799_v63 = vunpack.i.l.bf16 %v2798_v23  ;;  %v2800_v3 = vunpack.i.h.bf16 %v2798_v23 }
 0x25c   : > { %v3941_v55 = vpop.permute.xlu2 %2802 }
 0x25d   : > { %v2778_v20 = vpop.permute.xlu0 %2777  ;;  %v2773_v61 = vpop.permute.xlu1 %2772  ;;  %v2805_v51 = vunpack.i.h.bf16 %v3941_v55  ;;  %v2804_v21 = vunpack.i.l.bf16 %v3941_v55 }
 0x25e   : > { %v2774_v13 = vunpack.i.l.bf16 %v2773_v61  ;;  %v2775_v27 = vunpack.i.h.bf16 %v2773_v61  ;;  %v2780_v38 = vunpack.i.h.bf16 %v2778_v20  ;;  %v2779_v56 = vunpack.i.l.bf16 %v2778_v20 }
 0x260   : > { %v3955_v35 = vsel %vm434_vm0, %v2774_v13, %v2799_v63  ;;  %v3959_v6 = vsel %vm434_vm0, %v2775_v27, %v2800_v3  ;;  %v926_v47 = vsel %vm434_vm0, %v2799_v63, %v2774_v13  ;;  %v927_v49 = vsel %vm434_vm0, %v2800_v3, %v2775_v27 }
 0x265   : > { %v3939_v24 = vpop.permute.xlu0 %2782 }
 0x266   : > { %v2785_v2 = vunpack.i.h.bf16 %v3939_v24  ;;  %v2784_v60 = vunpack.i.l.bf16 %v3939_v24 }
 0x26c   : > { %v2813_v22 = vpop.permute.xlu1 %2812 }
 0x26d   : > { %v2815_v45 = vunpack.i.h.bf16 %v2813_v22  ;;  %v2814_v12 = vunpack.i.l.bf16 %v2813_v22  ;;  %v2788_v46 = vpop.permute.xlu0 %2787 }
 0x26e   : > { %v2790_v7 = vunpack.i.h.bf16 %v2788_v46  ;;  %v2789_v15 = vunpack.i.l.bf16 %v2788_v46 }
 0x26f   : > { %v951_v8 = vsel %vm459_vm1, %v2815_v45, %v2780_v38  ;;  %v950_v16 = vsel %vm459_vm1, %v2814_v12, %v2779_v56  ;;  %v946_v17 = vsel %vm459_vm1, %v2779_v56, %v2814_v12  ;;  %v947_v18 = vsel %vm459_vm1, %v2780_v38, %v2815_v45 }
 0x270   : > { %v3977_v36 = vsel %vm3398_vm3, %v950_v16, %v3955_v35  ;;  %v3982_v25 = vsel %vm3398_vm3, %v951_v8, %v3959_v6  ;;  %v920_v26 = vsel %vm434_vm0, %v2764_v19, %v2789_v15  ;;  %v921_v37 = vsel %vm434_vm0, %v2765_v50, %v2790_v7 }
 0x271   : > { %v924_v43 = vsel %vm434_vm0, %v2789_v15, %v2764_v19  ;;  %v925_v44 = vsel %vm434_vm0, %v2790_v7, %v2765_v50  ;;  %v956_v32 = vsel %vm3394_vm2, %v946_v17, %v926_v47  ;;  %v958_v30 = vsel %vm3394_vm2, %v947_v18, %v927_v49 }
 0x272   : > { %v1174_v9 = vpack.c.bf16 %v958_v30, %v956_v32  ;;  %v1175_v57 = vpack.c.bf16 %v3982_v25, %v3977_v36  ;;  %v4000_v10 = vsel %vm3402_vm4, %v924_v43, %v944_v34  ;;  %v4004_v58 = vsel %vm3402_vm4, %v925_v44, %v945_v41 }
 0x273   : > { %v2831_v20 = vpack.i.bf16 %v4004_v58, %v4000_v10  ;;  %v952_v23 = vsel %vm3394_vm2, %v944_v34, %v924_v43  ;;  %v954_v61 = vsel %vm3394_vm2, %v945_v41, %v925_v44  ;;  %v953_v0 = vsel %vm3398_vm3, %v948_v62, %v920_v26 }
 0x274   : > { %1264 = vmatpush.bf16.msrb.mxu1 %v1174_v9  ;;  %1321 = vmatpush.bf16.msra.mxu0 %v1175_v57  ;;  %v2818_v48 = vpop.permute.xlu1 %2817  ;;  %v2821_v52 = vpack.i.bf16 %v954_v61, %v952_v23  ;;  %v955_v13 = vsel %vm3398_vm3, %v949_v1, %v921_v37  ;;  %v1172_v50 = vpack.c.bf16 %v954_v61, %v952_v23 }
 0x275   : > { %v2820_v27 = vunpack.i.h.bf16 %v2818_v48  ;;  %v2819_v19 = vunpack.i.l.bf16 %v2818_v48  ;;  %2832 = vrot.lane.b32.xlu0 %v2831_v20, %s3259_s24  ;;  %v2826_v34 = vpack.i.bf16 %v955_v13, %v953_v0  ;;  %v2808_v63 = vpop.permute.xlu0 %2807  ;;  %v1173_v41 = vpack.c.bf16 %v955_v13, %v953_v0 }
 0x276   : > { %2822 = vrot.lane.b32.xlu1 %v2821_v52, %s3260_s25  ;;  %v2810_v3 = vunpack.i.h.bf16 %v2808_v63  ;;  %v2809_v38 = vunpack.i.l.bf16 %v2808_v63  ;;  %v4021_v24 = vsel %vm3406_vm5, %v920_v26, %v948_v62  ;;  %v4025_v56 = vsel %vm3406_vm5, %v921_v37, %v949_v1 }
 0x277   : > { %v4029_v22 = vsel %vm524_vm6, %v2820_v27, %v2785_v2  ;;  %v4033_v45 = vsel %vm524_vm6, %v2819_v19, %v2784_v60  ;;  %2827 = vrot.lane.b32.xlu2 %v2826_v34, %s3260_s25  ;;  %v4038_v12 = vsel %vm524_vm6, %v2784_v60, %v2819_v19  ;;  %v4042_v62 = vsel %vm524_vm6, %v2785_v2, %v2820_v27 }
 0x278   : > { %v4048_v1 = vsel %vm524_vm6, %v2809_v38, %v2804_v21  ;;  %v4054_v46 = vsel %vm524_vm6, %v2810_v3, %v2805_v51  ;;  %1265 = vmatpush.bf16.msrb.mxu1 %v1172_v50  ;;  %1322 = vmatpush.bf16.msra.mxu0 %v1173_v41  ;;  %v1190_v7 = vpack.c.bf16 %v4042_v62, %v4038_v12 }
 0x279   : > { %v4062_v2 = vsel %vm524_vm6, %v2804_v21, %v2809_v38  ;;  %v4068_v15 = vsel %vm524_vm6, %v2805_v51, %v2810_v3  ;;  %v2846_v26 = vpack.i.bf16 %v4025_v56, %v4021_v24  ;;  %v4074_v37 = vsel %vm3402_vm4, %v926_v47, %v946_v17 }
 0x27a   : > { %1283 = vmatpush.bf16.msrb.mxu3 %v1190_v7  ;;  %v4078_v43 = vsel %vm3402_vm4, %v927_v49, %v947_v18  ;;  %v4083_v21 = vsel %vm3406_vm5, %v3955_v35, %v950_v16  ;;  %v1188_v55 = vpack.c.bf16 %v4068_v15, %v4062_v2  ;;  %v4090_v51 = vsel %vm3406_vm5, %v3959_v6, %v951_v8 }
 0x27b   : > { %v2861_v8 = vpack.i.bf16 %v4078_v43, %v4074_v37  ;;  %v2851_v16 = vpack.i.bf16 %v958_v30, %v956_v32  ;;  %v2856_v17 = vpack.i.bf16 %v3982_v25, %v3977_v36  ;;  %v2886_v18 = vpack.i.bf16 %v4090_v51, %v4083_v21  ;;  %v1206_v36 = vld [vmem:[%s5614_s5 + $0x10] sm:$0xff] }
 0x27c   : > { %v5695_v39 = vpack.c.bf16 %v4078_v43, %v4074_v37 }
 0x27d   : > { %2847 = vrot.lane.b32.xlu0 %v2846_v26, %s3260_s25 }
 0x27e   : > { %2837 = vrot.lane.b32.xlu1 %v2846_v26, %s3259_s24  ;;  %1284 = vmatpush.bf16.msrb.mxu3 %v1188_v55 }
 0x27f   : > { %2842 = vrot.lane.b32.xlu2 %v2831_v20, %s3260_s25 }
 0x285   : > { %2862 = vrot.lane.b32.xlu0 %v2861_v8, %s3259_s24 }
 0x286   : > { %2852 = vrot.lane.b32.xlu1 %v2851_v16, %s3260_s25 }
 0x287   : > { %2857 = vrot.lane.b32.xlu2 %v2856_v17, %s3260_s25 }
 0x28d   : > { %2887 = vrot.lane.b32.xlu0 %v2886_v18, %s3260_s25 }
 0x28e   : > { %2867 = vrot.lane.b32.xlu1 %v2886_v18, %s3259_s24 }
 0x28f   : > { %2877 = vrot.lane.b32.xlu2 %v2861_v8, %s3260_s25 }
 0x295   : > { %2892 = vrot.lane.b32.xlu0 %v3899_v28, %s3259_s24  ;;  %v1205_v28 = vld [vmem:[%s5614_s5 + $0x8] sm:$0xff] }
 0x296   : > { %2872 = vrot.lane.b32.xlu1 %v3909_v4, %s3259_s24  ;;  %v1207_v4 = vld [vmem:[%s5614_s5 + $0x18] sm:$0xff] }
 0x297   : > { %2882 = vrot.lane.b32.xlu2 %v3923_v42, %s3259_s24 }
 0x29d   : > { %2907 = vrot.lane.b32.xlu0 %v2856_v17, %s3259_s24 }
 0x29e   : > { %2897 = vrot.lane.b32.xlu1 %v3907_v11, %s3259_s24  ;;  %v1204_v11 = vld [vmem:[%s5614_s5] sm:$0xff] }
 0x29f   : > { %2902 = vrot.lane.b32.xlu2 %v2851_v16, %s3259_s24 }
 0x2a5   : > { %1220 = vperm.xlu0 %2759, %v1206_v36  }
 0x2a6   : > { %2912 = vrot.lane.b32.xlu1 %v2821_v52, %s3259_s24 }
 0x2a7   : > { %2917 = vrot.lane.b32.xlu2 %v2826_v34, %s3259_s24 }
 0x2ad   : > { %1215 = vperm.xlu0 %2759, %v1205_v28  }
 0x2ae   : > { %1225 = vperm.xlu1 %2760, %v1207_v4  }
 0x2af   : > { %1210 = vperm.xlu2 %2758, %v1204_v11  }
 0x2d1   : > { %v4139_v42 = vpop.permute.xlu2 %2827 }
 0x2d2   : > { %v5628_v27 = vunpack.i.h.bf16 %v4139_v42  ;;  %v5630_v19 = vunpack.i.l.bf16 %v4139_v42 }
 0x2d9   : > { %v4141_v25 = vpop.permute.xlu2 %2842 }
 0x2da   : > { %v2845_v7 = vunpack.i.h.bf16 %v4141_v25  ;;  %v2844_v26 = vunpack.i.l.bf16 %v4141_v25 }
 0x2e1   : > { %v4147_v30 = vpop.permute.xlu2 %2857 }
 0x2e2   : > { %v5632_v61 = vunpack.i.h.bf16 %v4147_v30  ;;  %v5634_v0 = vunpack.i.l.bf16 %v4147_v30 }
 0x2e7   : > { %v4143_v44 = vpop.permute.xlu0 %2832 }
 0x2e8   : > { %v4145_v32 = vpop.permute.xlu1 %2822  ;;  %v2835_v55 = vunpack.i.h.bf16 %v4143_v44 }
 0x2e9   : > { %v4151_v20 = vpop.permute.xlu2 %2877  ;;  %v5629_v48 = vunpack.i.h.bf16 %v4145_v32  ;;  %v5631_v52 = vunpack.i.l.bf16 %v4145_v32 }
 0x2ea   : > { %v2880_v16 = vunpack.i.h.bf16 %v4151_v20  ;;  %v2879_v17 = vunpack.i.l.bf16 %v4151_v20 }
 0x2eb   : > { %v4187_v3 = vsel %vm524_vm6, %v5631_v52, %v5630_v19  ;;  %v4195_v38 = vsel %vm524_vm6, %v5629_v48, %v5628_v27  ;;  %v2834_v27 = vunpack.i.l.bf16 %v4143_v44 }
 0x2ec   : > { %v1184_v25 = vpack.c.bf16 %v4195_v38, %v4187_v3 }
 0x2ef   : > { %v4149_v9 = vpop.permute.xlu0 %2847 }
 0x2f0   : > { %v2838_v57 = vpop.permute.xlu1 %2837  ;;  %v2849_v8 = vunpack.i.l.bf16 %v4149_v9  ;;  %v2850_v18 = vunpack.i.h.bf16 %v4149_v9 }
 0x2f1   : > { %v2839_v36 = vunpack.i.l.bf16 %v2838_v57  ;;  %v2840_v4 = vunpack.i.h.bf16 %v2838_v57  ;;  %v2883_v48 = vpop.permute.xlu2 %2882 }
 0x2f2   : > { %v1136_v57 = vsel %vm524_vm6, %v2844_v26, %v2849_v8  ;;  %v1137_v44 = vsel %vm524_vm6, %v2845_v7, %v2850_v18  ;;  %v1140_v43 = vsel %vm524_vm6, %v2849_v8, %v2844_v26 }
 0x2f3   : > { %v1192_v37 = vpack.c.bf16 %v1137_v44, %v1136_v57 }
 0x2f7   : > { %v2863_v23 = vpop.permute.xlu0 %2862 }
 0x2f8   : > { %v4155_v60 = vpop.permute.xlu1 %2852  ;;  %v2864_v19 = vunpack.i.l.bf16 %v2863_v23 }
 0x2f9   : > { %v5633_v13 = vunpack.i.h.bf16 %v4155_v60  ;;  %v5635_v50 = vunpack.i.l.bf16 %v4155_v60  ;;  %v2903_v26 = vpop.permute.xlu2 %2902 }
 0x2fb   : > { %v4169_v34 = vsel %vm524_vm6, %v5635_v50, %v5634_v0  ;;  %v4177_v63 = vsel %vm524_vm6, %v5633_v13, %v5632_v61  ;;  %v2865_v61 = vunpack.i.h.bf16 %v2863_v23  ;;  %v1117_v50 = vsel %vm390_vm7, %v2840_v4, %v2835_v55 }
 0x2fc   : > { %v1186_v41 = vpack.c.bf16 %v4177_v63, %v4169_v34 }
 0x2fe   : > { %1285 = vmatpush.bf16.msrb.mxu3 %v1186_v41 }
 0x2ff   : > { %v2888_v28 = vpop.permute.xlu0 %2887 }
 0x300   : > { %v2890_v11 = vunpack.i.h.bf16 %v2888_v28  ;;  %v2889_v6 = vunpack.i.l.bf16 %v2888_v28  ;;  %v2868_v49 = vpop.permute.xlu1 %2867 }
 0x301   : > { %v2870_v41 = vunpack.i.h.bf16 %v2868_v49  ;;  %v2869_v52 = vunpack.i.l.bf16 %v2868_v49  ;;  %v1116_v49 = vsel %vm390_vm7, %v2839_v36, %v2834_v27 }
 0x302   : > { %v1138_v20 = vsel %vm524_vm6, %v2879_v17, %v2889_v6  ;;  %v1139_v9 = vsel %vm524_vm6, %v2880_v16, %v2890_v11  ;;  %1286 = vmatpush.bf16.msrb.mxu3 %v1184_v25 }
 0x303   : > { %v1194_v28 = vpack.c.bf16 %v1139_v9, %v1138_v20  ;;  %v1114_v13 = vsel %vm390_vm7, %v2864_v19, %v2869_v52  ;;  %v1115_v23 = vsel %vm390_vm7, %v2865_v61, %v2870_v41  ;;  %v1118_v0 = vsel %vm390_vm7, %v2869_v52, %v2864_v19  ;;  %v2474_v19 = vld [vmem:[%s5613_s4 + $0x8] sm:$0xf] }
 0x304   : > { %v1119_v25 = vsel %vm390_vm7, %v2870_v41, %v2865_v61  ;;  %v1171_v35 = vpack.c.bf16 %v1115_v23, %v1114_v13  ;;  %v1148_v47 = vsel %vm390_vm7, %v1138_v20, %v1118_v0  ;;  %v1112_v52 = vsel %vm390_vm7, %v2834_v27, %v2839_v36  ;;  %v2561_v0 = vld [vmem:[%s5613_s4 + $0x10] sm:$0xf0] }
 0x305   : > { %1308 = vmatpush.bf16.msra.mxu2 %v1194_v28  ;;  %v1150_v40 = vsel %vm390_vm7, %v1139_v9, %v1119_v25  ;;  %v1113_v61 = vsel %vm390_vm7, %v2835_v55, %v2840_v4  ;;  %v2884_v27 = vunpack.i.l.bf16 %v2883_v48  ;;  %v4252_v20 = vor.u32 %v2561_v0, %v2474_v19 }
 0x306   : > { %1287 = vmatpush.bf16.msrb.mxu3 %v5695_v39  ;;  %v1170_v54 = vpack.c.bf16 %v1150_v40, %v1148_v47  ;;  %1323 = vmatpush.bf16.msra.mxu0 %v1171_v35  ;;  %v1144_v39 = vsel %vm390_vm7, %v1136_v57, %v1116_v49  ;;  %v1146_v40 = vsel %vm390_vm7, %v1137_v44, %v1117_v50  ;;  %v2885_v47 = vunpack.i.h.bf16 %v2883_v48 }
 0x307   : > { %v4244_v41 = vpop.permute.xlu0 %2892  ;;  %v1169_v35 = vpack.c.bf16 %v1113_v61, %v1112_v52  ;;  %v1141_v9 = vsel %vm524_vm6, %v2850_v18, %v2845_v7  ;;  %v1142_v57 = vsel %vm524_vm6, %v2889_v6, %v2879_v17  ;;  %v1143_v50 = vsel %vm524_vm6, %v2890_v11, %v2880_v16  ;;  %v2559_v18 = vld [vmem:[%s5613_s4 + $0x4] sm:$0xf]  ;;  %v2468_v11 = vld [vmem:[%s5613_s4 + $0xc] sm:$0xf0] }
 0x308   : > { %1266 = vmatpush.bf16.msrb.mxu1 %v1170_v54  ;;  %v2873_v55 = vpop.permute.xlu1 %2872  ;;  %v5696_v48 = vpack.c.bf16 %v4004_v58, %v4000_v10  ;;  %v1168_v54 = vpack.c.bf16 %v1146_v40, %v1144_v39  ;;  %v2905_v25 = vunpack.i.h.bf16 %v2903_v26  ;;  %v2904_v0 = vunpack.i.l.bf16 %v2903_v26 }
 0x309   : > { %v2875_v36 = vunpack.i.h.bf16 %v2873_v55  ;;  %v2874_v4 = vunpack.i.l.bf16 %v2873_v55  ;;  %1309 = vmatpush.bf16.msra.mxu2 %v1192_v37 }
 0x30a   : > { %1288 = vmatpush.bf16.msrb.mxu3 %v5696_v48  ;;  %1324 = vmatpush.bf16.msra.mxu0 %v1169_v35  ;;  %v2918_v48 = vpop.permute.xlu2 %2917 }
 0x30b   : > { %v1050_v8 = vsel %vm390_vm7, %v2874_v4, %v2884_v27  ;;  %v1051_v28 = vsel %vm390_vm7, %v2875_v36, %v2885_v47  ;;  %v1054_v7 = vsel %vm390_vm7, %v2884_v27, %v2874_v4  ;;  %v1055_v6 = vsel %vm390_vm7, %v2885_v47, %v2875_v36 }
 0x30c   : > { %1267 = vmatpush.bf16.msrb.mxu1 %v1168_v54  ;;  %v4274_v10 = vsel %vm393_vm8, %v1050_v8, %v4033_v45  ;;  %v4279_v58 = vsel %vm393_vm8, %v1051_v28, %v4029_v22  ;;  %v1167_v16 = vpack.c.bf16 %v1051_v28, %v1050_v8  ;;  %v1084_v17 = vsel %vm390_vm7, %v4038_v12, %v1054_v7 }
 0x30d   : > { %v1157_v45 = vsel %vm393_vm8, %v1114_v13, %v1142_v57  ;;  %v1159_v22 = vsel %vm393_vm8, %v1115_v23, %v1143_v50  ;;  %v1086_v44 = vsel %vm390_vm7, %v4042_v62, %v1055_v6  ;;  %2488 = vmatmul.msk.bf16.vlgmr.msra.gmra.mxu2 %vm775_vm9, %v4252_v20  ;;  %v1191_v12 = vpack.c.bf16 %v4279_v58, %v4274_v10  ;;  %v2486_v6 = vld [vmem:[%s5613_s4 + $0x20] sm:$0xf] }
 0x30e   : > { %1289 = vmatpush.bf16.msrb.mxu3 %v3913_v5  ;;  %v1166_v49 = vpack.c.bf16 %v1086_v44, %v1084_v17  ;;  %1325 = vmatpush.bf16.msra.mxu0 %v1167_v16  ;;  %v4302_v13 = vor.u32 %v2559_v18, %v2468_v11  ;;  %v1153_v23 = vsel %vm393_vm8, %v1112_v52, %v1140_v43  ;;  %v2895_v5 = vunpack.i.h.bf16 %v4244_v41 }
 0x30f   : > { %v2908_v19 = vpop.permute.xlu0 %2907  ;;  %v1155_v62 = vsel %vm393_vm8, %v1113_v61, %v1141_v9  ;;  %v1195_v47 = vpack.c.bf16 %v1159_v22, %v1157_v45  ;;  %v2894_v27 = vunpack.i.l.bf16 %v4244_v41  ;;  %v2919_v17 = vunpack.i.l.bf16 %v2918_v48 }
 0x310   : > { %1268 = vmatpush.bf16.msrb.mxu1 %v1166_v49  ;;  %v2910_v37 = vunpack.i.h.bf16 %v2908_v19  ;;  %v2909_v39 = vunpack.i.l.bf16 %v2908_v19  ;;  %v2898_v40 = vpop.permute.xlu1 %2897  ;;  %v1193_v50 = vpack.c.bf16 %v1155_v62, %v1153_v23  ;;  %v2560_v49 = vld [vmem:[%s5613_s4 + $0x8] sm:$0xf0] }
 0x311   : > { %v2900_v55 = vunpack.i.h.bf16 %v2898_v40  ;;  %v2899_v36 = vunpack.i.l.bf16 %v2898_v40 }
 0x312   : > { %1290 = vmatpush.bf16.msrb.mxu3 %v3901_v33  ;;  %v990_v52 = vsel %vm390_vm7, %v2909_v39, %v2904_v0  ;;  %v991_v61 = vsel %vm390_vm7, %v2910_v37, %v2905_v25  ;;  %v986_v26 = vsel %vm390_vm7, %v2904_v0, %v2909_v39  ;;  %v987_v8 = vsel %vm390_vm7, %v2905_v25, %v2910_v37 }
 0x313   : > { %v1048_v43 = vsel %vm390_vm7, %v2894_v27, %v2899_v36  ;;  %v1049_v4 = vsel %vm390_vm7, %v2895_v5, %v2900_v55  ;;  %v1052_v41 = vsel %vm390_vm7, %v2899_v36, %v2894_v27  ;;  %v1053_v35 = vsel %vm390_vm7, %v2900_v55, %v2895_v5  ;;  %v2562_v5 = vld [vmem:[%s5613_s4 + $0x1c] sm:$0xf]  ;;  %v2480_v27 = vld [vmem:[%s5613_s4 + $0x24] sm:$0xf0] }
 0x314   : > { %v1165_v33 = vpack.c.bf16 %v1049_v4, %v1048_v43  ;;  %v1080_v9 = vsel %vm390_vm7, %v4062_v2, %v1052_v41  ;;  %v1082_v57 = vsel %vm390_vm7, %v4068_v15, %v1053_v35  ;;  %v1089_v28 = vsel %vm393_vm8, %v1048_v43, %v4048_v1  ;;  %v2564_v1 = vld [vmem:[%s5613_s4 + $0x28] sm:$0xf0] }
 0x315   : > { %1291 = vmatmul.bf16.vlgmr.msrb.gmra.mxu3 %v4302_v13  ;;  %v1164_v54 = vpack.c.bf16 %v1082_v57, %v1080_v9  ;;  %v1020_v2 = vsel %vm390_vm7, %v4169_v34, %v990_v52  ;;  %v1022_v15 = vsel %vm390_vm7, %v4177_v63, %v991_v61  ;;  %v1091_v7 = vsel %vm393_vm8, %v1049_v4, %v4054_v46  ;;  %v2466_v46 = vld [vmem:[%s5613_s4] sm:$0xf] }
 0x316   : > { %1365 = vmatpush.bf16.msra.mxu3 %v1195_v47  ;;  %1326 = vmatpush.bf16.msra.mxu0 %v1165_v33  ;;  %v1189_v16 = vpack.c.bf16 %v1091_v7, %v1089_v28  ;;  %v2920_v34 = vunpack.i.h.bf16 %v2918_v48  ;;  %v1163_v11 = vpack.c.bf16 %v987_v8, %v986_v26  ;;  %v1162_v22 = vpack.c.bf16 %v1022_v15, %v1020_v2  ;;  %v2478_v48 = vld [vmem:[%s5613_s4 + $0x18] sm:$0xf]  ;;  %v1211_v15 = vpop.permute.xlu2 %1210 }
 0x317   : > { %1269 = vmatpush.bf16.msrb.mxu1 %v1164_v54  ;;  %v2487_v44 = vor.u32 %v2564_v1, %v2486_v6  ;;  %v2467_v47 = vor.u32 %v2560_v49, %v2466_v46  ;;  %v5698_v55 = vunpack.i.l.bf16 %v4147_v30  ;;  %v5699_v52 = vunpack.i.h.bf16 %v4155_v60 }
 0x318   : > { %v2913_v18 = vpop.permute.xlu1 %2912  ;;  %v5700_v61 = vunpack.i.h.bf16 %v4147_v30  ;;  %v5702_v4 = vunpack.i.l.bf16 %v4139_v42  ;;  %v5703_v30 = vunpack.i.h.bf16 %v4145_v32  ;;  %v5704_v41 = vunpack.i.h.bf16 %v4139_v42  ;;  %v2563_v42 = vld [vmem:[%s5613_s4 + $0x20] sm:$0xf0] }
 0x319   : > { %v2915_v63 = vunpack.i.h.bf16 %v2913_v18  ;;  %v2914_v45 = vunpack.i.l.bf16 %v2913_v18  ;;  %v5705_v54 = vpack.c.bf16 %v4090_v51, %v4083_v21  ;;  %v1221_v51 = vpop.permute.xlu0 %1220 }
 0x31a   : > { %1366 = vmatpush.bf16.msra.mxu3 %v1193_v50  ;;  %1327 = vmatpush.bf16.msra.mxu0 %v1163_v11  ;;  %v1015_v43 = vsel %vm524_vm6, %v5700_v61, %v5699_v52  ;;  %v1013_v35 = vsel %vm524_vm6, %v5704_v41, %v5703_v30 }
 0x31b   : > { %1270 = vmatpush.bf16.msrb.mxu1 %v1162_v22  ;;  %v984_v25 = vsel %vm390_vm7, %v2914_v45, %v2919_v17  ;;  %v985_v19 = vsel %vm390_vm7, %v2915_v63, %v2920_v34  ;;  %v988_v23 = vsel %vm390_vm7, %v2919_v17, %v2914_v45  ;;  %v989_v62 = vsel %vm390_vm7, %v2920_v34, %v2915_v63 }
 0x31c   : > { %v1161_v0 = vpack.c.bf16 %v985_v19, %v984_v25  ;;  %v1016_v37 = vsel %vm390_vm7, %v4187_v3, %v988_v23  ;;  %v1018_v39 = vsel %vm390_vm7, %v4195_v38, %v989_v62  ;;  %v2483_v3 = vor.u32 %v2562_v5, %v2480_v27 }
 0x31d   : > { %v1160_v40 = vpack.c.bf16 %v1018_v39, %v1016_v37  ;;  %2489 = vmatmul.msk.bf16.gmra.mxu2 %vm775_vm9, %v2487_v44  ;;  %v5697_v38 = vunpack.i.l.bf16 %v4155_v60  ;;  %v1031_v58 = vsel %vm393_vm8, %v987_v8, %v1015_v43  ;;  %v1027_v57 = vsel %vm393_vm8, %v985_v19, %v1013_v35 }
 0x31e   : > { %1328 = vmatpush.bf16.msra.mxu0 %v1161_v0 }
 0x31f   : > { %1271 = vmatpush.bf16.msrb.mxu1 %v1160_v40  ;;  %v1014_v36 = vsel %vm524_vm6, %v5698_v55, %v5697_v38 }
 0x320   : > { %v1029_v10 = vsel %vm393_vm8, %v986_v26, %v1014_v36  ;;  %v5706_v26 = vpack.c.bf16 %v4025_v56, %v4021_v24  ;;  %v1226_v22 = vpop.permute.xlu1 %1225 }
 0x321   : > { %1329 = vmatmul.bf16.vlgmr.msra.gmra.mxu0 %v2467_v47  ;;  %v1187_v33 = vpack.c.bf16 %v1031_v58, %v1029_v10  ;;  %v1216_v56 = vpop.permute.xlu0 %1215 }
 0x322   : > { %1272 = vmatmul.bf16.vlgmr.msrb.gmra.mxu1 %v2467_v47 }
 0x323   : > { %1340 = vmatpush.bf16.msra.mxu1 %v1191_v12  ;;  %v5701_v12 = vunpack.i.l.bf16 %v4145_v32  ;;  %v2479_v32 = vor.u32 %v2563_v42, %v2478_v48 }
 0x325   : > { %1296 = vmatmul.bf16.gmra.mxu3 %v2483_v3  ;;  %v1012_v60 = vsel %vm524_vm6, %v5702_v4, %v5701_v12 }
 0x326   : > { %v1025_v9 = vsel %vm393_vm8, %v984_v25, %v1012_v60 }
 0x327   : > { %1341 = vmatpush.bf16.msra.mxu1 %v1189_v16  ;;  %v1185_v50 = vpack.c.bf16 %v1027_v57, %v1025_v9 }
 0x32b   : > { %1342 = vmatpush.bf16.msra.mxu1 %v1187_v33 }
 0x32f   : > { %1343 = vmatpush.bf16.msra.mxu1 %v1185_v50 }
 0x331   : > { %1334 = vmatmul.bf16.gmra.mxu0 %v2479_v32 }
 0x332   : > { %1277 = vmatmul.bf16.gmra.mxu1 %v2479_v32 }
 0x333   : > { %1344 = vmatpush.bf16.msra.mxu1 %v5705_v54 }
 0x335   : > { %2490 = vmatmul.msk.bf16.vlgmr.msra.gmra.mxu3 %vm775_vm9, %v4252_v20 }
 0x337   : > { %1345 = vmatpush.bf16.msra.mxu1 %v5706_v26 }
 0x33b   : > { %1346 = vmatpush.bf16.msra.mxu1 %v3925_v59 }
 0x33f   : > { %1347 = vmatpush.bf16.msra.mxu1 %v3915_v14 }
 0x342   : > { %1348 = vmatmul.bf16.vlgmr.msra.gmra.mxu1 %v4302_v13 }
 0x345   : > { %2491 = vmatmul.msk.bf16.gmra.mxu3 %vm775_vm9, %v2487_v44 }
 0x352   : > { %1353 = vmatmul.bf16.gmra.mxu1 %v2483_v3 }
 0x390   : > { %v1311_v8 = vpop.f32.mrf.mxu2 }
 0x398   : > { %v1292_v21 = vpop.f32.mrf.mxu3  ;;  %v1313_v6 = vpop.f32.mrf.mxu2 }
 0x39e   : > { %v1330_v45 = vpop.f32.mrf.mxu0 }
 0x39f   : > { %v1273_v28 = vpop.f32.mrf.mxu1  ;;  %v1331_v47 = vadd.f32 %v1330_v45, %v1211_v15 }
 0x3a0   : > { %v1294_v2 = vpop.f32.mrf.mxu3  ;;  %v1274_v24 = vadd.f32 %v1273_v28, %v1211_v15  ;;  %v1316_v11 = vpop.f32.mrf.mxu2 }
 0x3a2   : > { %v1293_v20 = vadd.f32 %v1292_v21, %v1274_v24 }
 0x3a4   : > { %v4432_v14 = vadd.f32 %v1311_v8, %v1293_v20 }
 0x3a6   : > { %v1332_v39 = vpop.f32.mrf.mxu0 }
 0x3a7   : > { %v1275_v7 = vpop.f32.mrf.mxu1  ;;  %v1333_v27 = vadd.f32 %v1332_v39, %v1216_v56 }
 0x3a8   : > { %v1276_v1 = vadd.f32 %v1275_v7, %v1216_v56  ;;  %v1297_v59 = vpop.f32.mrf.mxu3  ;;  %v1318_v19 = vpop.f32.mrf.mxu2 }
 0x3aa   : > { %v1295_v16 = vadd.f32 %v1294_v2, %v1276_v1 }
 0x3ac   : > { %v4434_v13 = vadd.f32 %v1313_v6, %v1295_v16 }
 0x3ae   : > { %v4438_v34 = vpack.i.bf16 %v4434_v13, %v4432_v14  ;;  %v1335_v36 = vpop.f32.mrf.mxu0 }
 0x3af   : > { %v1278_v17 = vpop.f32.mrf.mxu1  ;;  %v1336_v4 = vadd.f32 %v1335_v36, %v1221_v51 }
 0x3b0   : > { %2927 = vrot.lane.b32.xlu1 %v4438_v34, %s3257_s22  ;;  %2922 = vrot.lane.b32.xlu2 %v4438_v34, %s3258_s23  ;;  %v1299_v18 = vpop.f32.mrf.mxu3  ;;  %v1279_v63 = vadd.f32 %v1278_v17, %v1221_v51 }
 0x3b2   : > { %v1298_v46 = vadd.f32 %v1297_v59, %v1279_v63 }
 0x3b4   : > { %v4444_v62 = vadd.f32 %v1316_v11, %v1298_v46 }
 0x3b6   : > { %5707 = vst [vmem:[#allocation5_spill] sm:$0xff] %v4444_v62  ;;  %v1337_v12 = vpop.f32.mrf.mxu0 }
 0x3b7   : > { %v1280_v44 = vpop.f32.mrf.mxu1  ;;  %v1338_v60 = vadd.f32 %v1337_v12, %v1226_v22 }
 0x3b8   : > { %v1281_v49 = vadd.f32 %v1280_v44, %v1226_v22  ;;  %v1368_v23 = vpop.f32.mrf.mxu3 }
 0x3ba   : > { %v1300_v25 = vadd.f32 %v1299_v18, %v1281_v49 }
 0x3bc   : > { %v4446_v0 = vadd.f32 %v1318_v19, %v1300_v25 }
 0x3be   : > { %5708 = vst [vmem:[#allocation6_spill] sm:$0xff] %v4446_v0  ;;  %v2936_v37 = vpack.i.bf16 %v4446_v0, %v4444_v62 }
 0x3bf   : > { %v1349_v40 = vpop.f32.mrf.mxu1 }
 0x3c0   : > { %2937 = vrot.lane.b32.xlu0 %v2936_v37, %s3257_s22  ;;  %2932 = vrot.lane.b32.xlu1 %v2936_v37, %s3258_s23  ;;  %v1370_v5 = vpop.f32.mrf.mxu3  ;;  %v1350_v3 = vadd.f32 %v1349_v40, %v1331_v47 }
 0x3c2   : > { %v4452_v52 = vadd.f32 %v1368_v23, %v1350_v3 }
 0x3c4   : > { %5709 = vst [vmem:[#allocation7_spill] sm:$0xff] %v4452_v52 }
 0x3c7   : > { %v1351_v38 = vpop.f32.mrf.mxu1 }
 0x3c8   : > { %v1352_v55 = vadd.f32 %v1351_v38, %v1333_v27  ;;  %v1373_v10 = vpop.f32.mrf.mxu3 }
 0x3ca   : > { %v4454_v61 = vadd.f32 %v1370_v5, %v1352_v55 }
 0x3cc   : > { %5710 = vst [vmem:[#allocation8_spill] sm:$0xff] %v4454_v61  ;;  %v2941_v43 = vpack.i.bf16 %v4454_v61, %v4452_v52 }
 0x3ce   : > { %2942 = vrot.lane.b32.xlu0 %v2941_v43, %s3258_s23  ;;  %2947 = vrot.lane.b32.xlu2 %v2941_v43, %s3257_s22 }
 0x3cf   : > { %v1354_v58 = vpop.f32.mrf.mxu1 }
 0x3d0   : > { %v1355_v30 = vadd.f32 %v1354_v58, %v1336_v4  ;;  %v1375_v33 = vpop.f32.mrf.mxu3 }
 0x3d2   : > { %v4461_v9 = vadd.f32 %v1373_v10, %v1355_v30 }
 0x3d4   : > { %5711 = vst [vmem:[#allocation9_spill] sm:$0xff] %v4461_v9 }
 0x3d6   : > { %2977 = vrot.lane.b32.xlu0 %v2936_v37, %s3259_s24 }
 0x3d7   : > { %v1356_v41 = vpop.f32.mrf.mxu1 }
 0x3d8   : > { %v1357_v35 = vadd.f32 %v1356_v41, %v1338_v60 }
 0x3da   : > { %v4463_v57 = vadd.f32 %v1375_v33, %v1357_v35 }
 0x3dc   : > { %5712 = vst [vmem:[#allocation10_spill] sm:$0xff] %v4463_v57  ;;  %v2956_v50 = vpack.i.bf16 %v4463_v57, %v4461_v9 }
 0x3de   : > { %2957 = vrot.lane.b32.xlu1 %v2956_v50, %s3257_s22  ;;  %2952 = vrot.lane.b32.xlu2 %v2956_v50, %s3258_s23 }
 0x3e6   : > { %2962 = vrot.lane.b32.xlu1 %v2936_v37, %s3260_s25  ;;  %2972 = vrot.lane.b32.xlu2 %v2941_v43, %s3260_s25 }
 0x3ee   : > { %2967 = vrot.lane.b32.xlu1 %v4438_v34, %s3260_s25  ;;  %2982 = vrot.lane.b32.xlu2 %v2956_v50, %s3260_s25 }
 0x3f6   : > { %2987 = vrot.lane.b32.xlu1 %v2956_v50, %s3259_s24 }
 0x40a   : > { %v2923_v48 = vpop.permute.xlu2 %2922 }
 0x40b   : > { %v2925_v2 = vunpack.i.h.bf16 %v2923_v48  ;;  %v2924_v15 = vunpack.i.l.bf16 %v2923_v48 }
 0x422   : > { %v2928_v54 = vpop.permute.xlu1 %2927 }
 0x423   : > { %v2930_v51 = vunpack.i.h.bf16 %v2928_v54  ;;  %v2929_v8 = vunpack.i.l.bf16 %v2928_v54 }
 0x428   : > { %v2948_v32 = vpop.permute.xlu2 %2947 }
 0x429   : > { %v2950_v26 = vunpack.i.h.bf16 %v2948_v32  ;;  %v2949_v21 = vunpack.i.l.bf16 %v2948_v32 }
 0x42b   : > { %v1419_v6 = vsel %vm459_vm1, %v2930_v51, %v2950_v26  ;;  %v1423_v20 = vsel %vm459_vm1, %v2950_v26, %v2930_v51  ;;  %v1418_v1 = vsel %vm459_vm1, %v2929_v8, %v2949_v21  ;;  %v1422_v59 = vsel %vm459_vm1, %v2949_v21, %v2929_v8 }
 0x432   : > { %v2938_v42 = vpop.permute.xlu0 %2937  ;;  %v2933_v19 = vpop.permute.xlu1 %2932 }
 0x433   : > { %v2935_v5 = vunpack.i.h.bf16 %v2933_v19  ;;  %v2940_v27 = vunpack.i.h.bf16 %v2938_v42  ;;  %v2939_v3 = vunpack.i.l.bf16 %v2938_v42  ;;  %v2934_v38 = vunpack.i.l.bf16 %v2933_v19 }
 0x438   : > { %v2953_v24 = vpop.permute.xlu2 %2952 }
 0x439   : > { %v2955_v40 = vunpack.i.h.bf16 %v2953_v24  ;;  %v2954_v47 = vunpack.i.l.bf16 %v2953_v24 }
 0x43b   : > { %v1397_v36 = vsel %vm434_vm0, %v2935_v5, %v2955_v40  ;;  %v1401_v10 = vsel %vm434_vm0, %v2955_v40, %v2935_v5  ;;  %v1396_v4 = vsel %vm434_vm0, %v2934_v38, %v2954_v47 }
 0x440   : > { %v2943_v28 = vpop.permute.xlu0 %2942  ;;  %v4518_v39 = vpop.permute.xlu2 %2972 }
 0x441   : > { %v2945_v56 = vunpack.i.h.bf16 %v2943_v28  ;;  %v2944_v7 = vunpack.i.l.bf16 %v2943_v28 }
 0x443   : > { %v1394_v16 = vsel %vm434_vm0, %v2924_v15, %v2944_v7  ;;  %v1395_v17 = vsel %vm434_vm0, %v2925_v2, %v2945_v56  ;;  %v1398_v18 = vsel %vm434_vm0, %v2944_v7, %v2924_v15  ;;  %v1399_v11 = vsel %vm434_vm0, %v2945_v56, %v2925_v2 }
 0x444   : > { %v4493_v63 = vsel %vm3402_vm4, %v1398_v18, %v1418_v1  ;;  %v4497_v45 = vsel %vm3402_vm4, %v1399_v11, %v1419_v6  ;;  %v4501_v44 = vsel %vm3406_vm5, %v1394_v16, %v1422_v59  ;;  %v4505_v46 = vsel %vm3406_vm5, %v1395_v17, %v1423_v20 }
 0x445   : > { %v3001_v49 = vpack.i.bf16 %v4497_v45, %v4493_v63  ;;  %v2996_v25 = vpack.i.bf16 %v4505_v46, %v4501_v44  ;;  %v1426_v30 = vsel %vm3394_vm2, %v1418_v1, %v1398_v18  ;;  %v1428_v41 = vsel %vm3394_vm2, %v1419_v6, %v1399_v11 }
 0x446   : > { %v1427_v1 = vsel %vm3398_vm3, %v1422_v59, %v1394_v16  ;;  %v1429_v18 = vsel %vm3398_vm3, %v1423_v20, %v1395_v17  ;;  %v1646_v19 = vpack.c.bf16 %v1428_v41, %v1426_v30 }
 0x447   : > { %3002 = vrot.lane.b32.xlu2 %v3001_v49, %s3260_s25  ;;  %2992 = vrot.lane.b32.xlu0 %v3001_v49, %s3259_s24  ;;  %v1647_v16 = vpack.c.bf16 %v1429_v18, %v1427_v1 }
 0x448   : > { %2997 = vrot.lane.b32.xlu1 %v2996_v25, %s3259_s24  ;;  %v2983_v51 = vpop.permute.xlu2 %2982 }
 0x449   : > { %v2985_v11 = vunpack.i.h.bf16 %v2983_v51  ;;  %v2984_v49 = vunpack.i.l.bf16 %v2983_v51 }
 0x44f   : > { %3027 = vrot.lane.b32.xlu2 %v2941_v43, %s3259_s24  ;;  %3007 = vrot.lane.b32.xlu0 %v2996_v25, %s3260_s25  ;;  %v1400_v43 = vsel %vm434_vm0, %v2954_v47, %v2934_v38 }
 0x450   : > { %v2958_v55 = vpop.permute.xlu1 %2957 }
 0x451   : > { %v2960_v58 = vunpack.i.h.bf16 %v2958_v55  ;;  %v2959_v12 = vunpack.i.l.bf16 %v2958_v55 }
 0x453   : > { %v1421_v35 = vsel %vm459_vm1, %v2940_v27, %v2960_v58  ;;  %v1425_v33 = vsel %vm459_vm1, %v2960_v58, %v2940_v27  ;;  %v1420_v50 = vsel %vm459_vm1, %v2939_v3, %v2959_v12  ;;  %v1424_v48 = vsel %vm459_vm1, %v2959_v12, %v2939_v3 }
 0x454   : > { %v1430_v42 = vsel %vm3394_vm2, %v1420_v50, %v1400_v43  ;;  %v4546_v54 = vsel %vm3398_vm3, %v1424_v48, %v1396_v4  ;;  %v1432_v26 = vsel %vm3394_vm2, %v1421_v35, %v1401_v10  ;;  %v4552_v21 = vsel %vm3398_vm3, %v1425_v33, %v1397_v36 }
 0x455   : > { %v1648_v8 = vpack.c.bf16 %v1432_v26, %v1430_v42  ;;  %v1649_v28 = vpack.c.bf16 %v4552_v21, %v4546_v54  ;;  %v4558_v2 = vsel %vm3402_vm4, %v1400_v43, %v1420_v50  ;;  %v4562_v15 = vsel %vm3402_vm4, %v1401_v10, %v1421_v35 }
 0x456   : > { %v3041_v24 = vpack.i.bf16 %v4562_v15, %v4558_v2  ;;  %v4568_v56 = vsel %vm3406_vm5, %v1396_v4, %v1424_v48  ;;  %v4572_v7 = vsel %vm3406_vm5, %v1397_v36, %v1425_v33  ;;  %v3051_v55 = vpack.i.bf16 %v1432_v26, %v1430_v42  ;;  %v2978_v33 = vpop.permute.xlu0 %2977 }
 0x457   : > { %1738 = vmatpush.bf16.msrb.mxu2 %v1648_v8  ;;  %1795 = vmatpush.bf16.msrb.mxu3 %v1649_v28  ;;  %v3016_v6 = vpack.i.bf16 %v4572_v7, %v4568_v56  ;;  %v3031_v36 = vpack.i.bf16 %v1428_v41, %v1426_v30  ;;  %v2975_v58 = vunpack.i.h.bf16 %v4518_v39  ;;  %v2974_v12 = vunpack.i.l.bf16 %v4518_v39 }
 0x458   : > { %3042 = vrot.lane.b32.xlu2 %v3041_v24, %s3260_s25  ;;  %3012 = vrot.lane.b32.xlu0 %v3041_v24, %s3259_s24  ;;  %v2963_v25 = vpop.permute.xlu1 %2962  ;;  %v3036_v50 = vpack.i.bf16 %v1429_v18, %v1427_v1  ;;  %v2980_v42 = vunpack.i.h.bf16 %v2978_v33  ;;  %v2979_v26 = vunpack.i.l.bf16 %v2978_v33 }
 0x459   : > { %3017 = vrot.lane.b32.xlu1 %v3016_v6, %s3259_s24  ;;  %v2965_v40 = vunpack.i.h.bf16 %v2963_v25  ;;  %v2964_v47 = vunpack.i.l.bf16 %v2963_v25 }
 0x45b   : > { %v1548_v20 = vsel %vm524_vm6, %v2964_v47, %v2984_v49  ;;  %v1549_v17 = vsel %vm524_vm6, %v2965_v40, %v2985_v11  ;;  %v1552_v27 = vsel %vm524_vm6, %v2984_v49, %v2964_v47  ;;  %v1553_v3 = vsel %vm524_vm6, %v2985_v11, %v2965_v40  ;;  %1739 = vmatpush.bf16.msrb.mxu2 %v1646_v19 }
 0x45c   : > { %v1664_v38 = vpack.c.bf16 %v1549_v17, %v1548_v20  ;;  %1796 = vmatpush.bf16.msrb.mxu3 %v1647_v16  ;;  %v3056_v40 = vpack.i.bf16 %v4552_v21, %v4546_v54  ;;  %v1678_v16 = vld [vmem:[%s5616_s7] sm:$0xff]  ;;  %v1680_v54 = vld [vmem:[%s5616_s7 + $0x10] sm:$0xff]  ;;  %v1679_v21 = vld [vmem:[%s5616_s7 + $0x8] sm:$0xff] }
 0x45e   : > { %1757 = vmatpush.bf16.msrb.mxu0 %v1664_v38 }
 0x460   : > { %3052 = vrot.lane.b32.xlu2 %v3051_v55, %s3260_s25  ;;  %3032 = vrot.lane.b32.xlu0 %v3031_v36, %s3260_s25  ;;  %v2968_v10 = vpop.permute.xlu1 %2967 }
 0x461   : > { %3022 = vrot.lane.b32.xlu1 %v4438_v34, %s3259_s24  ;;  %v2970_v4 = vunpack.i.h.bf16 %v2968_v10  ;;  %v2969_v43 = vunpack.i.l.bf16 %v2968_v10 }
 0x463   : > { %v4603_v35 = vsel %vm524_vm6, %v2974_v12, %v2969_v43  ;;  %v4607_v30 = vsel %vm524_vm6, %v2975_v58, %v2970_v4  ;;  %v4611_v41 = vsel %vm524_vm6, %v2969_v43, %v2974_v12  ;;  %v4615_v39 = vsel %vm524_vm6, %v2970_v4, %v2975_v58 }
 0x464   : > { %v1662_v34 = vpack.c.bf16 %v4615_v39, %v4611_v41 }
 0x466   : > { %1758 = vmatpush.bf16.msrb.mxu0 %v1662_v34 }
 0x468   : > { %3062 = vrot.lane.b32.xlu2 %v3051_v55, %s3259_s24  ;;  %3047 = vrot.lane.b32.xlu0 %v3016_v6, %s3260_s25  ;;  %v2988_v48 = vpop.permute.xlu1 %2987 }
 0x469   : > { %3037 = vrot.lane.b32.xlu1 %v3036_v50, %s3260_s25  ;;  %v2990_v51 = vunpack.i.h.bf16 %v2988_v48  ;;  %v2989_v8 = vunpack.i.l.bf16 %v2988_v48 }
 0x46b   : > { %v1529_v28 = vsel %vm390_vm7, %v2990_v51, %v2980_v42  ;;  %v1528_v24 = vsel %vm390_vm7, %v2989_v8, %v2979_v26  ;;  %v1524_v1 = vsel %vm390_vm7, %v2979_v26, %v2989_v8  ;;  %v1525_v18 = vsel %vm390_vm7, %v2980_v42, %v2990_v51 }
 0x46c   : > { %v4632_v6 = vsel %vm393_vm8, %v1524_v1, %v1552_v27  ;;  %v4636_v11 = vsel %vm393_vm8, %v1525_v18, %v1553_v3  ;;  %v4640_v49 = vsel %vm390_vm7, %v1548_v20, %v1528_v24  ;;  %v4644_v25 = vsel %vm390_vm7, %v1549_v17, %v1529_v28  ;;  %v1681_v20 = vld [vmem:[%s5616_s7 + $0x18] sm:$0xff] }
 0x46d   : > { %v1641_v37 = vpack.c.bf16 %v1525_v18, %v1524_v1 }
 0x470   : > { %3057 = vrot.lane.b32.xlu0 %v3056_v40, %s3260_s25  ;;  %3077 = vrot.lane.b32.xlu2 %v3036_v50, %s3259_s24 }
 0x471   : > { %3072 = vrot.lane.b32.xlu1 %v3031_v36, %s3259_s24 }
 0x478   : > { %3067 = vrot.lane.b32.xlu0 %v3056_v40, %s3259_s24  ;;  %1684 = vperm.xlu2 %2758, %v1678_v16  }
 0x479   : > { %1699 = vperm.xlu1 %2760, %v1681_v20  }
 0x480   : > { %1694 = vperm.xlu0 %2759, %v1680_v54  }
 0x488   : > { %1689 = vperm.xlu0 %2759, %v1679_v21  }
 0x4a1   : > { %v4668_v17 = vpop.permute.xlu2 %3002 }
 0x4a2   : > { %v5719_v32 = vunpack.i.h.bf16 %v4668_v17 }
 0x4a9   : > { %v4672_v3 = vpop.permute.xlu2 %3027 }
 0x4aa   : > { %v3030_v21 = vunpack.i.h.bf16 %v4672_v3 }
 0x4b2   : > { %v4676_v36 = vpop.permute.xlu2 %3042 }
 0x4b3   : > { %v5644_v1 = vunpack.i.h.bf16 %v4676_v36 }
 0x4b9   : > { %v4670_v27 = vpop.permute.xlu0 %2992 }
 0x4ba   : > { %v2998_v55 = vpop.permute.xlu1 %2997  ;;  %v2995_v58 = vunpack.i.h.bf16 %v4670_v27  ;;  %v2994_v12 = vunpack.i.l.bf16 %v4670_v27  ;;  %v4700_v16 = vpop.permute.xlu2 %3052  ;;  %v3029_v27 = vunpack.i.l.bf16 %v4672_v3 }
 0x4bb   : > { %v3000_v33 = vunpack.i.h.bf16 %v2998_v55  ;;  %v2999_v50 = vunpack.i.l.bf16 %v2998_v55 }
 0x4bd   : > { %v4692_v28 = vsel %vm390_vm7, %v2994_v12, %v2999_v50  ;;  %v4696_v24 = vsel %vm390_vm7, %v2995_v58, %v3000_v33 }
 0x4be   : > { %v1643_v54 = vpack.c.bf16 %v4696_v24, %v4692_v28 }
 0x4c1   : > { %v4674_v38 = vpop.permute.xlu0 %3007 }
 0x4ca   : > { %v3013_v10 = vpop.permute.xlu0 %3012 }
 0x4cb   : > { %v3015_v4 = vunpack.i.h.bf16 %v3013_v10  ;;  %v3014_v43 = vunpack.i.l.bf16 %v3013_v10  ;;  %v3018_v34 = vpop.permute.xlu1 %3017 }
 0x4cc   : > { %v3020_v48 = vunpack.i.h.bf16 %v3018_v34  ;;  %v3019_v42 = vunpack.i.l.bf16 %v3018_v34 }
 0x4ce   : > { %v4682_v26 = vsel %vm390_vm7, %v3014_v43, %v3019_v42  ;;  %v4686_v51 = vsel %vm390_vm7, %v3015_v4, %v3020_v48  ;;  %v1592_v19 = vsel %vm390_vm7, %v3019_v42, %v3014_v43  ;;  %v1593_v42 = vsel %vm390_vm7, %v3020_v48, %v3015_v4  ;;  %v2567_v4 = vld [vmem:[%s5615_s6 + $0x10] sm:$0xf0] }
 0x4cf   : > { %v1645_v8 = vpack.c.bf16 %v4686_v51, %v4682_v26  ;;  %v1590_v48 = vsel %vm390_vm7, %v2999_v50, %v2994_v12 }
 0x4d1   : > { %1797 = vmatpush.bf16.msrb.mxu3 %v1645_v8 }
 0x4d2   : > { %v4698_v40 = vpop.permute.xlu0 %3032 }
 0x4d3   : > { %v4702_v20 = vpop.permute.xlu1 %3022 }
 0x4d4   : > { %v3025_v55 = vunpack.i.h.bf16 %v4702_v20  ;;  %v3024_v10 = vunpack.i.l.bf16 %v4702_v20  ;;  %v5717_v20 = vunpack.i.l.bf16 %v4668_v17 }
 0x4d5   : > { %1798 = vmatpush.bf16.msrb.mxu3 %v1643_v54  ;;  %v4738_v54 = vpop.permute.xlu2 %3062 }
 0x4d6   : > { %v1522_v34 = vsel %vm390_vm7, %v3024_v10, %v3029_v27  ;;  %v1523_v8 = vsel %vm390_vm7, %v3025_v55, %v3030_v21 }
 0x4d7   : > { %v4717_v59 = vsel %vm393_vm8, %v1522_v34, %v4603_v35  ;;  %v4722_v3 = vsel %vm393_vm8, %v1523_v8, %v4607_v30  ;;  %v5647_v35 = vunpack.i.l.bf16 %v4676_v36 }
 0x4d9   : > { %1799 = vmatpush.bf16.msrb.mxu3 %v1641_v37  ;;  %v1639_v37 = vpack.c.bf16 %v1523_v8, %v1522_v34  ;;  %v5716_v8 = vunpack.i.l.bf16 %v4674_v38 }
 0x4da   : > { %v4730_v23 = vpop.permute.xlu0 %3047 }
 0x4db   : > { %v5643_v5 = vunpack.i.h.bf16 %v4730_v23  ;;  %v5646_v30 = vunpack.i.l.bf16 %v4730_v23  ;;  %v4735_v47 = vpop.permute.xlu1 %3037  ;;  %v1610_v43 = vsel %vm524_vm6, %v5717_v20, %v5716_v8  ;;  %v2502_v20 = vld [vmem:[%s5615_s6 + $0x8] sm:$0xf]  ;;  %v5653_v8 = vunpack.i.l.bf16 %v4700_v16 }
 0x4dc   : > { %v5650_v12 = vunpack.i.h.bf16 %v4735_v47 }
 0x4dd   : > { %v1613_v18 = vsel %vm524_vm6, %v5644_v1, %v5643_v5  ;;  %v1612_v34 = vsel %vm524_vm6, %v5647_v35, %v5646_v30  ;;  %1800 = vmatpush.bf16.msrb.mxu3 %v1639_v37  ;;  %v5718_v1 = vunpack.i.h.bf16 %v4674_v38 }
 0x4de   : > { %v1668_v22 = vpack.c.bf16 %v1613_v18, %v1612_v34  ;;  %v1622_v5 = vsel %vm390_vm7, %v1612_v34, %v1592_v19  ;;  %v1624_v30 = vsel %vm390_vm7, %v1613_v18, %v1593_v42  ;;  %v1591_v19 = vsel %vm390_vm7, %v3000_v33, %v2995_v58 }
 0x4df   : > { %v1611_v37 = vsel %vm524_vm6, %v5719_v32, %v5718_v1  ;;  %v1644_v34 = vpack.c.bf16 %v1624_v30, %v1622_v5  ;;  %v1618_v32 = vsel %vm390_vm7, %v1610_v43, %v1590_v48  ;;  %v3055_v18 = vunpack.i.h.bf16 %v4700_v16 }
 0x4e0   : > { %1782 = vmatpush.bf16.msrb.mxu1 %v1668_v22  ;;  %v1620_v1 = vsel %vm390_vm7, %v1611_v37, %v1591_v19  ;;  %v1666_v35 = vpack.c.bf16 %v1611_v37, %v1610_v43  ;;  %v4790_v58 = vor.u32 %v2567_v4, %v2502_v20  ;;  %v5648_v22 = vunpack.i.l.bf16 %v4735_v47 }
 0x4e1   : > { %1740 = vmatpush.bf16.msrb.mxu2 %v1644_v34  ;;  %v1642_v50 = vpack.c.bf16 %v1620_v1, %v1618_v32  ;;  %v5651_v30 = vunpack.i.h.bf16 %v4698_v40  ;;  %v5649_v19 = vunpack.i.l.bf16 %v4698_v40  ;;  %v1527_v37 = vsel %vm390_vm7, %v3030_v21, %v3025_v55  ;;  %v3078_v34 = vpop.permute.xlu2 %3077 }
 0x4e2   : > { %v4788_v42 = vpop.permute.xlu0 %3057  ;;  %v1526_v20 = vsel %vm390_vm7, %v3029_v27, %v3024_v10  ;;  %v1556_v10 = vsel %vm390_vm7, %v4615_v39, %v1527_v37  ;;  %v3080_v1 = vunpack.i.h.bf16 %v3078_v34 }
 0x4e3   : > { %v5654_v5 = vunpack.i.h.bf16 %v4788_v42  ;;  %v5652_v33 = vunpack.i.l.bf16 %v4788_v42  ;;  %v3073_v48 = vpop.permute.xlu1 %3072  ;;  %v1482_v32 = vsel %vm524_vm6, %v5649_v19, %v5648_v22  ;;  %v1483_v21 = vsel %vm524_vm6, %v5651_v30, %v5650_v12 }
 0x4e4   : > { %1783 = vmatpush.bf16.msrb.mxu1 %v1666_v35  ;;  %v3075_v27 = vunpack.i.h.bf16 %v3073_v48  ;;  %v1554_v55 = vsel %vm390_vm7, %v4611_v41, %v1526_v20  ;;  %v5720_v22 = vpack.c.bf16 %v4644_v25, %v4640_v49  ;;  %v1658_v12 = vpack.c.bf16 %v1483_v21, %v1482_v32 }
 0x4e5   : > { %v1484_v43 = vsel %vm524_vm6, %v5653_v8, %v5652_v33  ;;  %v1485_v35 = vsel %vm524_vm6, %v3055_v18, %v5654_v5  ;;  %1741 = vmatpush.bf16.msrb.mxu2 %v1642_v50  ;;  %v3074_v50 = vunpack.i.l.bf16 %v3073_v48  ;;  %v3065_v30 = vunpack.i.h.bf16 %v4738_v54 }
 0x4e6   : > { %v1660_v4 = vpack.c.bf16 %v1485_v35, %v1484_v43  ;;  %v3079_v5 = vunpack.i.l.bf16 %v3078_v34  ;;  %v1463_v41 = vsel %vm390_vm7, %v3080_v1, %v3075_v27  ;;  %v1638_v39 = vpack.c.bf16 %v1556_v10, %v1554_v55 }
 0x4e7   : > { %2516 = vmatmul.msk.bf16.vlgmr.msrb.gmra.mxu1 %vm775_vm9, %v4790_v58  ;;  %v5722_v10 = vpack.c.bf16 %v4497_v45, %v4493_v63  ;;  %v1652_v63 = vpack.c.bf16 %v4446_v0, %v4444_v62  ;;  %v5727_v45 = vpack.c.bf16 %v4636_v11, %v4632_v6  ;;  %v5728_v6 = vunpack.i.h.bf16 %v4668_v17 }
 0x4e8   : > { %1759 = vmatpush.bf16.msrb.mxu0 %v1660_v4  ;;  %v3064_v4 = vunpack.i.l.bf16 %v4738_v54  ;;  %v1458_v34 = vsel %vm390_vm7, %v3074_v50, %v3079_v5  ;;  %v5729_v11 = vunpack.i.h.bf16 %v4674_v38 }
 0x4e9   : > { %1742 = vmatpush.bf16.msrb.mxu2 %v5720_v22  ;;  %v1462_v22 = vsel %vm390_vm7, %v3079_v5, %v3074_v50  ;;  %v1492_v5 = vsel %vm390_vm7, %v1483_v21, %v1463_v41  ;;  %v5723_v21 = vunpack.i.h.bf16 %v4676_v36  ;;  %v5724_v50 = vunpack.i.h.bf16 %v4730_v23 }
 0x4ea   : > { %v3068_v19 = vpop.permute.xlu0 %3067  ;;  %v5725_v41 = vunpack.i.l.bf16 %v4676_v36  ;;  %v2565_v36 = vld [vmem:[%s5615_s6 + $0x4] sm:$0xf] }
 0x4eb   : > { %v3070_v33 = vunpack.i.h.bf16 %v3068_v19  ;;  %v3069_v8 = vunpack.i.l.bf16 %v3068_v19 }
 0x4ec   : > { %1760 = vmatpush.bf16.msrb.mxu0 %v1658_v12 }
 0x4ed   : > { %v1465_v48 = vsel %vm390_vm7, %v3070_v33, %v3065_v30  ;;  %v1464_v49 = vsel %vm390_vm7, %v3069_v8, %v3064_v4  ;;  %v1460_v25 = vsel %vm390_vm7, %v3064_v4, %v3069_v8  ;;  %v1461_v54 = vsel %vm390_vm7, %v3065_v30, %v3070_v33  ;;  %1743 = vmatpush.bf16.msrb.mxu2 %v1638_v39  ;;  %v2494_v30 = vld [vmem:[%s5615_s6] sm:$0xf] }
 0x4ee   : > { %v1637_v19 = vpack.c.bf16 %v1461_v54, %v1460_v25  ;;  %v1494_v12 = vsel %vm390_vm7, %v1484_v43, %v1464_v49  ;;  %v1496_v37 = vsel %vm390_vm7, %v1485_v35, %v1465_v48  ;;  %v1459_v8 = vsel %vm390_vm7, %v3075_v27, %v3080_v1  ;;  %v2566_v43 = vld [vmem:[%s5615_s6 + $0x8] sm:$0xf0] }
 0x4ef   : > { %v1636_v20 = vpack.c.bf16 %v1496_v37, %v1494_v12  ;;  %v5721_v33 = vpack.c.bf16 %v4562_v15, %v4558_v2  ;;  %v1490_v35 = vsel %vm390_vm7, %v1482_v32, %v1462_v22  ;;  %v2514_v2 = vld [vmem:[%s5615_s6 + $0x20] sm:$0xf]  ;;  %v2570_v15 = vld [vmem:[%s5615_s6 + $0x28] sm:$0xf0]  ;;  %v1635_v27 = vpack.c.bf16 %v1459_v8, %v1458_v34  ;;  %v2496_v22 = vld [vmem:[%s5615_s6 + $0xc] sm:$0xf0] }
 0x4f0   : > { %1801 = vmatpush.bf16.msrb.mxu3 %v1637_v19  ;;  %v2495_v55 = vor.u32 %v2566_v43, %v2494_v30  ;;  %v1634_v32 = vpack.c.bf16 %v1492_v5, %v1490_v35  ;;  %v2515_v1 = vor.u32 %v2570_v15, %v2514_v2  ;;  %v1617_v4 = vsel %vm524_vm6, %v5724_v50, %v5723_v21  ;;  %v2508_v50 = vld [vmem:[%s5615_s6 + $0x24] sm:$0xf0] }
 0x4f1   : > { %1761 = vmatpush.bf16.msrb.mxu0 %v5721_v33  ;;  %1744 = vmatpush.bf16.msrb.mxu2 %v1636_v20  ;;  %v5726_v39 = vunpack.i.l.bf16 %v4730_v23  ;;  %v1633_v23 = vsel %vm393_vm8, %v4686_v51, %v1617_v4  ;;  %v5730_v19 = vunpack.i.l.bf16 %v4668_v17  ;;  %v5731_v51 = vunpack.i.l.bf16 %v4674_v38 }
 0x4f2   : > { %v5732_v37 = vunpack.i.h.bf16 %v4788_v42  ;;  %v5733_v33 = vunpack.i.l.bf16 %v4700_v16  ;;  %v5734_v30 = vunpack.i.l.bf16 %v4788_v42  ;;  %v1650_v17 = vpack.c.bf16 %v4434_v13, %v4432_v14 }
 0x4f3   : > { %v1616_v48 = vsel %vm524_vm6, %v5726_v39, %v5725_v41  ;;  %v1614_v12 = vsel %vm524_vm6, %v5731_v51, %v5730_v19  ;;  %v2499_v5 = vor.u32 %v2565_v36, %v2496_v22  ;;  %v5737_v15 = vunpack.i.h.bf16 %v4735_v47 }
 0x4f4   : > { %1802 = vmatpush.bf16.msrb.mxu3 %v1635_v27  ;;  %v1631_v49 = vsel %vm393_vm8, %v4682_v26, %v1616_v48  ;;  %v1615_v26 = vsel %vm524_vm6, %v5729_v11, %v5728_v6  ;;  %v1489_v20 = vsel %vm524_vm6, %v5732_v37, %v3055_v18  ;;  %v1488_v43 = vsel %vm524_vm6, %v5734_v30, %v5733_v33 }
 0x4f5   : > { %1762 = vmatpush.bf16.msrb.mxu0 %v5722_v10  ;;  %1745 = vmatpush.bf16.msrb.mxu2 %v1634_v32  ;;  %v1503_v38 = vsel %vm393_vm8, %v1460_v25, %v1488_v43  ;;  %v1505_v35 = vsel %vm393_vm8, %v1461_v54, %v1489_v20  ;;  %v5735_v18 = vpack.c.bf16 %v4722_v3, %v4717_v59  ;;  %v5736_v25 = vunpack.i.h.bf16 %v4698_v40 }
 0x4f6   : > { %v1669_v16 = vpack.c.bf16 %v1633_v23, %v1631_v49  ;;  %v1627_v42 = vsel %vm393_vm8, %v4692_v28, %v1614_v12  ;;  %v1629_v2 = vsel %vm393_vm8, %v4696_v24, %v1615_v26  ;;  %v5738_v59 = vunpack.i.l.bf16 %v4698_v40  ;;  %v2506_v40 = vld [vmem:[%s5615_s6 + $0x18] sm:$0xf] }
 0x4f7   : > { %1803 = vmatmul.bf16.vlgmr.msrb.gmra.mxu3 %v2495_v55  ;;  %2517 = vmatmul.msk.bf16.gmra.mxu1 %vm775_vm9, %v2515_v1  ;;  %v1487_v54 = vsel %vm524_vm6, %v5737_v15, %v5736_v25  ;;  %v5739_v3 = vunpack.i.l.bf16 %v4735_v47  ;;  %v1661_v28 = vpack.c.bf16 %v1505_v35, %v1503_v38  ;;  %v1667_v10 = vpack.c.bf16 %v1629_v2, %v1627_v42  ;;  %v2569_v47 = vld [vmem:[%s5615_s6 + $0x20] sm:$0xf0]  ;;  %v1700_v38 = vpop.permute.xlu1 %1699 }
 0x4f8   : > { %1746 = vmatmul.bf16.vlgmr.msrb.gmra.mxu2 %v2495_v55  ;;  %v1501_v24 = vsel %vm393_vm8, %v1459_v8, %v1487_v54  ;;  %v2507_v21 = vor.u32 %v2569_v47, %v2506_v40  ;;  %v2568_v8 = vld [vmem:[%s5615_s6 + $0x1c] sm:$0xf]  ;;  %v5741_v4 = vpack.c.bf16 %v4505_v46, %v4501_v44  ;;  %v1653_v39 = vpack.c.bf16 %v4463_v57, %v4461_v9 }
 0x4f9   : > { %1814 = vmatpush.bf16.msra.mxu2 %v5727_v45  ;;  %1763 = vmatpush.bf16.msrb.mxu0 %v1652_v63  ;;  %v1486_v27 = vsel %vm524_vm6, %v5739_v3, %v5738_v59  ;;  %v2511_v41 = vor.u32 %v2568_v8, %v2508_v50  ;;  %v1685_v63 = vpop.permute.xlu2 %1684 }
 0x4fa   : > { %v1499_v55 = vsel %vm393_vm8, %v1458_v34, %v1486_v27  ;;  %v5740_v34 = vpack.c.bf16 %v4572_v7, %v4568_v56  ;;  %v1651_v56 = vpack.c.bf16 %v4454_v61, %v4452_v52  ;;  %v1695_v7 = vpop.permute.xlu0 %1694 }
 0x4fb   : > { %v1659_v32 = vpack.c.bf16 %v1501_v24, %v1499_v55 }
 0x4fd   : > { %1815 = vmatpush.bf16.msra.mxu2 %v5735_v18  ;;  %1764 = vmatpush.bf16.msrb.mxu0 %v1650_v17 }
 0x500   : > { %1765 = vmatmul.bf16.vlgmr.msrb.gmra.mxu0 %v2499_v5 }
 0x501   : > { %1839 = vmatpush.bf16.msra.mxu0 %v1669_v16  ;;  %1816 = vmatpush.bf16.msra.mxu2 %v1661_v28 }
 0x502   : > { %v1690_v49 = vpop.permute.xlu0 %1689 }
 0x505   : > { %1840 = vmatpush.bf16.msra.mxu0 %v1667_v10  ;;  %1817 = vmatpush.bf16.msra.mxu2 %v1659_v32 }
 0x507   : > { %1808 = vmatmul.bf16.gmra.mxu3 %v2507_v21 }
 0x508   : > { %1751 = vmatmul.bf16.gmra.mxu2 %v2507_v21 }
 0x509   : > { %1818 = vmatpush.bf16.msra.mxu2 %v5740_v34 }
 0x50d   : > { %1819 = vmatpush.bf16.msra.mxu2 %v5741_v4 }
 0x510   : > { %1770 = vmatmul.bf16.gmra.mxu0 %v2511_v41 }
 0x511   : > { %1820 = vmatpush.bf16.msra.mxu2 %v1653_v39 }
 0x515   : > { %1821 = vmatpush.bf16.msra.mxu2 %v1651_v56 }
 0x518   : > { %1822 = vmatmul.bf16.vlgmr.msra.gmra.mxu2 %v2499_v5 }
 0x520   : > { %2518 = vmatmul.msk.bf16.vlgmr.msra.gmra.mxu0 %vm775_vm9, %v4790_v58 }
 0x528   : > { %1827 = vmatmul.bf16.gmra.mxu2 %v2511_v41 }
 0x530   : > { %2519 = vmatmul.msk.bf16.gmra.mxu0 %vm775_vm9, %v2515_v1 }
 0x564   : > { %v1785_v44 = vpop.f32.mrf.mxu1 }
 0x56c   : > { %v1787_v36 = vpop.f32.mrf.mxu1 }
 0x574   : > { %v1790_v33 = vpop.f32.mrf.mxu1 }
 0x57a   : > { %v1804_v17 = vpop.f32.mrf.mxu3 }
 0x57b   : > { %v1747_v46 = vpop.f32.mrf.mxu2  ;;  %v1805_v10 = vadd.f32 %v1804_v17, %v1685_v63 }
 0x57c   : > { %v1748_v45 = vadd.f32 %v1747_v46, %v1685_v63  ;;  %v1792_v25 = vpop.f32.mrf.mxu1 }
 0x57d   : > { %v1766_v48 = vpop.f32.mrf.mxu0 }
 0x57e   : > { %v1767_v23 = vadd.f32 %v1766_v48, %v1748_v45 }
 0x580   : > { %v1786_v26 = vadd.f32 %v1785_v44, %v1767_v23 }
 0x582   : > { %v1852_v12 = vmax.f32 %v1786_v26, 0.0  ;;  %v1806_v54 = vpop.f32.mrf.mxu3 }
 0x583   : > { %v1749_v22 = vpop.f32.mrf.mxu2  ;;  %v1807_v47 = vadd.f32 %v1806_v54, %v1690_v49 }
 0x584   : > { %v1750_v11 = vadd.f32 %v1749_v22, %v1690_v49 }
 0x585   : > { %v1768_v6 = vpop.f32.mrf.mxu0 }
 0x586   : > { %v1769_v19 = vadd.f32 %v1768_v6, %v1750_v11 }
 0x588   : > { %v1788_v51 = vadd.f32 %v1787_v36, %v1769_v19 }
 0x58a   : > { %v1854_v58 = vmax.f32 %v1788_v51, 0.0  ;;  %v1809_v50 = vpop.f32.mrf.mxu3 }
 0x58b   : > { %v1752_v37 = vpop.f32.mrf.mxu2  ;;  %v1810_v63 = vadd.f32 %v1809_v50, %v1695_v7 }
 0x58c   : > { %v4991_v1 = vpack.i.bf16 %v1854_v58, %v1852_v12  ;;  %v4993_v30 = vpack.c.bf16 %v1854_v58, %v1852_v12  ;;  %v1753_v43 = vadd.f32 %v1752_v37, %v1695_v7 }
 0x58d   : > { %v1771_v20 = vpop.f32.mrf.mxu0 }
 0x58e   : > { %3087 = vrot.lane.b32.xlu1 %v4991_v1, %s3257_s22  ;;  %3082 = vrot.lane.b32.xlu2 %v4991_v1, %s3258_s23  ;;  %v1772_v35 = vadd.f32 %v1771_v20, %v1753_v43 }
 0x590   : > { %v1791_v42 = vadd.f32 %v1790_v33, %v1772_v35 }
 0x592   : > { %v1856_v59 = vmax.f32 %v1791_v42, 0.0  ;;  %v1811_v45 = vpop.f32.mrf.mxu3 }
 0x593   : > { %v1754_v18 = vpop.f32.mrf.mxu2  ;;  %v1812_v23 = vadd.f32 %v1811_v45, %v1700_v38 }
 0x594   : > { %v1755_v5 = vadd.f32 %v1754_v18, %v1700_v38 }
 0x595   : > { %v1773_v16 = vpop.f32.mrf.mxu0 }
 0x596   : > { %v1774_v2 = vadd.f32 %v1773_v16, %v1755_v5 }
 0x598   : > { %v1793_v15 = vadd.f32 %v1792_v25, %v1774_v2 }
 0x59a   : > { %v1858_v3 = vmax.f32 %v1793_v15, 0.0 }
 0x59b   : > { %v1823_v27 = vpop.f32.mrf.mxu2 }
 0x59c   : > { %v4999_v55 = vpack.i.bf16 %v1858_v3, %v1856_v59  ;;  %v5001_v24 = vpack.c.bf16 %v1858_v3, %v1856_v59  ;;  %v1824_v40 = vadd.f32 %v1823_v27, %v1805_v10 }
 0x59d   : > { %v1842_v28 = vpop.f32.mrf.mxu0 }
 0x59e   : > { %3097 = vrot.lane.b32.xlu0 %v4999_v55, %s3257_s22  ;;  %3092 = vrot.lane.b32.xlu1 %v4999_v55, %s3258_s23  ;;  %v1843_v34 = vadd.f32 %v1842_v28, %v1824_v40 }
 0x5a0   : > { %v1853_v41 = vmax.f32 %v1843_v34, 0.0 }
 0x5a3   : > { %v1825_v32 = vpop.f32.mrf.mxu2 }
 0x5a4   : > { %v1826_v8 = vadd.f32 %v1825_v32, %v1807_v47 }
 0x5a5   : > { %v1844_v21 = vpop.f32.mrf.mxu0 }
 0x5a6   : > { %v1845_v4 = vadd.f32 %v1844_v21, %v1826_v8  ;;  %3102 = vrot.lane.b32.xlu0 %v4999_v55, %s3260_s25 }
 0x5a8   : > { %v1855_v39 = vmax.f32 %v1845_v4, 0.0 }
 0x5aa   : > { %v5009_v56 = vpack.i.bf16 %v1855_v39, %v1853_v41  ;;  %v5011_v48 = vpack.c.bf16 %v1855_v39, %v1853_v41 }
 0x5ab   : > { %v1828_v44 = vpop.f32.mrf.mxu2 }
 0x5ac   : > { %3112 = vrot.lane.b32.xlu2 %v5009_v56, %s3257_s22  ;;  %v1829_v49 = vadd.f32 %v1828_v44, %v1810_v63 }
 0x5ad   : > { %v1847_v46 = vpop.f32.mrf.mxu0 }
 0x5ae   : > { %3107 = vrot.lane.b32.xlu0 %v5009_v56, %s3258_s23  ;;  %v1848_v6 = vadd.f32 %v1847_v46, %v1829_v49 }
 0x5b0   : > { %v1857_v19 = vmax.f32 %v1848_v6, 0.0 }
 0x5b3   : > { %v1830_v36 = vpop.f32.mrf.mxu2 }
 0x5b4   : > { %v1831_v11 = vadd.f32 %v1830_v36, %v1812_v23 }
 0x5b5   : > { %v1849_v22 = vpop.f32.mrf.mxu0 }
 0x5b6   : > { %v1850_v26 = vadd.f32 %v1849_v22, %v1831_v11  ;;  %3127 = vrot.lane.b32.xlu0 %v5009_v56, %s3260_s25 }
 0x5b8   : > { %v1859_v51 = vmax.f32 %v1850_v26, 0.0 }
 0x5ba   : > { %v5019_v12 = vpack.i.bf16 %v1859_v51, %v1857_v19  ;;  %v5021_v58 = vpack.c.bf16 %v1859_v51, %v1857_v19 }
 0x5bc   : > { %3132 = vrot.lane.b32.xlu1 %v5019_v12, %s3257_s22  ;;  %3117 = vrot.lane.b32.xlu2 %v5019_v12, %s3258_s23  ;;  %s5581_s22 = scalar_lea.vmem %s5619_s10, %s3325_s15 }
 0x5c4   : > { %3137 = vrot.lane.b32.xlu1 %v5019_v12, %s3260_s25  ;;  %3122 = vrot.lane.b32.xlu2 %v4991_v1, %s3260_s25 }
 0x5e8   : > { %v3083_v7 = vpop.permute.xlu2 %3082 }
 0x5e9   : > { %v3085_v42 = vunpack.i.h.bf16 %v3083_v7  ;;  %v3084_v2 = vunpack.i.l.bf16 %v3083_v7 }
 0x600   : > { %v3088_v17 = vpop.permute.xlu1 %3087 }
 0x601   : > { %v3090_v18 = vunpack.i.h.bf16 %v3088_v17  ;;  %v3089_v16 = vunpack.i.l.bf16 %v3088_v17 }
 0x606   : > { %v3113_v20 = vpop.permute.xlu2 %3112 }
 0x607   : > { %v3115_v38 = vunpack.i.h.bf16 %v3113_v20  ;;  %v3114_v35 = vunpack.i.l.bf16 %v3113_v20 }
 0x609   : > { %v1901_v54 = vsel %vm459_vm1, %v3090_v18, %v3115_v38  ;;  %v1905_v59 = vsel %vm459_vm1, %v3115_v38, %v3090_v18  ;;  %v1900_v3 = vsel %vm459_vm1, %v3089_v16, %v3114_v35  ;;  %v1904_v27 = vsel %vm459_vm1, %v3114_v35, %v3089_v16 }
 0x610   : > { %v5031_v37 = vpop.permute.xlu0 %3097  ;;  %v3093_v63 = vpop.permute.xlu1 %3092 }
 0x611   : > { %v3095_v16 = vunpack.i.h.bf16 %v3093_v63 }
 0x616   : > { %v3118_v43 = vpop.permute.xlu2 %3117 }
 0x617   : > { %v3120_v38 = vunpack.i.h.bf16 %v3118_v43  ;;  %v3119_v35 = vunpack.i.l.bf16 %v3118_v43 }
 0x618   : > { %v5033_v33 = vpop.permute.xlu0 %3102 }
 0x619   : > { %v1883_v43 = vsel %vm434_vm0, %v3120_v38, %v3095_v16  ;;  %v3104_v53 = vunpack.i.l.bf16 %v5033_v33 }
 0x61e   : > { %v5067_v50 = vpop.permute.xlu2 %3122 }
 0x61f   : > { %v3125_v22 = vunpack.i.h.bf16 %v5067_v50  ;;  %v3124_v26 = vunpack.i.l.bf16 %v5067_v50  ;;  %v2160_v50 = vld [vmem:[%s5618_s9] sm:$0xff] }
 0x620   : > { %v3108_v5 = vpop.permute.xlu0 %3107 }
 0x621   : > { %v3110_v25 = vunpack.i.h.bf16 %v3108_v5  ;;  %v3109_v15 = vunpack.i.l.bf16 %v3108_v5  ;;  %v3094_v5 = vunpack.i.l.bf16 %v3093_v63 }
 0x623   : > { %v1876_v28 = vsel %vm434_vm0, %v3084_v2, %v3109_v15  ;;  %v1877_v10 = vsel %vm434_vm0, %v3085_v42, %v3110_v25  ;;  %v1880_v40 = vsel %vm434_vm0, %v3109_v15, %v3084_v2  ;;  %v1881_v47 = vsel %vm434_vm0, %v3110_v25, %v3085_v42 }
 0x624   : > { %v5053_v32 = vsel %vm3402_vm4, %v1880_v40, %v1900_v3  ;;  %v5057_v21 = vsel %vm3402_vm4, %v1881_v47, %v1901_v54  ;;  %v5061_v34 = vsel %vm3394_vm2, %v1900_v3, %v1880_v40  ;;  %v5065_v8 = vsel %vm3394_vm2, %v1901_v54, %v1881_v47 }
 0x625   : > { %v3151_v4 = vpack.i.bf16 %v5057_v21, %v5053_v32  ;;  %v5073_v41 = vpack.i.bf16 %v5065_v8, %v5061_v34  ;;  %v5077_v44 = vsel %vm3398_vm3, %v1904_v27, %v1876_v28  ;;  %v5081_v46 = vsel %vm3398_vm3, %v1905_v59, %v1877_v10 }
 0x626   : > { %v5085_v45 = vpack.i.bf16 %v5081_v46, %v5077_v44  ;;  %v5089_v23 = vsel %vm3406_vm5, %v1876_v28, %v1904_v27  ;;  %v5093_v36 = vsel %vm3406_vm5, %v1877_v10, %v1905_v59  ;;  %v3100_v2 = vunpack.i.h.bf16 %v5031_v37 }
 0x627   : > { %3152 = vrot.lane.b32.xlu0 %v3151_v4, %s3259_s24  ;;  %3142 = vrot.lane.b32.xlu1 %v5073_v41, %s3260_s25  ;;  %v3166_v18 = vpack.i.bf16 %v5093_v36, %v5089_v23  ;;  %v3099_v25 = vunpack.i.l.bf16 %v5031_v37  ;;  %v1879_v59 = vsel %vm434_vm0, %v3095_v16, %v3120_v38  ;;  %v1878_v3 = vsel %vm434_vm0, %v3094_v5, %v3119_v35 }
 0x628   : > { %3147 = vrot.lane.b32.xlu2 %v5085_v45, %s3260_s25  ;;  %v5101_v6 = vpop.permute.xlu0 %3127  ;;  %v1882_v27 = vsel %vm434_vm0, %v3119_v35, %v3094_v5  ;;  %v2128_v49 = vpack.c.bf16 %v5065_v8, %v5061_v34 }
 0x629   : > { %v3130_v19 = vunpack.i.h.bf16 %v5101_v6  ;;  %v3129_v51 = vunpack.i.l.bf16 %v5101_v6 }
 0x62b   : > { %v5112_v20 = vsel %vm524_vm6, %v3129_v51, %v3124_v26  ;;  %v5118_v17 = vsel %vm524_vm6, %v3130_v19, %v3125_v22 }
 0x62e   : > { %v3133_v42 = vpop.permute.xlu1 %3132 }
 0x62f   : > { %v3135_v15 = vunpack.i.h.bf16 %v3133_v42  ;;  %v3134_v54 = vunpack.i.l.bf16 %v3133_v42  ;;  %3167 = vrot.lane.b32.xlu0 %v3166_v18, %s3260_s25  ;;  %3157 = vrot.lane.b32.xlu1 %v3166_v18, %s3259_s24 }
 0x630   : > { %3162 = vrot.lane.b32.xlu2 %v3151_v4, %s3260_s25 }
 0x631   : > { %v1903_v37 = vsel %vm459_vm1, %v3100_v2, %v3135_v15  ;;  %v1907_v28 = vsel %vm459_vm1, %v3135_v15, %v3100_v2  ;;  %v1902_v10 = vsel %vm459_vm1, %v3099_v25, %v3134_v54  ;;  %v1906_v40 = vsel %vm459_vm1, %v3134_v54, %v3099_v25 }
 0x632   : > { %v1912_v47 = vsel %vm3394_vm2, %v1902_v10, %v1882_v27  ;;  %v1913_v63 = vsel %vm3398_vm3, %v1906_v40, %v1878_v3  ;;  %v1914_v4 = vsel %vm3394_vm2, %v1903_v37, %v1883_v43  ;;  %v1915_v6 = vsel %vm3398_vm3, %v1907_v28, %v1879_v59 }
 0x633   : > { %v2130_v38 = vpack.c.bf16 %v1914_v4, %v1912_v47  ;;  %v5151_v35 = vpack.c.bf16 %v1915_v6, %v1913_v63  ;;  %v5155_v18 = vsel %vm3402_vm4, %v1882_v27, %v1902_v10  ;;  %v5159_v16 = vsel %vm3402_vm4, %v1883_v43, %v1903_v37 }
 0x634   : > { %v5163_v5 = vsel %vm3406_vm5, %v1878_v3, %v1906_v40  ;;  %v3181_v60 = vpack.i.bf16 %v5159_v16, %v5155_v18  ;;  %v3171_v39 = vpack.i.bf16 %v1914_v4, %v1912_v47  ;;  %v5170_v42 = vsel %vm3406_vm5, %v1879_v59, %v1907_v28 }
 0x635   : > { %2220 = vmatpush.bf16.msra.mxu1 %v2130_v38  ;;  %2277 = vmatpush.bf16.msrb.mxu0 %v5151_v35  ;;  %v3105_v2 = vunpack.i.h.bf16 %v5033_v33  ;;  %v3176_v15 = vpack.i.bf16 %v1915_v6, %v1913_v63  ;;  %v5185_v33 = vpack.c.bf16 %v5081_v46, %v5077_v44  ;;  %v5208_v46 = vsel %vm524_vm6, %v3124_v26, %v3129_v51 }
 0x636   : > { %v3138_v25 = vpop.permute.xlu1 %3137  ;;  %v5214_v28 = vsel %vm524_vm6, %v3125_v22, %v3130_v19  ;;  %v3206_v10 = vpack.i.bf16 %v5170_v42, %v5163_v5 }
 0x637   : > { %v3140_v43 = vunpack.i.h.bf16 %v3138_v25  ;;  %v3139_v3 = vunpack.i.l.bf16 %v3138_v25  ;;  %3182 = vrot.lane.b32.xlu0 %v3181_v60, %s3259_s24  ;;  %3172 = vrot.lane.b32.xlu1 %v3171_v39, %s3260_s25  ;;  %v2144_v40 = vpack.c.bf16 %v5214_v28, %v5208_v46 }
 0x638   : > { %3177 = vrot.lane.b32.xlu2 %v3176_v15, %s3260_s25 }
 0x639   : > { %v5189_v27 = vsel %vm524_vm6, %v3105_v2, %v3140_v43  ;;  %v5193_v37 = vsel %vm524_vm6, %v3140_v43, %v3105_v2  ;;  %v5197_v34 = vsel %vm524_vm6, %v3104_v53, %v3139_v3  ;;  %v5201_v8 = vsel %vm524_vm6, %v3139_v3, %v3104_v53  ;;  %2221 = vmatpush.bf16.msra.mxu1 %v2128_v49 }
 0x63a   : > { %v2146_v44 = vpack.c.bf16 %v5189_v27, %v5197_v34  ;;  %2278 = vmatpush.bf16.msrb.mxu0 %v5185_v33 }
 0x63c   : > { %2239 = vmatpush.bf16.msra.mxu3 %v2146_v44 }
 0x63f   : > { %3207 = vrot.lane.b32.xlu0 %v3206_v10, %s3260_s25  ;;  %3187 = vrot.lane.b32.xlu1 %v3206_v10, %s3259_s24 }
 0x640   : > { %3197 = vrot.lane.b32.xlu2 %v3181_v60, %s3260_s25  ;;  %2240 = vmatpush.bf16.msra.mxu3 %v2144_v40 }
 0x647   : > { %3212 = vrot.lane.b32.xlu0 %v4991_v1, %s3259_s24  ;;  %3192 = vrot.lane.b32.xlu1 %v4999_v55, %s3259_s24  ;;  %v2163_v1 = vld [vmem:[%s5618_s9 + $0x18] sm:$0xff]  ;;  %v2161_v55 = vld [vmem:[%s5618_s9 + $0x8] sm:$0xff] }
 0x648   : > { %3202 = vrot.lane.b32.xlu2 %v5019_v12, %s3259_s24 }
 0x64f   : > { %3227 = vrot.lane.b32.xlu0 %v3176_v15, %s3259_s24  ;;  %3217 = vrot.lane.b32.xlu1 %v5009_v56, %s3259_s24  ;;  %v2162_v56 = vld [vmem:[%s5618_s9 + $0x10] sm:$0xff] }
 0x650   : > { %3222 = vrot.lane.b32.xlu2 %v3171_v39, %s3259_s24 }
 0x657   : > { %2166 = vperm.xlu0 %2759, %v2160_v50   ;;  %3232 = vrot.lane.b32.xlu1 %v5073_v41, %s3259_s24 }
 0x658   : > { %3237 = vrot.lane.b32.xlu2 %v5085_v45, %s3259_s24 }
 0x65f   : > { %2181 = vperm.xlu0 %2759, %v2163_v1   ;;  %2171 = vperm.xlu1 %2760, %v2161_v55  }
 0x660   : > { %2176 = vperm.xlu2 %2758, %v2162_v56  }
 0x682   : > { %v5249_v12 = vpop.permute.xlu2 %3147 }
 0x683   : > { %v5657_v25 = vunpack.i.h.bf16 %v5249_v12  ;;  %v5655_v15 = vunpack.i.l.bf16 %v5249_v12 }
 0x68a   : > { %v5251_v41 = vpop.permute.xlu2 %3162 }
 0x68b   : > { %v5746_v9 = vunpack.i.h.bf16 %v5251_v41 }
 0x692   : > { %v5257_v26 = vpop.permute.xlu2 %3177 }
 0x693   : > { %v5659_v63 = vunpack.i.h.bf16 %v5257_v26  ;;  %v5661_v4 = vunpack.i.l.bf16 %v5257_v26 }
 0x699   : > { %v5253_v45 = vpop.permute.xlu0 %3152  ;;  %v5255_v22 = vpop.permute.xlu1 %3142 }
 0x69a   : > { %v5261_v47 = vpop.permute.xlu2 %3197  ;;  %v5658_v60 = vunpack.i.h.bf16 %v5255_v22  ;;  %v5656_v39 = vunpack.i.l.bf16 %v5255_v22  ;;  %v3155_v56 = vunpack.i.h.bf16 %v5253_v45 }
 0x69c   : > { %v5297_v44 = vsel %vm524_vm6, %v5656_v39, %v5655_v15  ;;  %v5305_v10 = vsel %vm524_vm6, %v5658_v60, %v5657_v25  ;;  %v3154_v15 = vunpack.i.l.bf16 %v5253_v45  ;;  %v3200_v39 = vunpack.i.h.bf16 %v5261_v47 }
 0x69d   : > { %v3199_v25 = vunpack.i.l.bf16 %v5261_v47 }
 0x6a1   : > { %v5259_v19 = vpop.permute.xlu0 %3167  ;;  %v3158_v51 = vpop.permute.xlu1 %3157 }
 0x6a2   : > { %v3160_v50 = vunpack.i.h.bf16 %v3158_v51  ;;  %v3159_v1 = vunpack.i.l.bf16 %v3158_v51  ;;  %v5668_v59 = vunpack.i.l.bf16 %v5259_v19  ;;  %v2140_v51 = vpack.c.bf16 %v5305_v10, %v5297_v44 }
 0x6a3   : > { %v5745_v57 = vunpack.i.h.bf16 %v5259_v19 }
 0x6a4   : > { %v2073_v54 = vsel %vm390_vm7, %v3160_v50, %v3155_v56  ;;  %v2072_v45 = vsel %vm390_vm7, %v3159_v1, %v3154_v15 }
 0x6a9   : > { %v3183_v6 = vpop.permute.xlu0 %3182  ;;  %v5265_v38 = vpop.permute.xlu1 %3172 }
 0x6aa   : > { %v5660_v2 = vunpack.i.h.bf16 %v5265_v38  ;;  %v5662_v53 = vunpack.i.l.bf16 %v5265_v38  ;;  %v3185_v40 = vunpack.i.h.bf16 %v3183_v6  ;;  %v3184_v7 = vunpack.i.l.bf16 %v3183_v6 }
 0x6ab   : > { %v2093_v6 = vsel %vm524_vm6, %v5746_v9, %v5745_v57  ;;  %v5351_v9 = vsel %vm390_vm7, %v3154_v15, %v3159_v1  ;;  %v2530_v57 = vld [vmem:[%s5617_s8 + $0x8] sm:$0xf] }
 0x6ac   : > { %v5279_v43 = vsel %vm524_vm6, %v5662_v53, %v5661_v4  ;;  %v5287_v3 = vsel %vm524_vm6, %v5660_v2, %v5659_v63 }
 0x6ad   : > { %v2142_v49 = vpack.c.bf16 %v5287_v3, %v5279_v43 }
 0x6af   : > { %2241 = vmatpush.bf16.msra.mxu3 %v2142_v49  ;;  %v3203_v49 = vpop.permute.xlu2 %3202 }
 0x6b0   : > { %v3205_v1 = vunpack.i.h.bf16 %v3203_v49 }
 0x6b1   : > { %v3208_v60 = vpop.permute.xlu0 %3207  ;;  %v3188_v63 = vpop.permute.xlu1 %3187 }
 0x6b2   : > { %v3210_v2 = vunpack.i.h.bf16 %v3208_v60  ;;  %v3209_v4 = vunpack.i.l.bf16 %v3208_v60  ;;  %v3190_v53 = vunpack.i.h.bf16 %v3188_v63  ;;  %v3189_v11 = vunpack.i.l.bf16 %v3188_v63 }
 0x6b3   : > { %2242 = vmatpush.bf16.msra.mxu3 %v2140_v51  ;;  %v5744_v60 = vunpack.i.l.bf16 %v5251_v41 }
 0x6b4   : > { %v2094_v47 = vsel %vm524_vm6, %v3199_v25, %v3209_v4  ;;  %v2095_v55 = vsel %vm524_vm6, %v3200_v39, %v3210_v2  ;;  %v2075_v61 = vsel %vm390_vm7, %v3190_v53, %v3185_v40  ;;  %v2074_v52 = vsel %vm390_vm7, %v3189_v11, %v3184_v7 }
 0x6b5   : > { %v2092_v63 = vsel %vm524_vm6, %v5744_v60, %v5668_v59  ;;  %v2150_v51 = vpack.c.bf16 %v2095_v55, %v2094_v47  ;;  %v2070_v0 = vsel %vm390_vm7, %v3184_v7, %v3189_v11  ;;  %v2071_v60 = vsel %vm390_vm7, %v3185_v40, %v3190_v53  ;;  %v2573_v11 = vld [vmem:[%s5617_s8 + $0x10] sm:$0xf0] }
 0x6b6   : > { %v2104_v59 = vsel %vm390_vm7, %v2094_v47, %v2074_v52  ;;  %v2106_v62 = vsel %vm390_vm7, %v2095_v55, %v2075_v61  ;;  %v5747_v7 = vpack.c.bf16 %v5159_v16, %v5155_v18  ;;  %v5362_v52 = vpack.c.bf16 %v2071_v60, %v2070_v0 }
 0x6b7   : > { %2264 = vmatpush.bf16.msrb.mxu2 %v2150_v51  ;;  %v2126_v61 = vpack.c.bf16 %v2106_v62, %v2104_v59  ;;  %v2069_v53 = vsel %vm390_vm7, %v3155_v56, %v3160_v50  ;;  %v2100_v15 = vsel %vm390_vm7, %v2092_v63, %v2072_v45  ;;  %v2102_v40 = vsel %vm390_vm7, %v2093_v6, %v2073_v54 }
 0x6b8   : > { %2243 = vmatpush.bf16.msra.mxu3 %v5747_v7  ;;  %2279 = vmatpush.bf16.msrb.mxu0 %v5362_v52  ;;  %v2148_v16 = vpack.c.bf16 %v2093_v6, %v2092_v63  ;;  %v5373_v47 = vor.u32 %v2573_v11, %v2530_v57  ;;  %v3204_v62 = vunpack.i.l.bf16 %v3203_v49  ;;  %v5376_v50 = vpack.c.bf16 %v2069_v53, %v5351_v9  ;;  %v3223_v6 = vpop.permute.xlu2 %3222 }
 0x6b9   : > { %2222 = vmatpush.bf16.msra.mxu1 %v2126_v61  ;;  %v5371_v55 = vpop.permute.xlu0 %3212  ;;  %v3193_v18 = vpop.permute.xlu1 %3192  ;;  %v2098_v56 = vsel %vm524_vm6, %v3209_v4, %v3199_v25  ;;  %v2099_v54 = vsel %vm524_vm6, %v3210_v2, %v3200_v39  ;;  %v5748_v45 = vpack.c.bf16 %v5057_v21, %v5053_v32  ;;  %v2124_v63 = vpack.c.bf16 %v2102_v40, %v2100_v15  ;;  %v2571_v2 = vld [vmem:[%s5617_s8 + $0x4] sm:$0xf]  ;;  %v2524_v25 = vld [vmem:[%s5617_s8 + $0xc] sm:$0xf0] }
 0x6ba   : > { %v3195_v59 = vunpack.i.h.bf16 %v3193_v18  ;;  %v3194_v51 = vunpack.i.l.bf16 %v3193_v18  ;;  %v5749_v7 = vunpack.i.l.bf16 %v5251_v41  ;;  %v5750_v61 = vunpack.i.l.bf16 %v5259_v19 }
 0x6bb   : > { %2265 = vmatpush.bf16.msrb.mxu2 %v2148_v16  ;;  %v2113_v18 = vsel %vm393_vm8, %v2070_v0, %v2098_v56  ;;  %v2115_v16 = vsel %vm393_vm8, %v2071_v60, %v2099_v54 }
 0x6bc   : > { %2244 = vmatpush.bf16.msra.mxu3 %v5748_v45  ;;  %v2010_v49 = vsel %vm390_vm7, %v3204_v62, %v3194_v51  ;;  %v2011_v57 = vsel %vm390_vm7, %v3205_v1, %v3195_v59  ;;  %v2006_v4 = vsel %vm390_vm7, %v3194_v51, %v3204_v62  ;;  %v2007_v39 = vsel %vm390_vm7, %v3195_v59, %v3205_v1 }
 0x6bd   : > { %2280 = vmatpush.bf16.msrb.mxu0 %v5376_v50  ;;  %2223 = vmatpush.bf16.msra.mxu1 %v2124_v63  ;;  %v5398_v32 = vsel %vm393_vm8, %v2006_v4, %v5201_v8  ;;  %v5403_v21 = vsel %vm393_vm8, %v2007_v39, %v5193_v37  ;;  %v2040_v8 = vsel %vm390_vm7, %v5197_v34, %v2010_v49  ;;  %v5751_v1 = vunpack.i.h.bf16 %v5251_v41 }
 0x6be   : > { %2544 = vmatmul.msk.bf16.vlgmr.msrb.gmra.mxu2 %vm775_vm9, %v5373_v47  ;;  %v2042_v37 = vsel %vm390_vm7, %v5189_v27, %v2011_v57  ;;  %v2147_v11 = vpack.c.bf16 %v5403_v21, %v5398_v32  ;;  %v2096_v15 = vsel %vm524_vm6, %v5750_v61, %v5749_v7  ;;  %v5752_v34 = vunpack.i.h.bf16 %v5259_v19  ;;  %v2542_v7 = vld [vmem:[%s5617_s8 + $0x20] sm:$0xf] }
 0x6bf   : > { %2577 = vmatpush.bf16.msra.mxu2 %v5151_v35  ;;  %v5405_v35 = vpack.c.bf16 %v2007_v39, %v2006_v4  ;;  %v2122_v40 = vpack.c.bf16 %v2042_v37, %v2040_v8  ;;  %v5441_v62 = vor.u32 %v2571_v2, %v2524_v25  ;;  %v3225_v59 = vunpack.i.h.bf16 %v3223_v6 }
 0x6c0   : > { %2245 = vmatpush.bf16.msra.mxu3 %v5001_v24  ;;  %v2097_v27 = vsel %vm524_vm6, %v5752_v34, %v5751_v1  ;;  %v3224_v24 = vunpack.i.l.bf16 %v3223_v6  ;;  %v3215_v51 = vunpack.i.h.bf16 %v5371_v55  ;;  %v3214_v41 = vunpack.i.l.bf16 %v5371_v55  ;;  %v3238_v2 = vpop.permute.xlu2 %3237 }
 0x6c1   : > { %2281 = vmatpush.bf16.msrb.mxu0 %v5405_v35  ;;  %2224 = vmatpush.bf16.msra.mxu1 %v2122_v40  ;;  %v3228_v19 = vpop.permute.xlu0 %3227  ;;  %v3218_v45 = vpop.permute.xlu1 %3217  ;;  %v2109_v60 = vsel %vm393_vm8, %v5351_v9, %v2096_v15  ;;  %v2111_v54 = vsel %vm393_vm8, %v2069_v53, %v2097_v27  ;;  %v3240_v34 = vunpack.i.h.bf16 %v3238_v2  ;;  %v3239_v27 = vunpack.i.l.bf16 %v3238_v2  ;;  %v2534_v2 = vld [vmem:[%s5617_s8 + $0x18] sm:$0xf] }
 0x6c2   : > { %v3230_v63 = vunpack.i.h.bf16 %v3228_v19  ;;  %v3229_v0 = vunpack.i.l.bf16 %v3228_v19  ;;  %v3220_v56 = vunpack.i.h.bf16 %v3218_v45  ;;  %v3219_v49 = vunpack.i.l.bf16 %v3218_v45  ;;  %v2572_v19 = vld [vmem:[%s5617_s8 + $0x8] sm:$0xf0] }
 0x6c3   : > { %2578 = vmatpush.bf16.msra.mxu2 %v5185_v33  ;;  %v2151_v33 = vpack.c.bf16 %v2115_v16, %v2113_v18 }
 0x6c4   : > { %2246 = vmatpush.bf16.msra.mxu3 %v4993_v30  ;;  %v1946_v55 = vsel %vm390_vm7, %v3229_v0, %v3224_v24  ;;  %v1947_v6 = vsel %vm390_vm7, %v3230_v63, %v3225_v59  ;;  %v2009_v57 = vsel %vm390_vm7, %v3220_v56, %v3215_v51  ;;  %v2008_v30 = vsel %vm390_vm7, %v3219_v49, %v3214_v41 }
 0x6c5   : > { %v2004_v9 = vsel %vm390_vm7, %v3214_v41, %v3219_v49  ;;  %v2005_v53 = vsel %vm390_vm7, %v3215_v51, %v3220_v56  ;;  %v2036_v4 = vsel %vm390_vm7, %v5208_v46, %v2008_v30  ;;  %v2038_v39 = vsel %vm390_vm7, %v5214_v28, %v2009_v57  ;;  %v2576_v46 = vld [vmem:[%s5617_s8 + $0x28] sm:$0xf0] }
 0x6c6   : > { %v2121_v25 = vpack.c.bf16 %v2005_v53, %v2004_v9  ;;  %v2120_v8 = vpack.c.bf16 %v2038_v39, %v2036_v4  ;;  %v1942_v37 = vsel %vm390_vm7, %v3224_v24, %v3229_v0  ;;  %v1943_v28 = vsel %vm390_vm7, %v3225_v59, %v3230_v63 }
 0x6c7   : > { %2579 = vmatpush.bf16.msra.mxu2 %v5362_v52  ;;  %2247 = vmatmul.bf16.vlgmr.msra.gmra.mxu3 %v5441_v62  ;;  %v2149_v52 = vpack.c.bf16 %v2111_v54, %v2109_v60  ;;  %v1976_v61 = vsel %vm390_vm7, %v5279_v43, %v1946_v55  ;;  %v1978_v15 = vsel %vm390_vm7, %v5287_v3, %v1947_v6  ;;  %v2536_v60 = vld [vmem:[%s5617_s8 + $0x24] sm:$0xf0]  ;;  %v5754_v54 = vunpack.i.l.bf16 %v5257_v26 }
 0x6c8   : > { %2321 = vmatpush.bf16.msrb.mxu3 %v2151_v33  ;;  %v2045_v40 = vsel %vm393_vm8, %v2004_v9, %v5112_v20  ;;  %2282 = vmatpush.bf16.msrb.mxu0 %v2121_v25  ;;  %v2047_v1 = vsel %vm393_vm8, %v2005_v53, %v5118_v17  ;;  %v2543_v18 = vor.u32 %v2576_v46, %v2542_v7  ;;  %v5755_v6 = vunpack.i.h.bf16 %v5265_v38 }
 0x6c9   : > { %2225 = vmatpush.bf16.msra.mxu1 %v2120_v8  ;;  %v3233_v43 = vpop.permute.xlu1 %3232  ;;  %v2145_v16 = vpack.c.bf16 %v2047_v1, %v2045_v40  ;;  %v2119_v24 = vpack.c.bf16 %v1943_v28, %v1942_v37  ;;  %v2118_v51 = vpack.c.bf16 %v1978_v15, %v1976_v61  ;;  %v5756_v57 = vunpack.i.h.bf16 %v5257_v26 }
 0x6ca   : > { %v3235_v59 = vunpack.i.h.bf16 %v3233_v43  ;;  %v3234_v3 = vunpack.i.l.bf16 %v3233_v43  ;;  %v5759_v9 = vunpack.i.h.bf16 %v5255_v22  ;;  %v5760_v53 = vunpack.i.h.bf16 %v5249_v12 }
 0x6cb   : > { %2580 = vmatpush.bf16.msra.mxu2 %v5376_v50  ;;  %v2522_v50 = vld [vmem:[%s5617_s8] sm:$0xf]  ;;  %v1971_v30 = vsel %vm524_vm6, %v5756_v57, %v5755_v6  ;;  %v3244_v6 = vld [vmem:[%s3335_s21 + $0x30] sm:$0xff] }
 0x6cc   : > { %2322 = vmatpush.bf16.msrb.mxu3 %v2149_v52  ;;  %v1944_v20 = vsel %vm390_vm7, %v3239_v27, %v3234_v3  ;;  %v1945_v41 = vsel %vm390_vm7, %v3240_v34, %v3235_v59  ;;  %2283 = vmatpush.bf16.msrb.mxu0 %v2119_v24  ;;  %v1940_v17 = vsel %vm390_vm7, %v3234_v3, %v3239_v27 }
 0x6cd   : > { %2226 = vmatpush.bf16.msra.mxu1 %v2118_v51  ;;  %v1941_v45 = vsel %vm390_vm7, %v3235_v59, %v3240_v34  ;;  %v1972_v63 = vsel %vm390_vm7, %v5297_v44, %v1944_v20  ;;  %v1974_v0 = vsel %vm390_vm7, %v5305_v10, %v1945_v41  ;;  %v2523_v33 = vor.u32 %v2572_v19, %v2522_v50 }
 0x6ce   : > { %2545 = vmatmul.msk.bf16.gmra.mxu2 %vm775_vm9, %v2543_v18  ;;  %v2117_v56 = vpack.c.bf16 %v1941_v45, %v1940_v17  ;;  %v2116_v49 = vpack.c.bf16 %v1974_v0, %v1972_v63  ;;  %v5753_v10 = vunpack.i.l.bf16 %v5265_v38  ;;  %v1987_v21 = vsel %vm393_vm8, %v1943_v28, %v1971_v30  ;;  %v3243_v63 = vld [vmem:[%s3335_s21 + $0x20] sm:$0xff] }
 0x6cf   : > { %2581 = vmatpush.bf16.msra.mxu2 %v5405_v35  ;;  %v2574_v35 = vld [vmem:[%s5617_s8 + $0x1c] sm:$0xf]  ;;  %v5758_v38 = vunpack.i.l.bf16 %v5249_v12  ;;  %v1969_v4 = vsel %vm524_vm6, %v5760_v53, %v5759_v9  ;;  %v5761_v52 = vpack.c.bf16 %v5170_v42, %v5163_v5  ;;  %v2167_v42 = vpop.permute.xlu0 %2166  ;;  %v3245_v53 = vld [vmem:[%s3335_s21 + $0x8] sm:$0xff] }
 0x6d0   : > { %2284 = vmatpush.bf16.msrb.mxu0 %v2117_v56  ;;  %v2539_v44 = vor.u32 %v2574_v35, %v2536_v60  ;;  %v1970_v55 = vsel %vm524_vm6, %v5754_v54, %v5753_v10  ;;  %v5764_v10 = vld [vmem:[#allocation6_spill] sm:$0xff] }
 0x6d1   : > { %2227 = vmatpush.bf16.msra.mxu1 %v2116_v49  ;;  %v1985_v32 = vsel %vm393_vm8, %v1942_v37, %v1970_v55  ;;  %v5762_v37 = vpack.c.bf16 %v5093_v36, %v5089_v23 }
 0x6d2   : > { %v2143_v39 = vpack.c.bf16 %v1987_v21, %v1985_v32 }
 0x6d3   : > { %2582 = vmatpush.bf16.msra.mxu2 %v2121_v25  ;;  %2285 = vmatmul.bf16.vlgmr.msrb.gmra.mxu0 %v2523_v33  ;;  %v2575_v25 = vld [vmem:[%s5617_s8 + $0x20] sm:$0xf0] }
 0x6d4   : > { %2228 = vmatmul.bf16.vlgmr.msra.gmra.mxu1 %v2523_v33  ;;  %v2535_v12 = vor.u32 %v2575_v25, %v2534_v2 }
 0x6d5   : > { %2296 = vmatpush.bf16.msrb.mxu1 %v2147_v11  ;;  %v5757_v11 = vunpack.i.l.bf16 %v5255_v22  ;;  %v1983_v22 = vsel %vm393_vm8, %v1941_v45, %v1969_v4 }
 0x6d7   : > { %2583 = vmatpush.bf16.msra.mxu2 %v2119_v24  ;;  %2252 = vmatmul.bf16.gmra.mxu3 %v2539_v44  ;;  %v1968_v26 = vsel %vm524_vm6, %v5758_v38, %v5757_v11  ;;  %v2182_v19 = vpop.permute.xlu0 %2181  ;;  %v5765_v11 = vld [vmem:[#allocation7_spill] sm:$0xff] }
 0x6d8   : > { %v1981_v8 = vsel %vm393_vm8, %v1940_v17, %v1968_v26  ;;  %v5763_v17 = vld [vmem:[#allocation5_spill] sm:$0xff] }
 0x6d9   : > { %2297 = vmatpush.bf16.msrb.mxu1 %v2145_v16  ;;  %v2141_v29 = vpack.c.bf16 %v1983_v22, %v1981_v8  ;;  %v3242_v16 = vld [vmem:[%s3335_s21 + $0x10] sm:$0xff] }
 0x6da   : > { %v5766_v22 = vld [vmem:[#allocation8_spill] sm:$0xff] }
 0x6db   : > { %2584 = vmatpush.bf16.msra.mxu2 %v2117_v56 }
 0x6dd   : > { %2298 = vmatpush.bf16.msrb.mxu1 %v2143_v39 }
 0x6de   : > { %2290 = vmatmul.bf16.vlgmr.msra.gmra.mxu2 %v2535_v12 }
 0x6e1   : > { %2299 = vmatpush.bf16.msrb.mxu1 %v2141_v29 }
 0x6e4   : > { %2233 = vmatmul.bf16.gmra.mxu1 %v2535_v12 }
 0x6e5   : > { %2300 = vmatpush.bf16.msrb.mxu1 %v5761_v52  ;;  %v3246_v52 = vld [vmem:[%s3335_s21 + $0x18] sm:$0xff] }
 0x6e7   : > { %2546 = vmatmul.msk.bf16.vlgmr.msrb.gmra.mxu3 %vm775_vm9, %v5373_v47  ;;  %v2172_v47 = vpop.permute.xlu1 %2171 }
 0x6e9   : > { %2301 = vmatpush.bf16.msrb.mxu1 %v5762_v37 }
 0x6ed   : > { %2302 = vmatpush.bf16.msrb.mxu1 %v5021_v58 }
 0x6f1   : > { %2303 = vmatpush.bf16.msrb.mxu1 %v5011_v48 }
 0x6f4   : > { %2304 = vmatmul.bf16.vlgmr.msrb.gmra.mxu1 %v5441_v62  ;;  %v3241_v62 = vld [vmem:[%s3335_s21] sm:$0xff] }
 0x6f7   : > { %2547 = vmatmul.msk.bf16.gmra.mxu3 %vm775_vm9, %v2543_v18 }
 0x704   : > { %2309 = vmatmul.bf16.gmra.mxu1 %v2539_v44 }
 0x741   : > { %v2267_v5 = vpop.f32.mrf.mxu2 }
 0x749   : > { %v2269_v61 = vpop.f32.mrf.mxu2 }
 0x74a   : > { %v2248_v31 = vpop.f32.mrf.mxu3 }
 0x750   : > { %v2286_v56 = vpop.f32.mrf.mxu0 }
 0x751   : > { %v2229_v7 = vpop.f32.mrf.mxu1  ;;  %v2272_v24 = vpop.f32.mrf.mxu2  ;;  %v2287_v44 = vadd.f32 %v2286_v56, %v2167_v42 }
 0x752   : > { %v2230_v23 = vadd.f32 %v2229_v7, %v2167_v42  ;;  %v2250_v36 = vpop.f32.mrf.mxu3 }
 0x754   : > { %v2249_v46 = vadd.f32 %v2248_v31, %v2230_v23 }
 0x756   : > { %v2268_v28 = vadd.f32 %v2267_v5, %v2249_v46 }
 0x758   : > { %v2334_v58 = vadd.f32 %v2268_v28, %v4432_v14  ;;  %v2177_v14 = vpop.permute.xlu2 %2176  ;;  %v2288_v21 = vpop.f32.mrf.mxu0 }
 0x759   : > { %v2231_v48 = vpop.f32.mrf.mxu1  ;;  %v2274_v33 = vpop.f32.mrf.mxu2  ;;  %v2289_v9 = vadd.f32 %v2288_v21, %v2172_v47 }
 0x75a   : > { %v2342_v15 = vadd.f32 %v3241_v62, %v2334_v58  ;;  %v2232_v40 = vadd.f32 %v2231_v48, %v2172_v47  ;;  %v2253_v1 = vpop.f32.mrf.mxu3  ;;  %v3247_v47 = vld [vmem:[%s3335_s21 + $0x28] sm:$0xff] }
 0x75c   : > { %2350 = vst [vmem:[%s5581_s22] sm:$0xff] %v2342_v15  ;;  %v2251_v34 = vadd.f32 %v2250_v36, %v2232_v40  ;;  %v5767_v36 = vld [vmem:[#allocation9_spill] sm:$0xff]  ;;  %v5768_v40 = vld [vmem:[#allocation10_spill] sm:$0xff] }
 0x75e   : > { %v2270_v27 = vadd.f32 %v2269_v61, %v2251_v34  ;;  %v3248_v34 = vld [vmem:[%s3335_s21 + $0x38] sm:$0xff] }
 0x760   : > { %v2336_v43 = vadd.f32 %v2270_v27, %v4434_v13 }
 0x761   : > { %v2234_v18 = vpop.f32.mrf.mxu1  ;;  %v2291_v25 = vpop.f32.mrf.mxu2 }
 0x762   : > { %v2344_v59 = vadd.f32 %v3242_v16, %v2336_v43  ;;  %v2235_v3 = vadd.f32 %v2234_v18, %v2177_v14  ;;  %v2255_v51 = vpop.f32.mrf.mxu3  ;;  %v2292_v29 = vadd.f32 %v2291_v25, %v2177_v14 }
 0x764   : > { %2352 = vst [vmem:[%s5581_s22 + $0x10] sm:$0xff] %v2344_v59  ;;  %v2254_v20 = vadd.f32 %v2253_v1, %v2235_v3 }
 0x766   : > { %v2273_v41 = vadd.f32 %v2272_v24, %v2254_v20 }
 0x768   : > { %v2338_v50 = vadd.f32 %v2273_v41, %v5763_v17 }
 0x769   : > { %v2236_v45 = vpop.f32.mrf.mxu1  ;;  %v2293_v23 = vpop.f32.mrf.mxu2 }
 0x76a   : > { %v2346_v0 = vadd.f32 %v3243_v63, %v2338_v50  ;;  %v2237_v13 = vadd.f32 %v2236_v45, %v2182_v19  ;;  %v2324_v35 = vpop.f32.mrf.mxu3  ;;  %v2294_v28 = vadd.f32 %v2293_v23, %v2182_v19 }
 0x76c   : > { %2354 = vst [vmem:[%s5581_s22 + $0x20] sm:$0xff] %v2346_v0  ;;  %v2256_v49 = vadd.f32 %v2255_v51, %v2237_v13 }
 0x76e   : > { %v2275_v60 = vadd.f32 %v2274_v33, %v2256_v49 }
 0x770   : > { %v2340_v54 = vadd.f32 %v2275_v60, %v5764_v10 }
 0x771   : > { %v2305_v55 = vpop.f32.mrf.mxu1 }
 0x772   : > { %v2348_v57 = vadd.f32 %v3244_v6, %v2340_v54  ;;  %v2306_v30 = vadd.f32 %v2305_v55, %v2287_v44  ;;  %v2326_v26 = vpop.f32.mrf.mxu3 }
 0x774   : > { %2356 = vst [vmem:[%s5581_s22 + $0x30] sm:$0xff] %v2348_v57  ;;  %v2325_v32 = vadd.f32 %v2324_v35, %v2306_v30 }
 0x776   : > { %v2335_v38 = vadd.f32 %v2325_v32, %v5765_v11 }
 0x778   : > { %v2343_v4 = vadd.f32 %v3245_v53, %v2335_v38 }
 0x779   : > { %v2307_v39 = vpop.f32.mrf.mxu1 }
 0x77a   : > { %2351 = vst [vmem:[%s5581_s22 + $0x8] sm:$0xff] %v2343_v4  ;;  %v2308_v2 = vadd.f32 %v2307_v39, %v2289_v9  ;;  %v2329_v31 = vpop.f32.mrf.mxu3 }
 0x77c   : > { %v2327_v8 = vadd.f32 %v2326_v26, %v2308_v2 }
 0x77e   : > { %v2337_v12 = vadd.f32 %v2327_v8, %v5766_v22 }
 0x780   : > { %v2345_v37 = vadd.f32 %v3246_v52, %v2337_v12 }
 0x781   : > { %v2310_v5 = vpop.f32.mrf.mxu1 }
 0x782   : > { %2353 = vst [vmem:[%s5581_s22 + $0x18] sm:$0xff] %v2345_v37  ;;  %v2311_v42 = vadd.f32 %v2310_v5, %v2292_v29  ;;  %v2331_v62 = vpop.f32.mrf.mxu3 }
 0x784   : > { %v2330_v7 = vadd.f32 %v2329_v31, %v2311_v42 }
 0x786   : > { %v2339_v46 = vadd.f32 %v2330_v7, %v5767_v36 }
 0x788   : > { %v2347_v58 = vadd.f32 %v3247_v47, %v2339_v46 }
 0x789   : > { %v2312_v61 = vpop.f32.mrf.mxu1 }
 0x78a   : > { %2355 = vst [vmem:[%s5581_s22 + $0x28] sm:$0xff] %v2347_v58  ;;  %v2313_v48 = vadd.f32 %v2312_v61, %v2294_v28 }
 0x78c   : > { %v2332_v15 = vadd.f32 %v2331_v62, %v2313_v48 }
 0x78e   : > { %v2341_v1 = vadd.f32 %v2332_v15, %v5768_v40 }
 0x790   : > { %v2349_v27 = vadd.f32 %v3248_v34, %v2341_v1 }
 0x792   : > { %2357 = vst [vmem:[%s5581_s22 + $0x38] sm:$0xff] %v2349_v27 }
 0x793 PF: > { %s20_s13 = sadd.s32 1, %s3255_s13  }
 0x794   : > { %p17_p4 = scmp.ge.s32.totalorder %s20_s13, 4  }
 0x796   :  { %19 = sbr.rel (!%p17_p4) target bundleno = 1 (0x1), region = 93 }

</bundles_post_ra>
